<compile_context>
chip_gen: v6e
topology: v6e:2x2x1
jax: 0.10.0
libtpu: 0.0.40
codegen_flags: <defaults>
</compile_context>

<pallas_src>
import math

import jax
import jax.numpy as jnp
from jax.experimental import pallas as pl
from jax.experimental.pallas import tpu as pltpu

D_MODEL = 32
N_HEAD = 4
D_HEAD = D_MODEL // N_HEAD
D_FF = 64
NUM_LAYERS = 2
LN_EPS = 1e-5
NEG_INF = -1e30


# ---------------------------------------------------------------------------
# Fully fused decoder kernel (single pallas_call, no grid)
# ---------------------------------------------------------------------------

def _make_decoder_kernel(batch, nq, ns):
    """batch, nq (=Q*B), ns (=S*B) are static Python ints closed over."""
    scale = 1.0 / math.sqrt(D_HEAD)

    def kernel(tgt_ref, mem_ref, qpos_ref, pos_ref,
               attn_w_ref, ffn_w_ref, pblob_ref, out_ref):
        x = tgt_ref[...]                 # (nq, D) interleaved batch rows
        qpos = qpos_ref[...]             # (nq, D)
        mem = mem_ref[...]               # (ns, D)
        mem_p = mem + pos_ref[...]       # cross-attn key input (hoisted)

        # ---- batch block-diagonal additive masks, generated in-kernel ----
        def batch_mask(nrows, ncols):
            rb = jax.lax.broadcasted_iota(jnp.int32, (nrows, ncols), 0) % batch
            cb = jax.lax.broadcasted_iota(jnp.int32, (nrows, ncols), 1) % batch
            return jnp.where(rb == cb, 0.0, NEG_INF).astype(jnp.float32)

        self_mask = batch_mask(nq, nq)     # (nq, nq)
        cross_mask = batch_mask(nq, ns)    # (nq, ns)

        # ---- per-head lane masks (1, D), built once (comparisons only) ----
        lane = jax.lax.broadcasted_iota(jnp.int32, (1, D_MODEL), 1)
        head_masks = [
            jnp.where((lane >= h * D_HEAD) & (lane < (h + 1) * D_HEAD),
                      1.0, 0.0).astype(jnp.float32)
            for h in range(N_HEAD)
        ]

        def layer_norm(v, g, b):
            mu = jnp.mean(v, axis=-1, keepdims=True)
            vc = v - mu
            var = jnp.mean(vc * vc, axis=-1, keepdims=True)
            return vc * jax.lax.rsqrt(var + LN_EPS) * g + b

        def attention(q_in, k_in, v_in, wq, bq, wk, bk, wv, bv, wo, bo, mask):
            # Full-width projections; scale folded into q once.
            q = (jnp.dot(q_in, wq, preferred_element_type=jnp.float32) + bq) * scale
            k = jnp.dot(k_in, wk, preferred_element_type=jnp.float32) + bk
            v = jnp.dot(v_in, wv, preferred_element_type=jnp.float32) + bv
            av = jnp.zeros((q_in.shape[0], D_MODEL), jnp.float32)
            for h in range(N_HEAD):            # static unroll, no lane slicing
                hm = head_masks[h]             # (1, D): 1 on this head's lanes
                # full 32-lane contraction; non-head lanes of k are zeroed.
                s = jax.lax.dot_general(
                    q, k * hm, (((1,), (1,)), ((), ())),
                    preferred_element_type=jnp.float32) + mask
                s = s - jnp.max(s, axis=-1, keepdims=True)
                p = jnp.exp(s)
                p = p / jnp.sum(p, axis=-1, keepdims=True)   # exact divide
                # masked V => head h's contribution lands in its own columns.
                av = av + jnp.dot(p, v * hm, preferred_element_type=jnp.float32)
            # single output projection for all heads.
            return jnp.dot(av, wo, preferred_element_type=jnp.float32) + bo

        for l in range(NUM_LAYERS):
            aw = attn_w_ref[l]     # (32, 256): sa_q|sa_k|sa_v|sa_o|ca_q|ca_k|ca_v|ca_o
            fw = ffn_w_ref[l]      # (64, 96):  rows0:32,cols0:64 = w1 ; cols64:96 = w2 (64x32)
            pb = pblob_ref[l]      # (5, 128):  packed biases / LN params

            sa_q_w = aw[:, 0:32];    sa_k_w = aw[:, 32:64]
            sa_v_w = aw[:, 64:96];   sa_o_w = aw[:, 96:128]
            ca_q_w = aw[:, 128:160]; ca_k_w = aw[:, 160:192]
            ca_v_w = aw[:, 192:224]; ca_o_w = aw[:, 224:256]
            w1 = fw[:D_MODEL, :D_FF]           # (32, 64)
            w2 = fw[:, D_FF:]                  # (64, 32)

            # pblob row layout (see init_params):
            sa_q_b, sa_k_b = pb[0:1, 0:32],  pb[0:1, 32:64]
            sa_v_b, sa_o_b = pb[0:1, 64:96], pb[0:1, 96:128]
            ca_q_b, ca_k_b = pb[1:2, 0:32],  pb[1:2, 32:64]
            ca_v_b, ca_o_b = pb[1:2, 64:96], pb[1:2, 96:128]
            b1, b2 = pb[2:3, 0:64], pb[2:3, 64:96]
            n1_g, n1_b = pb[3:4, 0:32],  pb[3:4, 32:64]
            n2_g, n2_b = pb[3:4, 64:96], pb[3:4, 96:128]
            n3_g, n3_b = pb[4:5, 0:32],  pb[4:5, 32:64]

            # --- self attention (q = k = tgt + query_pos, value = tgt) ---
            q_in = x + qpos
            sa = attention(q_in, q_in, x,
                           sa_q_w, sa_q_b, sa_k_w, sa_k_b, sa_v_w, sa_v_b,
                           sa_o_w, sa_o_b, self_mask)
            x = layer_norm(x + sa, n1_g, n1_b)

            # --- cross attention (q = x + query_pos, k = memory + pos, v = memory) ---
            ca = attention(x + qpos, mem_p, mem,
                           ca_q_w, ca_q_b, ca_k_w, ca_k_b, ca_v_w, ca_v_b,
                           ca_o_w, ca_o_b, cross_mask)
            x = layer_norm(x + ca, n2_g, n2_b)

            # --- feed-forward ---
            hid = jnp.maximum(
                jnp.dot(x, w1, preferred_element_type=jnp.float32) + b1, 0.0)
            ff = jnp.dot(hid, w2, preferred_element_type=jnp.float32) + b2
            x = layer_norm(x + ff, n3_g, n3_b)

        # final decoder norm params stored in layer 0's pblob, row 4 cols 64:128
        pb0 = pblob_ref[0]
        fn_g, fn_b = pb0[4:5, 64:96], pb0[4:5, 96:128]
        out_ref[...] = layer_norm(x, fn_g, fn_b).astype(out_ref.dtype)

    return kernel


# ---------------------------------------------------------------------------
# JAX wrapper (one pallas_call per forward, 7 operands total)
# ---------------------------------------------------------------------------

def transformer_decoder_forward(tgt, memory, pos, query_pos, params,
                                num_frames=4, seq_len=196):
    """Mirrors TransformerDecoder.forward with return_intermediate=False."""
    q, b, d = tgt.shape
    s = memory.shape[0]
    nq, ns = q * b, s * b

    # Free reshapes (no transposes): row r = (seq_idx, batch_idx=r % b).
    tgt2 = tgt.reshape(nq, d)
    mem2 = memory.reshape(ns, d)
    qpos2 = query_pos.reshape(nq, d)
    pos2 = pos.reshape(ns, d)

    vm = pl.BlockSpec(memory_space=pltpu.MemorySpace.VMEM)
    kernel = _make_decoder_kernel(b, nq, ns)

    out2 = pl.pallas_call(
        kernel,
        out_shape=jax.ShapeDtypeStruct((nq, d), tgt.dtype),
        in_specs=[vm] * 7,
        out_specs=vm,
    )(tgt2, mem2, qpos2, pos2,
      params["attn_w"], params["ffn_w"], params["pblob"])

    output = out2.reshape(q, b, d)            # free view back to (Q, B, D)
    attns, self_attns = [], []                # never appended in reference forward
    return output[None], attns, self_attns    # == output.unsqueeze(0)


# ---------------------------------------------------------------------------
# Deterministic parameter construction: pack once at init into 3 blobs
# ---------------------------------------------------------------------------

def init_params(key):
    keys = iter(jax.random.split(key, 32))

    def dense(shape, scl=0.05):
        return scl * jax.random.normal(next(keys), shape, jnp.float32)

    L, D, F = NUM_LAYERS, D_MODEL, D_FF

    # Weights stored pre-transposed as (Din, Dout): y = x @ W.
    sa_q_w, sa_k_w, sa_v_w, sa_o_w = (dense((L, D, D)) for _ in range(4))
    ca_q_w, ca_k_w, ca_v_w, ca_o_w = (dense((L, D, D)) for _ in range(4))
    w1 = dense((L, D, F))
    w2 = dense((L, F, D))

    sa_q_b, sa_k_b, sa_v_b, sa_o_b = (dense((L, D)) for _ in range(4))
    ca_q_b, ca_k_b, ca_v_b, ca_o_b = (dense((L, D)) for _ in range(4))
    b1 = dense((L, F))
    b2 = dense((L, D))

    ones = jnp.ones((L, D), jnp.float32)
    zeros = jnp.zeros((L, D), jnp.float32)
    n1_g, n1_b, n2_g, n2_b, n3_g, n3_b = ones, zeros, ones, zeros, ones, zeros
    fn_g, fn_b = ones, zeros          # final norm (only layer 0's copy is read)

    # --- pack attention weights: (L, 32, 256) ---
    attn_w = jnp.concatenate(
        [sa_q_w, sa_k_w, sa_v_w, sa_o_w, ca_q_w, ca_k_w, ca_v_w, ca_o_w], axis=-1)

    # --- pack FFN weights: (L, 64, 96) ---
    w1_pad = jnp.concatenate([w1, jnp.zeros((L, D, F), jnp.float32)], axis=1)  # (L,64,64)
    ffn_w = jnp.concatenate([w1_pad, w2], axis=-1)                             # (L,64,96)

    # --- pack biases / LN params: (L, 5, 128) ---
    z32 = jnp.zeros((L, D), jnp.float32)
    row0 = jnp.concatenate([sa_q_b, sa_k_b, sa_v_b, sa_o_b], axis=-1)   # (L,128)
    row1 = jnp.concatenate([ca_q_b, ca_k_b, ca_v_b, ca_o_b], axis=-1)
    row2 = jnp.concatenate([b1, b2, z32], axis=-1)
    row3 = jnp.concatenate([n1_g, n1_b, n2_g, n2_b], axis=-1)
    row4 = jnp.concatenate([n3_g, n3_b, fn_g, fn_b], axis=-1)
    pblob = jnp.stack([row0, row1, row2, row3, row4], axis=1)           # (L,5,128)

    return {"attn_w": attn_w, "ffn_w": ffn_w, "pblob": pblob}


if __name__ == "__main__":
    key = jax.random.PRNGKey(0)
    k_p, k_t, k_m, k_qp, k_pos = jax.random.split(key, 5)

    Q, B, S = 8, 2, 16
    params = init_params(k_p)
    tgt = jax.random.normal(k_t, (Q, B, D_MODEL), jnp.float32)
    memory = jax.random.normal(k_m, (S, B, D_MODEL), jnp.float32)
    query_pos = jax.random.normal(k_qp, (Q, B, D_MODEL), jnp.float32)
    pos = jax.random.normal(k_pos, (S, B, D_MODEL), jnp.float32)

    fwd = jax.jit(transformer_decoder_forward)
    out, attns, self_attns = fwd(tgt, memory, pos, query_pos, params)
    out = jax.block_until_ready(out)

    assert out.shape == (1, Q, B, D_MODEL), out.shape
    assert attns == [] and self_attns == []
    assert bool(jnp.all(jnp.isfinite(out)))
    print("KERNEL_OK")
</pallas_src>

<mosaic_0001>
module attributes {stable_mosaic.version = 11 : i64} {
  func.func @kernel(%arg0: memref<16x32xf32, #tpu.memory_space<vmem>>, %arg1: memref<32x32xf32, #tpu.memory_space<vmem>>, %arg2: memref<16x32xf32, #tpu.memory_space<vmem>>, %arg3: memref<32x32xf32, #tpu.memory_space<vmem>>, %arg4: memref<2x32x256xf32, #tpu.memory_space<vmem>>, %arg5: memref<2x64x96xf32, #tpu.memory_space<vmem>>, %arg6: memref<2x5x128xf32, #tpu.memory_space<vmem>>, %arg7: memref<16x32xf32, #tpu.memory_space<vmem>>) attributes {dimension_semantics = [], scalar_prefetch = 0 : i64, scratch_operands = 0 : i64, tpu.core_type = #tpu.core_type<tc>} {
    %c0 = arith.constant 0 : index
    %c0_0 = arith.constant 0 : index
    %0 = vector.load %arg0[%c0, %c0_0] : memref<16x32xf32, #tpu.memory_space<vmem>>, vector<16x32xf32>
    %c0_1 = arith.constant 0 : index
    %c0_2 = arith.constant 0 : index
    %1 = vector.load %arg2[%c0_1, %c0_2] : memref<16x32xf32, #tpu.memory_space<vmem>>, vector<16x32xf32>
    %c0_3 = arith.constant 0 : index
    %c0_4 = arith.constant 0 : index
    %2 = vector.load %arg1[%c0_3, %c0_4] : memref<32x32xf32, #tpu.memory_space<vmem>>, vector<32x32xf32>
    %c0_5 = arith.constant 0 : index
    %c0_6 = arith.constant 0 : index
    %3 = vector.load %arg3[%c0_5, %c0_6] : memref<32x32xf32, #tpu.memory_space<vmem>>, vector<32x32xf32>
    %4 = arith.addf %2, %3 : vector<32x32xf32>
    %5 = tpu.iota {dimensions = array<i32: 0>} : vector<16x16xi32>
    %c2_i32 = arith.constant 2 : i32
    %c0_i32 = arith.constant 0 : i32
    %6 = arith.cmpi eq, %c2_i32, %c0_i32 : i32
    %c1_i32 = arith.constant 1 : i32
    %7 = arith.select %6, %c1_i32, %c2_i32 : i32
    %8 = vector.broadcast %7 : i32 to vector<16x16xi32>
    %9 = arith.remsi %5, %8 : vector<16x16xi32>
    %c0_i32_7 = arith.constant 0 : i32
    %10 = vector.broadcast %c0_i32_7 : i32 to vector<16x16xi32>
    %11 = arith.cmpi ne, %9, %10 : vector<16x16xi32>
    %c0_i32_8 = arith.constant 0 : i32
    %12 = vector.broadcast %c0_i32_8 : i32 to vector<16x16xi32>
    %13 = arith.cmpi slt, %9, %12 : vector<16x16xi32>
    %c0_i32_9 = arith.constant 0 : i32
    %14 = arith.cmpi slt, %7, %c0_i32_9 : i32
    %15 = vector.broadcast %14 : i1 to vector<16x16xi1>
    %16 = vector.broadcast %15 : vector<16x16xi1> to vector<16x16xi1>
    %17 = arith.xori %13, %16 : vector<16x16xi1>
    %18 = arith.andi %17, %11 : vector<16x16xi1>
    %19 = vector.broadcast %7 : i32 to vector<16x16xi32>
    %20 = arith.addi %9, %19 : vector<16x16xi32>
    %21 = arith.select %18, %20, %9 : vector<16x16xi1>, vector<16x16xi32>
    %22 = tpu.iota {dimensions = array<i32: 1>} : vector<16x16xi32>
    %c2_i32_10 = arith.constant 2 : i32
    %c0_i32_11 = arith.constant 0 : i32
    %23 = arith.cmpi eq, %c2_i32_10, %c0_i32_11 : i32
    %c1_i32_12 = arith.constant 1 : i32
    %24 = arith.select %23, %c1_i32_12, %c2_i32_10 : i32
    %25 = vector.broadcast %24 : i32 to vector<16x16xi32>
    %26 = arith.remsi %22, %25 : vector<16x16xi32>
    %c0_i32_13 = arith.constant 0 : i32
    %27 = vector.broadcast %c0_i32_13 : i32 to vector<16x16xi32>
    %28 = arith.cmpi ne, %26, %27 : vector<16x16xi32>
    %c0_i32_14 = arith.constant 0 : i32
    %29 = vector.broadcast %c0_i32_14 : i32 to vector<16x16xi32>
    %30 = arith.cmpi slt, %26, %29 : vector<16x16xi32>
    %c0_i32_15 = arith.constant 0 : i32
    %31 = arith.cmpi slt, %24, %c0_i32_15 : i32
    %32 = vector.broadcast %31 : i1 to vector<16x16xi1>
    %33 = vector.broadcast %32 : vector<16x16xi1> to vector<16x16xi1>
    %34 = arith.xori %30, %33 : vector<16x16xi1>
    %35 = arith.andi %34, %28 : vector<16x16xi1>
    %36 = vector.broadcast %24 : i32 to vector<16x16xi32>
    %37 = arith.addi %26, %36 : vector<16x16xi32>
    %38 = arith.select %35, %37, %26 : vector<16x16xi1>, vector<16x16xi32>
    %39 = arith.cmpi eq, %21, %38 : vector<16x16xi32>
    %cst = arith.constant 0.000000e+00 : f32
    %cst_16 = arith.constant -1.000000e+30 : f32
    %40 = vector.broadcast %cst : f32 to vector<16x16xf32>
    %41 = vector.broadcast %cst_16 : f32 to vector<16x16xf32>
    %42 = arith.select %39, %40, %41 : vector<16x16xi1>, vector<16x16xf32>
    %43 = tpu.iota {dimensions = array<i32: 0>} : vector<16x32xi32>
    %c2_i32_17 = arith.constant 2 : i32
    %c0_i32_18 = arith.constant 0 : i32
    %44 = arith.cmpi eq, %c2_i32_17, %c0_i32_18 : i32
    %c1_i32_19 = arith.constant 1 : i32
    %45 = arith.select %44, %c1_i32_19, %c2_i32_17 : i32
    %46 = vector.broadcast %45 : i32 to vector<16x32xi32>
    %47 = arith.remsi %43, %46 : vector<16x32xi32>
    %c0_i32_20 = arith.constant 0 : i32
    %48 = vector.broadcast %c0_i32_20 : i32 to vector<16x32xi32>
    %49 = arith.cmpi ne, %47, %48 : vector<16x32xi32>
    %c0_i32_21 = arith.constant 0 : i32
    %50 = vector.broadcast %c0_i32_21 : i32 to vector<16x32xi32>
    %51 = arith.cmpi slt, %47, %50 : vector<16x32xi32>
    %c0_i32_22 = arith.constant 0 : i32
    %52 = arith.cmpi slt, %45, %c0_i32_22 : i32
    %53 = vector.broadcast %52 : i1 to vector<16x32xi1>
    %54 = vector.broadcast %53 : vector<16x32xi1> to vector<16x32xi1>
    %55 = arith.xori %51, %54 : vector<16x32xi1>
    %56 = arith.andi %55, %49 : vector<16x32xi1>
    %57 = vector.broadcast %45 : i32 to vector<16x32xi32>
    %58 = arith.addi %47, %57 : vector<16x32xi32>
    %59 = arith.select %56, %58, %47 : vector<16x32xi1>, vector<16x32xi32>
    %60 = tpu.iota {dimensions = array<i32: 1>} : vector<16x32xi32>
    %c2_i32_23 = arith.constant 2 : i32
    %c0_i32_24 = arith.constant 0 : i32
    %61 = arith.cmpi eq, %c2_i32_23, %c0_i32_24 : i32
    %c1_i32_25 = arith.constant 1 : i32
    %62 = arith.select %61, %c1_i32_25, %c2_i32_23 : i32
    %63 = vector.broadcast %62 : i32 to vector<16x32xi32>
    %64 = arith.remsi %60, %63 : vector<16x32xi32>
    %c0_i32_26 = arith.constant 0 : i32
    %65 = vector.broadcast %c0_i32_26 : i32 to vector<16x32xi32>
    %66 = arith.cmpi ne, %64, %65 : vector<16x32xi32>
    %c0_i32_27 = arith.constant 0 : i32
    %67 = vector.broadcast %c0_i32_27 : i32 to vector<16x32xi32>
    %68 = arith.cmpi slt, %64, %67 : vector<16x32xi32>
    %c0_i32_28 = arith.constant 0 : i32
    %69 = arith.cmpi slt, %62, %c0_i32_28 : i32
    %70 = vector.broadcast %69 : i1 to vector<16x32xi1>
    %71 = vector.broadcast %70 : vector<16x32xi1> to vector<16x32xi1>
    %72 = arith.xori %68, %71 : vector<16x32xi1>
    %73 = arith.andi %72, %66 : vector<16x32xi1>
    %74 = vector.broadcast %62 : i32 to vector<16x32xi32>
    %75 = arith.addi %64, %74 : vector<16x32xi32>
    %76 = arith.select %73, %75, %64 : vector<16x32xi1>, vector<16x32xi32>
    %77 = arith.cmpi eq, %59, %76 : vector<16x32xi32>
    %cst_29 = arith.constant 0.000000e+00 : f32
    %cst_30 = arith.constant -1.000000e+30 : f32
    %78 = vector.broadcast %cst_29 : f32 to vector<16x32xf32>
    %79 = vector.broadcast %cst_30 : f32 to vector<16x32xf32>
    %80 = arith.select %77, %78, %79 : vector<16x32xi1>, vector<16x32xf32>
    %81 = tpu.iota {dimensions = array<i32: 1>} : vector<1x32xi32>
    %c0_i32_31 = arith.constant 0 : i32
    %82 = vector.broadcast %c0_i32_31 : i32 to vector<1x32xi32>
    %83 = arith.cmpi sge, %81, %82 : vector<1x32xi32>
    %c8_i32 = arith.constant 8 : i32
    %84 = vector.broadcast %c8_i32 : i32 to vector<1x32xi32>
    %85 = arith.cmpi slt, %81, %84 : vector<1x32xi32>
    %86 = arith.andi %83, %85 : vector<1x32xi1>
    %cst_32 = arith.constant 1.000000e+00 : f32
    %cst_33 = arith.constant 0.000000e+00 : f32
    %87 = vector.broadcast %cst_32 : f32 to vector<1x32xf32>
    %88 = vector.broadcast %cst_33 : f32 to vector<1x32xf32>
    %89 = arith.select %86, %87, %88 : vector<1x32xi1>, vector<1x32xf32>
    %c8_i32_34 = arith.constant 8 : i32
    %90 = vector.broadcast %c8_i32_34 : i32 to vector<1x32xi32>
    %91 = arith.cmpi sge, %81, %90 : vector<1x32xi32>
    %c16_i32 = arith.constant 16 : i32
    %92 = vector.broadcast %c16_i32 : i32 to vector<1x32xi32>
    %93 = arith.cmpi slt, %81, %92 : vector<1x32xi32>
    %94 = arith.andi %91, %93 : vector<1x32xi1>
    %cst_35 = arith.constant 1.000000e+00 : f32
    %cst_36 = arith.constant 0.000000e+00 : f32
    %95 = vector.broadcast %cst_35 : f32 to vector<1x32xf32>
    %96 = vector.broadcast %cst_36 : f32 to vector<1x32xf32>
    %97 = arith.select %94, %95, %96 : vector<1x32xi1>, vector<1x32xf32>
    %c16_i32_37 = arith.constant 16 : i32
    %98 = vector.broadcast %c16_i32_37 : i32 to vector<1x32xi32>
    %99 = arith.cmpi sge, %81, %98 : vector<1x32xi32>
    %c24_i32 = arith.constant 24 : i32
    %100 = vector.broadcast %c24_i32 : i32 to vector<1x32xi32>
    %101 = arith.cmpi slt, %81, %100 : vector<1x32xi32>
    %102 = arith.andi %99, %101 : vector<1x32xi1>
    %cst_38 = arith.constant 1.000000e+00 : f32
    %cst_39 = arith.constant 0.000000e+00 : f32
    %103 = vector.broadcast %cst_38 : f32 to vector<1x32xf32>
    %104 = vector.broadcast %cst_39 : f32 to vector<1x32xf32>
    %105 = arith.select %102, %103, %104 : vector<1x32xi1>, vector<1x32xf32>
    %c24_i32_40 = arith.constant 24 : i32
    %106 = vector.broadcast %c24_i32_40 : i32 to vector<1x32xi32>
    %107 = arith.cmpi sge, %81, %106 : vector<1x32xi32>
    %c32_i32 = arith.constant 32 : i32
    %108 = vector.broadcast %c32_i32 : i32 to vector<1x32xi32>
    %109 = arith.cmpi slt, %81, %108 : vector<1x32xi32>
    %110 = arith.andi %107, %109 : vector<1x32xi1>
    %cst_41 = arith.constant 1.000000e+00 : f32
    %cst_42 = arith.constant 0.000000e+00 : f32
    %111 = vector.broadcast %cst_41 : f32 to vector<1x32xf32>
    %112 = vector.broadcast %cst_42 : f32 to vector<1x32xf32>
    %113 = arith.select %110, %111, %112 : vector<1x32xi1>, vector<1x32xf32>
    %c0_43 = arith.constant 0 : index
    %c0_44 = arith.constant 0 : index
    %c0_45 = arith.constant 0 : index
    %114 = vector.load %arg4[%c0_43, %c0_44, %c0_45] : memref<2x32x256xf32, #tpu.memory_space<vmem>>, vector<1x32x256xf32>
    %115 = vector.shape_cast %114 : vector<1x32x256xf32> to vector<32x256xf32>
    %c0_46 = arith.constant 0 : index
    %c0_47 = arith.constant 0 : index
    %c0_48 = arith.constant 0 : index
    %116 = vector.load %arg5[%c0_46, %c0_47, %c0_48] : memref<2x64x96xf32, #tpu.memory_space<vmem>>, vector<1x64x96xf32>
    %117 = vector.shape_cast %116 : vector<1x64x96xf32> to vector<64x96xf32>
    %c0_49 = arith.constant 0 : index
    %c0_50 = arith.constant 0 : index
    %c0_51 = arith.constant 0 : index
    %118 = vector.load %arg6[%c0_49, %c0_50, %c0_51] : memref<2x5x128xf32, #tpu.memory_space<vmem>>, vector<1x5x128xf32>
    %119 = vector.shape_cast %118 : vector<1x5x128xf32> to vector<5x128xf32>
    %120 = vector.extract_strided_slice %115 {offsets = [0, 0], sizes = [32, 32], strides = [1, 1]} : vector<32x256xf32> to vector<32x32xf32>
    %121 = vector.extract_strided_slice %115 {offsets = [0, 32], sizes = [32, 32], strides = [1, 1]} : vector<32x256xf32> to vector<32x32xf32>
    %122 = vector.extract_strided_slice %115 {offsets = [0, 64], sizes = [32, 32], strides = [1, 1]} : vector<32x256xf32> to vector<32x32xf32>
    %123 = vector.extract_strided_slice %115 {offsets = [0, 96], sizes = [32, 32], strides = [1, 1]} : vector<32x256xf32> to vector<32x32xf32>
    %124 = vector.extract_strided_slice %115 {offsets = [0, 128], sizes = [32, 32], strides = [1, 1]} : vector<32x256xf32> to vector<32x32xf32>
    %125 = vector.extract_strided_slice %115 {offsets = [0, 160], sizes = [32, 32], strides = [1, 1]} : vector<32x256xf32> to vector<32x32xf32>
    %126 = vector.extract_strided_slice %115 {offsets = [0, 192], sizes = [32, 32], strides = [1, 1]} : vector<32x256xf32> to vector<32x32xf32>
    %127 = vector.extract_strided_slice %115 {offsets = [0, 224], sizes = [32, 32], strides = [1, 1]} : vector<32x256xf32> to vector<32x32xf32>
    %128 = vector.extract_strided_slice %117 {offsets = [0, 0], sizes = [32, 64], strides = [1, 1]} : vector<64x96xf32> to vector<32x64xf32>
    %129 = vector.extract_strided_slice %117 {offsets = [0, 64], sizes = [64, 32], strides = [1, 1]} : vector<64x96xf32> to vector<64x32xf32>
    %130 = vector.extract_strided_slice %119 {offsets = [0, 0], sizes = [1, 32], strides = [1, 1]} : vector<5x128xf32> to vector<1x32xf32>
    %131 = vector.extract_strided_slice %119 {offsets = [0, 32], sizes = [1, 32], strides = [1, 1]} : vector<5x128xf32> to vector<1x32xf32>
    %132 = vector.extract_strided_slice %119 {offsets = [0, 64], sizes = [1, 32], strides = [1, 1]} : vector<5x128xf32> to vector<1x32xf32>
    %133 = vector.extract_strided_slice %119 {offsets = [0, 96], sizes = [1, 32], strides = [1, 1]} : vector<5x128xf32> to vector<1x32xf32>
    %134 = vector.extract_strided_slice %119 {offsets = [1, 0], sizes = [1, 32], strides = [1, 1]} : vector<5x128xf32> to vector<1x32xf32>
    %135 = vector.extract_strided_slice %119 {offsets = [1, 32], sizes = [1, 32], strides = [1, 1]} : vector<5x128xf32> to vector<1x32xf32>
    %136 = vector.extract_strided_slice %119 {offsets = [1, 64], sizes = [1, 32], strides = [1, 1]} : vector<5x128xf32> to vector<1x32xf32>
    %137 = vector.extract_strided_slice %119 {offsets = [1, 96], sizes = [1, 32], strides = [1, 1]} : vector<5x128xf32> to vector<1x32xf32>
    %138 = vector.extract_strided_slice %119 {offsets = [2, 0], sizes = [1, 64], strides = [1, 1]} : vector<5x128xf32> to vector<1x64xf32>
    %139 = vector.extract_strided_slice %119 {offsets = [2, 64], sizes = [1, 32], strides = [1, 1]} : vector<5x128xf32> to vector<1x32xf32>
    %140 = vector.extract_strided_slice %119 {offsets = [3, 0], sizes = [1, 32], strides = [1, 1]} : vector<5x128xf32> to vector<1x32xf32>
    %141 = vector.extract_strided_slice %119 {offsets = [3, 32], sizes = [1, 32], strides = [1, 1]} : vector<5x128xf32> to vector<1x32xf32>
    %142 = vector.extract_strided_slice %119 {offsets = [3, 64], sizes = [1, 32], strides = [1, 1]} : vector<5x128xf32> to vector<1x32xf32>
    %143 = vector.extract_strided_slice %119 {offsets = [3, 96], sizes = [1, 32], strides = [1, 1]} : vector<5x128xf32> to vector<1x32xf32>
    %144 = vector.extract_strided_slice %119 {offsets = [4, 0], sizes = [1, 32], strides = [1, 1]} : vector<5x128xf32> to vector<1x32xf32>
    %145 = vector.extract_strided_slice %119 {offsets = [4, 32], sizes = [1, 32], strides = [1, 1]} : vector<5x128xf32> to vector<1x32xf32>
    %146 = arith.addf %0, %1 : vector<16x32xf32>
    %cst_52 = arith.constant dense<0.000000e+00> : vector<16x32xf32>
    %147 = tpu.matmul %146, %120, %cst_52 {dimension_numbers = #tpu.dot_dimension_numbers<[1], [0], [0], [1], [0, 0, 1, 1], [], []>} : vector<16x32xf32>, vector<32x32xf32>, vector<16x32xf32> -> vector<16x32xf32>
    %148 = vector.broadcast %130 : vector<1x32xf32> to vector<16x32xf32>
    %149 = arith.addf %147, %148 : vector<16x32xf32>
    %cst_53 = arith.constant 0.353553385 : f32
    %150 = vector.broadcast %cst_53 : f32 to vector<16x32xf32>
    %151 = arith.mulf %149, %150 : vector<16x32xf32>
    %cst_54 = arith.constant dense<0.000000e+00> : vector<16x32xf32>
    %152 = tpu.matmul %146, %121, %cst_54 {dimension_numbers = #tpu.dot_dimension_numbers<[1], [0], [0], [1], [0, 0, 1, 1], [], []>} : vector<16x32xf32>, vector<32x32xf32>, vector<16x32xf32> -> vector<16x32xf32>
    %153 = vector.broadcast %131 : vector<1x32xf32> to vector<16x32xf32>
    %154 = arith.addf %152, %153 : vector<16x32xf32>
    %cst_55 = arith.constant dense<0.000000e+00> : vector<16x32xf32>
    %155 = tpu.matmul %0, %122, %cst_55 {dimension_numbers = #tpu.dot_dimension_numbers<[1], [0], [0], [1], [0, 0, 1, 1], [], []>} : vector<16x32xf32>, vector<32x32xf32>, vector<16x32xf32> -> vector<16x32xf32>
    %156 = vector.broadcast %132 : vector<1x32xf32> to vector<16x32xf32>
    %157 = arith.addf %155, %156 : vector<16x32xf32>
    %cst_56 = arith.constant 0.000000e+00 : f32
    %158 = vector.broadcast %cst_56 : f32 to vector<16x32xf32>
    %159 = vector.broadcast %89 : vector<1x32xf32> to vector<16x32xf32>
    %160 = arith.mulf %154, %159 : vector<16x32xf32>
    %cst_57 = arith.constant dense<0.000000e+00> : vector<16x16xf32>
    %161 = tpu.matmul %151, %160, %cst_57 {dimension_numbers = #tpu.dot_dimension_numbers<[1], [1], [0], [0], [0, 0, 1, 0], [], []>} : vector<16x32xf32>, vector<16x32xf32>, vector<16x16xf32> -> vector<16x16xf32>
    %162 = arith.addf %161, %42 : vector<16x16xf32>
    %cst_58 = arith.constant dense<0xFF800000> : vector<16xf32>
    %163 = vector.multi_reduction <maximumf>, %162, %cst_58 [1] : vector<16x16xf32> to vector<16xf32>
    %164 = vector.shape_cast %163 : vector<16xf32> to vector<16x1xf32>
    %165 = vector.broadcast %164 : vector<16x1xf32> to vector<16x16xf32>
    %166 = arith.subf %162, %165 : vector<16x16xf32>
    %167 = math.exp %166 : vector<16x16xf32>
    %cst_59 = arith.constant dense<0.000000e+00> : vector<16xf32>
    %168 = vector.multi_reduction <add>, %167, %cst_59 [1] : vector<16x16xf32> to vector<16xf32>
    %169 = vector.shape_cast %168 : vector<16xf32> to vector<16x1xf32>
    %170 = vector.broadcast %169 : vector<16x1xf32> to vector<16x16xf32>
    %171 = arith.divf %167, %170 : vector<16x16xf32>
    %172 = vector.broadcast %89 : vector<1x32xf32> to vector<16x32xf32>
    %173 = arith.mulf %157, %172 : vector<16x32xf32>
    %cst_60 = arith.constant dense<0.000000e+00> : vector<16x32xf32>
    %174 = tpu.matmul %171, %173, %cst_60 {dimension_numbers = #tpu.dot_dimension_numbers<[1], [0], [0], [1], [0, 0, 1, 1], [], []>} : vector<16x16xf32>, vector<16x32xf32>, vector<16x32xf32> -> vector<16x32xf32>
    %175 = arith.addf %158, %174 : vector<16x32xf32>
    %176 = vector.broadcast %97 : vector<1x32xf32> to vector<16x32xf32>
    %177 = arith.mulf %154, %176 : vector<16x32xf32>
    %cst_61 = arith.constant dense<0.000000e+00> : vector<16x16xf32>
    %178 = tpu.matmul %151, %177, %cst_61 {dimension_numbers = #tpu.dot_dimension_numbers<[1], [1], [0], [0], [0, 0, 1, 0], [], []>} : vector<16x32xf32>, vector<16x32xf32>, vector<16x16xf32> -> vector<16x16xf32>
    %179 = arith.addf %178, %42 : vector<16x16xf32>
    %cst_62 = arith.constant dense<0xFF800000> : vector<16xf32>
    %180 = vector.multi_reduction <maximumf>, %179, %cst_62 [1] : vector<16x16xf32> to vector<16xf32>
    %181 = vector.shape_cast %180 : vector<16xf32> to vector<16x1xf32>
    %182 = vector.broadcast %181 : vector<16x1xf32> to vector<16x16xf32>
    %183 = arith.subf %179, %182 : vector<16x16xf32>
    %184 = math.exp %183 : vector<16x16xf32>
    %cst_63 = arith.constant dense<0.000000e+00> : vector<16xf32>
    %185 = vector.multi_reduction <add>, %184, %cst_63 [1] : vector<16x16xf32> to vector<16xf32>
    %186 = vector.shape_cast %185 : vector<16xf32> to vector<16x1xf32>
    %187 = vector.broadcast %186 : vector<16x1xf32> to vector<16x16xf32>
    %188 = arith.divf %184, %187 : vector<16x16xf32>
    %189 = vector.broadcast %97 : vector<1x32xf32> to vector<16x32xf32>
    %190 = arith.mulf %157, %189 : vector<16x32xf32>
    %cst_64 = arith.constant dense<0.000000e+00> : vector<16x32xf32>
    %191 = tpu.matmul %188, %190, %cst_64 {dimension_numbers = #tpu.dot_dimension_numbers<[1], [0], [0], [1], [0, 0, 1, 1], [], []>} : vector<16x16xf32>, vector<16x32xf32>, vector<16x32xf32> -> vector<16x32xf32>
    %192 = arith.addf %175, %191 : vector<16x32xf32>
    %193 = vector.broadcast %105 : vector<1x32xf32> to vector<16x32xf32>
    %194 = arith.mulf %154, %193 : vector<16x32xf32>
    %cst_65 = arith.constant dense<0.000000e+00> : vector<16x16xf32>
    %195 = tpu.matmul %151, %194, %cst_65 {dimension_numbers = #tpu.dot_dimension_numbers<[1], [1], [0], [0], [0, 0, 1, 0], [], []>} : vector<16x32xf32>, vector<16x32xf32>, vector<16x16xf32> -> vector<16x16xf32>
    %196 = arith.addf %195, %42 : vector<16x16xf32>
    %cst_66 = arith.constant dense<0xFF800000> : vector<16xf32>
    %197 = vector.multi_reduction <maximumf>, %196, %cst_66 [1] : vector<16x16xf32> to vector<16xf32>
    %198 = vector.shape_cast %197 : vector<16xf32> to vector<16x1xf32>
    %199 = vector.broadcast %198 : vector<16x1xf32> to vector<16x16xf32>
    %200 = arith.subf %196, %199 : vector<16x16xf32>
    %201 = math.exp %200 : vector<16x16xf32>
    %cst_67 = arith.constant dense<0.000000e+00> : vector<16xf32>
    %202 = vector.multi_reduction <add>, %201, %cst_67 [1] : vector<16x16xf32> to vector<16xf32>
    %203 = vector.shape_cast %202 : vector<16xf32> to vector<16x1xf32>
    %204 = vector.broadcast %203 : vector<16x1xf32> to vector<16x16xf32>
    %205 = arith.divf %201, %204 : vector<16x16xf32>
    %206 = vector.broadcast %105 : vector<1x32xf32> to vector<16x32xf32>
    %207 = arith.mulf %157, %206 : vector<16x32xf32>
    %cst_68 = arith.constant dense<0.000000e+00> : vector<16x32xf32>
    %208 = tpu.matmul %205, %207, %cst_68 {dimension_numbers = #tpu.dot_dimension_numbers<[1], [0], [0], [1], [0, 0, 1, 1], [], []>} : vector<16x16xf32>, vector<16x32xf32>, vector<16x32xf32> -> vector<16x32xf32>
    %209 = arith.addf %192, %208 : vector<16x32xf32>
    %210 = vector.broadcast %113 : vector<1x32xf32> to vector<16x32xf32>
    %211 = arith.mulf %154, %210 : vector<16x32xf32>
    %cst_69 = arith.constant dense<0.000000e+00> : vector<16x16xf32>
    %212 = tpu.matmul %151, %211, %cst_69 {dimension_numbers = #tpu.dot_dimension_numbers<[1], [1], [0], [0], [0, 0, 1, 0], [], []>} : vector<16x32xf32>, vector<16x32xf32>, vector<16x16xf32> -> vector<16x16xf32>
    %213 = arith.addf %212, %42 : vector<16x16xf32>
    %cst_70 = arith.constant dense<0xFF800000> : vector<16xf32>
    %214 = vector.multi_reduction <maximumf>, %213, %cst_70 [1] : vector<16x16xf32> to vector<16xf32>
    %215 = vector.shape_cast %214 : vector<16xf32> to vector<16x1xf32>
    %216 = vector.broadcast %215 : vector<16x1xf32> to vector<16x16xf32>
    %217 = arith.subf %213, %216 : vector<16x16xf32>
    %218 = math.exp %217 : vector<16x16xf32>
    %cst_71 = arith.constant dense<0.000000e+00> : vector<16xf32>
    %219 = vector.multi_reduction <add>, %218, %cst_71 [1] : vector<16x16xf32> to vector<16xf32>
    %220 = vector.shape_cast %219 : vector<16xf32> to vector<16x1xf32>
    %221 = vector.broadcast %220 : vector<16x1xf32> to vector<16x16xf32>
    %222 = arith.divf %218, %221 : vector<16x16xf32>
    %223 = vector.broadcast %113 : vector<1x32xf32> to vector<16x32xf32>
    %224 = arith.mulf %157, %223 : vector<16x32xf32>
    %cst_72 = arith.constant dense<0.000000e+00> : vector<16x32xf32>
    %225 = tpu.matmul %222, %224, %cst_72 {dimension_numbers = #tpu.dot_dimension_numbers<[1], [0], [0], [1], [0, 0, 1, 1], [], []>} : vector<16x16xf32>, vector<16x32xf32>, vector<16x32xf32> -> vector<16x32xf32>
    %226 = arith.addf %209, %225 : vector<16x32xf32>
    %cst_73 = arith.constant dense<0.000000e+00> : vector<16x32xf32>
    %227 = tpu.matmul %226, %123, %cst_73 {dimension_numbers = #tpu.dot_dimension_numbers<[1], [0], [0], [1], [0, 0, 1, 1], [], []>} : vector<16x32xf32>, vector<32x32xf32>, vector<16x32xf32> -> vector<16x32xf32>
    %228 = vector.broadcast %133 : vector<1x32xf32> to vector<16x32xf32>
    %229 = arith.addf %227, %228 : vector<16x32xf32>
    %230 = arith.addf %0, %229 : vector<16x32xf32>
    %cst_74 = arith.constant dense<0.000000e+00> : vector<16xf32>
    %231 = vector.multi_reduction <add>, %230, %cst_74 [1] : vector<16x32xf32> to vector<16xf32>
    %232 = vector.shape_cast %231 : vector<16xf32> to vector<16x1xf32>
    %cst_75 = arith.constant 3.200000e+01 : f32
    %233 = vector.broadcast %cst_75 : f32 to vector<16x1xf32>
    %234 = arith.divf %232, %233 : vector<16x1xf32>
    %235 = vector.broadcast %234 : vector<16x1xf32> to vector<16x32xf32>
    %236 = arith.subf %230, %235 : vector<16x32xf32>
    %237 = arith.mulf %236, %236 : vector<16x32xf32>
    %cst_76 = arith.constant dense<0.000000e+00> : vector<16xf32>
    %238 = vector.multi_reduction <add>, %237, %cst_76 [1] : vector<16x32xf32> to vector<16xf32>
    %239 = vector.shape_cast %238 : vector<16xf32> to vector<16x1xf32>
    %cst_77 = arith.constant 3.200000e+01 : f32
    %240 = vector.broadcast %cst_77 : f32 to vector<16x1xf32>
    %241 = arith.divf %239, %240 : vector<16x1xf32>
    %cst_78 = arith.constant 9.99999974E-6 : f32
    %242 = vector.broadcast %cst_78 : f32 to vector<16x1xf32>
    %243 = arith.addf %241, %242 : vector<16x1xf32>
    %244 = math.rsqrt %243 : vector<16x1xf32>
    %245 = vector.broadcast %244 : vector<16x1xf32> to vector<16x32xf32>
    %246 = arith.mulf %236, %245 : vector<16x32xf32>
    %247 = vector.broadcast %140 : vector<1x32xf32> to vector<16x32xf32>
    %248 = arith.mulf %246, %247 : vector<16x32xf32>
    %249 = vector.broadcast %141 : vector<1x32xf32> to vector<16x32xf32>
    %250 = arith.addf %248, %249 : vector<16x32xf32>
    %251 = arith.addf %250, %1 : vector<16x32xf32>
    %cst_79 = arith.constant dense<0.000000e+00> : vector<16x32xf32>
    %252 = tpu.matmul %251, %124, %cst_79 {dimension_numbers = #tpu.dot_dimension_numbers<[1], [0], [0], [1], [0, 0, 1, 1], [], []>} : vector<16x32xf32>, vector<32x32xf32>, vector<16x32xf32> -> vector<16x32xf32>
    %253 = vector.broadcast %134 : vector<1x32xf32> to vector<16x32xf32>
    %254 = arith.addf %252, %253 : vector<16x32xf32>
    %cst_80 = arith.constant 0.353553385 : f32
    %255 = vector.broadcast %cst_80 : f32 to vector<16x32xf32>
    %256 = arith.mulf %254, %255 : vector<16x32xf32>
    %cst_81 = arith.constant dense<0.000000e+00> : vector<32x32xf32>
    %257 = tpu.matmul %4, %125, %cst_81 {dimension_numbers = #tpu.dot_dimension_numbers<[1], [0], [0], [1], [0, 0, 1, 1], [], []>} : vector<32x32xf32>, vector<32x32xf32>, vector<32x32xf32> -> vector<32x32xf32>
    %258 = vector.broadcast %135 : vector<1x32xf32> to vector<32x32xf32>
    %259 = arith.addf %257, %258 : vector<32x32xf32>
    %cst_82 = arith.constant dense<0.000000e+00> : vector<32x32xf32>
    %260 = tpu.matmul %2, %126, %cst_82 {dimension_numbers = #tpu.dot_dimension_numbers<[1], [0], [0], [1], [0, 0, 1, 1], [], []>} : vector<32x32xf32>, vector<32x32xf32>, vector<32x32xf32> -> vector<32x32xf32>
    %261 = vector.broadcast %136 : vector<1x32xf32> to vector<32x32xf32>
    %262 = arith.addf %260, %261 : vector<32x32xf32>
    %cst_83 = arith.constant 0.000000e+00 : f32
    %263 = vector.broadcast %cst_83 : f32 to vector<16x32xf32>
    %264 = vector.broadcast %89 : vector<1x32xf32> to vector<32x32xf32>
    %265 = arith.mulf %259, %264 : vector<32x32xf32>
    %cst_84 = arith.constant dense<0.000000e+00> : vector<16x32xf32>
    %266 = tpu.matmul %256, %265, %cst_84 {dimension_numbers = #tpu.dot_dimension_numbers<[1], [1], [0], [0], [0, 0, 1, 0], [], []>} : vector<16x32xf32>, vector<32x32xf32>, vector<16x32xf32> -> vector<16x32xf32>
    %267 = arith.addf %266, %80 : vector<16x32xf32>
    %cst_85 = arith.constant dense<0xFF800000> : vector<16xf32>
    %268 = vector.multi_reduction <maximumf>, %267, %cst_85 [1] : vector<16x32xf32> to vector<16xf32>
    %269 = vector.shape_cast %268 : vector<16xf32> to vector<16x1xf32>
    %270 = vector.broadcast %269 : vector<16x1xf32> to vector<16x32xf32>
    %271 = arith.subf %267, %270 : vector<16x32xf32>
    %272 = math.exp %271 : vector<16x32xf32>
    %cst_86 = arith.constant dense<0.000000e+00> : vector<16xf32>
    %273 = vector.multi_reduction <add>, %272, %cst_86 [1] : vector<16x32xf32> to vector<16xf32>
    %274 = vector.shape_cast %273 : vector<16xf32> to vector<16x1xf32>
    %275 = vector.broadcast %274 : vector<16x1xf32> to vector<16x32xf32>
    %276 = arith.divf %272, %275 : vector<16x32xf32>
    %277 = vector.broadcast %89 : vector<1x32xf32> to vector<32x32xf32>
    %278 = arith.mulf %262, %277 : vector<32x32xf32>
    %cst_87 = arith.constant dense<0.000000e+00> : vector<16x32xf32>
    %279 = tpu.matmul %276, %278, %cst_87 {dimension_numbers = #tpu.dot_dimension_numbers<[1], [0], [0], [1], [0, 0, 1, 1], [], []>} : vector<16x32xf32>, vector<32x32xf32>, vector<16x32xf32> -> vector<16x32xf32>
    %280 = arith.addf %263, %279 : vector<16x32xf32>
    %281 = vector.broadcast %97 : vector<1x32xf32> to vector<32x32xf32>
    %282 = arith.mulf %259, %281 : vector<32x32xf32>
    %cst_88 = arith.constant dense<0.000000e+00> : vector<16x32xf32>
    %283 = tpu.matmul %256, %282, %cst_88 {dimension_numbers = #tpu.dot_dimension_numbers<[1], [1], [0], [0], [0, 0, 1, 0], [], []>} : vector<16x32xf32>, vector<32x32xf32>, vector<16x32xf32> -> vector<16x32xf32>
    %284 = arith.addf %283, %80 : vector<16x32xf32>
    %cst_89 = arith.constant dense<0xFF800000> : vector<16xf32>
    %285 = vector.multi_reduction <maximumf>, %284, %cst_89 [1] : vector<16x32xf32> to vector<16xf32>
    %286 = vector.shape_cast %285 : vector<16xf32> to vector<16x1xf32>
    %287 = vector.broadcast %286 : vector<16x1xf32> to vector<16x32xf32>
    %288 = arith.subf %284, %287 : vector<16x32xf32>
    %289 = math.exp %288 : vector<16x32xf32>
    %cst_90 = arith.constant dense<0.000000e+00> : vector<16xf32>
    %290 = vector.multi_reduction <add>, %289, %cst_90 [1] : vector<16x32xf32> to vector<16xf32>
    %291 = vector.shape_cast %290 : vector<16xf32> to vector<16x1xf32>
    %292 = vector.broadcast %291 : vector<16x1xf32> to vector<16x32xf32>
    %293 = arith.divf %289, %292 : vector<16x32xf32>
    %294 = vector.broadcast %97 : vector<1x32xf32> to vector<32x32xf32>
    %295 = arith.mulf %262, %294 : vector<32x32xf32>
    %cst_91 = arith.constant dense<0.000000e+00> : vector<16x32xf32>
    %296 = tpu.matmul %293, %295, %cst_91 {dimension_numbers = #tpu.dot_dimension_numbers<[1], [0], [0], [1], [0, 0, 1, 1], [], []>} : vector<16x32xf32>, vector<32x32xf32>, vector<16x32xf32> -> vector<16x32xf32>
    %297 = arith.addf %280, %296 : vector<16x32xf32>
    %298 = vector.broadcast %105 : vector<1x32xf32> to vector<32x32xf32>
    %299 = arith.mulf %259, %298 : vector<32x32xf32>
    %cst_92 = arith.constant dense<0.000000e+00> : vector<16x32xf32>
    %300 = tpu.matmul %256, %299, %cst_92 {dimension_numbers = #tpu.dot_dimension_numbers<[1], [1], [0], [0], [0, 0, 1, 0], [], []>} : vector<16x32xf32>, vector<32x32xf32>, vector<16x32xf32> -> vector<16x32xf32>
    %301 = arith.addf %300, %80 : vector<16x32xf32>
    %cst_93 = arith.constant dense<0xFF800000> : vector<16xf32>
    %302 = vector.multi_reduction <maximumf>, %301, %cst_93 [1] : vector<16x32xf32> to vector<16xf32>
    %303 = vector.shape_cast %302 : vector<16xf32> to vector<16x1xf32>
    %304 = vector.broadcast %303 : vector<16x1xf32> to vector<16x32xf32>
    %305 = arith.subf %301, %304 : vector<16x32xf32>
    %306 = math.exp %305 : vector<16x32xf32>
    %cst_94 = arith.constant dense<0.000000e+00> : vector<16xf32>
    %307 = vector.multi_reduction <add>, %306, %cst_94 [1] : vector<16x32xf32> to vector<16xf32>
    %308 = vector.shape_cast %307 : vector<16xf32> to vector<16x1xf32>
    %309 = vector.broadcast %308 : vector<16x1xf32> to vector<16x32xf32>
    %310 = arith.divf %306, %309 : vector<16x32xf32>
    %311 = vector.broadcast %105 : vector<1x32xf32> to vector<32x32xf32>
    %312 = arith.mulf %262, %311 : vector<32x32xf32>
    %cst_95 = arith.constant dense<0.000000e+00> : vector<16x32xf32>
    %313 = tpu.matmul %310, %312, %cst_95 {dimension_numbers = #tpu.dot_dimension_numbers<[1], [0], [0], [1], [0, 0, 1, 1], [], []>} : vector<16x32xf32>, vector<32x32xf32>, vector<16x32xf32> -> vector<16x32xf32>
    %314 = arith.addf %297, %313 : vector<16x32xf32>
    %315 = vector.broadcast %113 : vector<1x32xf32> to vector<32x32xf32>
    %316 = arith.mulf %259, %315 : vector<32x32xf32>
    %cst_96 = arith.constant dense<0.000000e+00> : vector<16x32xf32>
    %317 = tpu.matmul %256, %316, %cst_96 {dimension_numbers = #tpu.dot_dimension_numbers<[1], [1], [0], [0], [0, 0, 1, 0], [], []>} : vector<16x32xf32>, vector<32x32xf32>, vector<16x32xf32> -> vector<16x32xf32>
    %318 = arith.addf %317, %80 : vector<16x32xf32>
    %cst_97 = arith.constant dense<0xFF800000> : vector<16xf32>
    %319 = vector.multi_reduction <maximumf>, %318, %cst_97 [1] : vector<16x32xf32> to vector<16xf32>
    %320 = vector.shape_cast %319 : vector<16xf32> to vector<16x1xf32>
    %321 = vector.broadcast %320 : vector<16x1xf32> to vector<16x32xf32>
    %322 = arith.subf %318, %321 : vector<16x32xf32>
    %323 = math.exp %322 : vector<16x32xf32>
    %cst_98 = arith.constant dense<0.000000e+00> : vector<16xf32>
    %324 = vector.multi_reduction <add>, %323, %cst_98 [1] : vector<16x32xf32> to vector<16xf32>
    %325 = vector.shape_cast %324 : vector<16xf32> to vector<16x1xf32>
    %326 = vector.broadcast %325 : vector<16x1xf32> to vector<16x32xf32>
    %327 = arith.divf %323, %326 : vector<16x32xf32>
    %328 = vector.broadcast %113 : vector<1x32xf32> to vector<32x32xf32>
    %329 = arith.mulf %262, %328 : vector<32x32xf32>
    %cst_99 = arith.constant dense<0.000000e+00> : vector<16x32xf32>
    %330 = tpu.matmul %327, %329, %cst_99 {dimension_numbers = #tpu.dot_dimension_numbers<[1], [0], [0], [1], [0, 0, 1, 1], [], []>} : vector<16x32xf32>, vector<32x32xf32>, vector<16x32xf32> -> vector<16x32xf32>
    %331 = arith.addf %314, %330 : vector<16x32xf32>
    %cst_100 = arith.constant dense<0.000000e+00> : vector<16x32xf32>
    %332 = tpu.matmul %331, %127, %cst_100 {dimension_numbers = #tpu.dot_dimension_numbers<[1], [0], [0], [1], [0, 0, 1, 1], [], []>} : vector<16x32xf32>, vector<32x32xf32>, vector<16x32xf32> -> vector<16x32xf32>
    %333 = vector.broadcast %137 : vector<1x32xf32> to vector<16x32xf32>
    %334 = arith.addf %332, %333 : vector<16x32xf32>
    %335 = arith.addf %250, %334 : vector<16x32xf32>
    %cst_101 = arith.constant dense<0.000000e+00> : vector<16xf32>
    %336 = vector.multi_reduction <add>, %335, %cst_101 [1] : vector<16x32xf32> to vector<16xf32>
    %337 = vector.shape_cast %336 : vector<16xf32> to vector<16x1xf32>
    %cst_102 = arith.constant 3.200000e+01 : f32
    %338 = vector.broadcast %cst_102 : f32 to vector<16x1xf32>
    %339 = arith.divf %337, %338 : vector<16x1xf32>
    %340 = vector.broadcast %339 : vector<16x1xf32> to vector<16x32xf32>
    %341 = arith.subf %335, %340 : vector<16x32xf32>
    %342 = arith.mulf %341, %341 : vector<16x32xf32>
    %cst_103 = arith.constant dense<0.000000e+00> : vector<16xf32>
    %343 = vector.multi_reduction <add>, %342, %cst_103 [1] : vector<16x32xf32> to vector<16xf32>
    %344 = vector.shape_cast %343 : vector<16xf32> to vector<16x1xf32>
    %cst_104 = arith.constant 3.200000e+01 : f32
    %345 = vector.broadcast %cst_104 : f32 to vector<16x1xf32>
    %346 = arith.divf %344, %345 : vector<16x1xf32>
    %cst_105 = arith.constant 9.99999974E-6 : f32
    %347 = vector.broadcast %cst_105 : f32 to vector<16x1xf32>
    %348 = arith.addf %346, %347 : vector<16x1xf32>
    %349 = math.rsqrt %348 : vector<16x1xf32>
    %350 = vector.broadcast %349 : vector<16x1xf32> to vector<16x32xf32>
    %351 = arith.mulf %341, %350 : vector<16x32xf32>
    %352 = vector.broadcast %142 : vector<1x32xf32> to vector<16x32xf32>
    %353 = arith.mulf %351, %352 : vector<16x32xf32>
    %354 = vector.broadcast %143 : vector<1x32xf32> to vector<16x32xf32>
    %355 = arith.addf %353, %354 : vector<16x32xf32>
    %cst_106 = arith.constant dense<0.000000e+00> : vector<16x64xf32>
    %356 = tpu.matmul %355, %128, %cst_106 {dimension_numbers = #tpu.dot_dimension_numbers<[1], [0], [0], [1], [0, 0, 1, 1], [], []>} : vector<16x32xf32>, vector<32x64xf32>, vector<16x64xf32> -> vector<16x64xf32>
    %357 = vector.broadcast %138 : vector<1x64xf32> to vector<16x64xf32>
    %358 = arith.addf %356, %357 : vector<16x64xf32>
    %cst_107 = arith.constant 0.000000e+00 : f32
    %359 = vector.broadcast %cst_107 : f32 to vector<16x64xf32>
    %360 = arith.maximumf %358, %359 : vector<16x64xf32>
    %cst_108 = arith.constant dense<0.000000e+00> : vector<16x32xf32>
    %361 = tpu.matmul %360, %129, %cst_108 {dimension_numbers = #tpu.dot_dimension_numbers<[1], [0], [0], [1], [0, 0, 1, 1], [], []>} : vector<16x64xf32>, vector<64x32xf32>, vector<16x32xf32> -> vector<16x32xf32>
    %362 = vector.broadcast %139 : vector<1x32xf32> to vector<16x32xf32>
    %363 = arith.addf %361, %362 : vector<16x32xf32>
    %364 = arith.addf %355, %363 : vector<16x32xf32>
    %cst_109 = arith.constant dense<0.000000e+00> : vector<16xf32>
    %365 = vector.multi_reduction <add>, %364, %cst_109 [1] : vector<16x32xf32> to vector<16xf32>
    %366 = vector.shape_cast %365 : vector<16xf32> to vector<16x1xf32>
    %cst_110 = arith.constant 3.200000e+01 : f32
    %367 = vector.broadcast %cst_110 : f32 to vector<16x1xf32>
    %368 = arith.divf %366, %367 : vector<16x1xf32>
    %369 = vector.broadcast %368 : vector<16x1xf32> to vector<16x32xf32>
    %370 = arith.subf %364, %369 : vector<16x32xf32>
    %371 = arith.mulf %370, %370 : vector<16x32xf32>
    %cst_111 = arith.constant dense<0.000000e+00> : vector<16xf32>
    %372 = vector.multi_reduction <add>, %371, %cst_111 [1] : vector<16x32xf32> to vector<16xf32>
    %373 = vector.shape_cast %372 : vector<16xf32> to vector<16x1xf32>
    %cst_112 = arith.constant 3.200000e+01 : f32
    %374 = vector.broadcast %cst_112 : f32 to vector<16x1xf32>
    %375 = arith.divf %373, %374 : vector<16x1xf32>
    %cst_113 = arith.constant 9.99999974E-6 : f32
    %376 = vector.broadcast %cst_113 : f32 to vector<16x1xf32>
    %377 = arith.addf %375, %376 : vector<16x1xf32>
    %378 = math.rsqrt %377 : vector<16x1xf32>
    %379 = vector.broadcast %378 : vector<16x1xf32> to vector<16x32xf32>
    %380 = arith.mulf %370, %379 : vector<16x32xf32>
    %381 = vector.broadcast %144 : vector<1x32xf32> to vector<16x32xf32>
    %382 = arith.mulf %380, %381 : vector<16x32xf32>
    %383 = vector.broadcast %145 : vector<1x32xf32> to vector<16x32xf32>
    %384 = arith.addf %382, %383 : vector<16x32xf32>
    %c1 = arith.constant 1 : index
    %c0_114 = arith.constant 0 : index
    %c0_115 = arith.constant 0 : index
    %385 = vector.load %arg4[%c1, %c0_114, %c0_115] : memref<2x32x256xf32, #tpu.memory_space<vmem>>, vector<1x32x256xf32>
    %386 = vector.shape_cast %385 : vector<1x32x256xf32> to vector<32x256xf32>
    %c1_116 = arith.constant 1 : index
    %c0_117 = arith.constant 0 : index
    %c0_118 = arith.constant 0 : index
    %387 = vector.load %arg5[%c1_116, %c0_117, %c0_118] : memref<2x64x96xf32, #tpu.memory_space<vmem>>, vector<1x64x96xf32>
    %388 = vector.shape_cast %387 : vector<1x64x96xf32> to vector<64x96xf32>
    %c1_119 = arith.constant 1 : index
    %c0_120 = arith.constant 0 : index
    %c0_121 = arith.constant 0 : index
    %389 = vector.load %arg6[%c1_119, %c0_120, %c0_121] : memref<2x5x128xf32, #tpu.memory_space<vmem>>, vector<1x5x128xf32>
    %390 = vector.shape_cast %389 : vector<1x5x128xf32> to vector<5x128xf32>
    %391 = vector.extract_strided_slice %386 {offsets = [0, 0], sizes = [32, 32], strides = [1, 1]} : vector<32x256xf32> to vector<32x32xf32>
    %392 = vector.extract_strided_slice %386 {offsets = [0, 32], sizes = [32, 32], strides = [1, 1]} : vector<32x256xf32> to vector<32x32xf32>
    %393 = vector.extract_strided_slice %386 {offsets = [0, 64], sizes = [32, 32], strides = [1, 1]} : vector<32x256xf32> to vector<32x32xf32>
    %394 = vector.extract_strided_slice %386 {offsets = [0, 96], sizes = [32, 32], strides = [1, 1]} : vector<32x256xf32> to vector<32x32xf32>
    %395 = vector.extract_strided_slice %386 {offsets = [0, 128], sizes = [32, 32], strides = [1, 1]} : vector<32x256xf32> to vector<32x32xf32>
    %396 = vector.extract_strided_slice %386 {offsets = [0, 160], sizes = [32, 32], strides = [1, 1]} : vector<32x256xf32> to vector<32x32xf32>
    %397 = vector.extract_strided_slice %386 {offsets = [0, 192], sizes = [32, 32], strides = [1, 1]} : vector<32x256xf32> to vector<32x32xf32>
    %398 = vector.extract_strided_slice %386 {offsets = [0, 224], sizes = [32, 32], strides = [1, 1]} : vector<32x256xf32> to vector<32x32xf32>
    %399 = vector.extract_strided_slice %388 {offsets = [0, 0], sizes = [32, 64], strides = [1, 1]} : vector<64x96xf32> to vector<32x64xf32>
    %400 = vector.extract_strided_slice %388 {offsets = [0, 64], sizes = [64, 32], strides = [1, 1]} : vector<64x96xf32> to vector<64x32xf32>
    %401 = vector.extract_strided_slice %390 {offsets = [0, 0], sizes = [1, 32], strides = [1, 1]} : vector<5x128xf32> to vector<1x32xf32>
    %402 = vector.extract_strided_slice %390 {offsets = [0, 32], sizes = [1, 32], strides = [1, 1]} : vector<5x128xf32> to vector<1x32xf32>
    %403 = vector.extract_strided_slice %390 {offsets = [0, 64], sizes = [1, 32], strides = [1, 1]} : vector<5x128xf32> to vector<1x32xf32>
    %404 = vector.extract_strided_slice %390 {offsets = [0, 96], sizes = [1, 32], strides = [1, 1]} : vector<5x128xf32> to vector<1x32xf32>
    %405 = vector.extract_strided_slice %390 {offsets = [1, 0], sizes = [1, 32], strides = [1, 1]} : vector<5x128xf32> to vector<1x32xf32>
    %406 = vector.extract_strided_slice %390 {offsets = [1, 32], sizes = [1, 32], strides = [1, 1]} : vector<5x128xf32> to vector<1x32xf32>
    %407 = vector.extract_strided_slice %390 {offsets = [1, 64], sizes = [1, 32], strides = [1, 1]} : vector<5x128xf32> to vector<1x32xf32>
    %408 = vector.extract_strided_slice %390 {offsets = [1, 96], sizes = [1, 32], strides = [1, 1]} : vector<5x128xf32> to vector<1x32xf32>
    %409 = vector.extract_strided_slice %390 {offsets = [2, 0], sizes = [1, 64], strides = [1, 1]} : vector<5x128xf32> to vector<1x64xf32>
    %410 = vector.extract_strided_slice %390 {offsets = [2, 64], sizes = [1, 32], strides = [1, 1]} : vector<5x128xf32> to vector<1x32xf32>
    %411 = vector.extract_strided_slice %390 {offsets = [3, 0], sizes = [1, 32], strides = [1, 1]} : vector<5x128xf32> to vector<1x32xf32>
    %412 = vector.extract_strided_slice %390 {offsets = [3, 32], sizes = [1, 32], strides = [1, 1]} : vector<5x128xf32> to vector<1x32xf32>
    %413 = vector.extract_strided_slice %390 {offsets = [3, 64], sizes = [1, 32], strides = [1, 1]} : vector<5x128xf32> to vector<1x32xf32>
    %414 = vector.extract_strided_slice %390 {offsets = [3, 96], sizes = [1, 32], strides = [1, 1]} : vector<5x128xf32> to vector<1x32xf32>
    %415 = vector.extract_strided_slice %390 {offsets = [4, 0], sizes = [1, 32], strides = [1, 1]} : vector<5x128xf32> to vector<1x32xf32>
    %416 = vector.extract_strided_slice %390 {offsets = [4, 32], sizes = [1, 32], strides = [1, 1]} : vector<5x128xf32> to vector<1x32xf32>
    %417 = arith.addf %384, %1 : vector<16x32xf32>
    %cst_122 = arith.constant dense<0.000000e+00> : vector<16x32xf32>
    %418 = tpu.matmul %417, %391, %cst_122 {dimension_numbers = #tpu.dot_dimension_numbers<[1], [0], [0], [1], [0, 0, 1, 1], [], []>} : vector<16x32xf32>, vector<32x32xf32>, vector<16x32xf32> -> vector<16x32xf32>
    %419 = vector.broadcast %401 : vector<1x32xf32> to vector<16x32xf32>
    %420 = arith.addf %418, %419 : vector<16x32xf32>
    %cst_123 = arith.constant 0.353553385 : f32
    %421 = vector.broadcast %cst_123 : f32 to vector<16x32xf32>
    %422 = arith.mulf %420, %421 : vector<16x32xf32>
    %cst_124 = arith.constant dense<0.000000e+00> : vector<16x32xf32>
    %423 = tpu.matmul %417, %392, %cst_124 {dimension_numbers = #tpu.dot_dimension_numbers<[1], [0], [0], [1], [0, 0, 1, 1], [], []>} : vector<16x32xf32>, vector<32x32xf32>, vector<16x32xf32> -> vector<16x32xf32>
    %424 = vector.broadcast %402 : vector<1x32xf32> to vector<16x32xf32>
    %425 = arith.addf %423, %424 : vector<16x32xf32>
    %cst_125 = arith.constant dense<0.000000e+00> : vector<16x32xf32>
    %426 = tpu.matmul %384, %393, %cst_125 {dimension_numbers = #tpu.dot_dimension_numbers<[1], [0], [0], [1], [0, 0, 1, 1], [], []>} : vector<16x32xf32>, vector<32x32xf32>, vector<16x32xf32> -> vector<16x32xf32>
    %427 = vector.broadcast %403 : vector<1x32xf32> to vector<16x32xf32>
    %428 = arith.addf %426, %427 : vector<16x32xf32>
    %cst_126 = arith.constant 0.000000e+00 : f32
    %429 = vector.broadcast %cst_126 : f32 to vector<16x32xf32>
    %430 = vector.broadcast %89 : vector<1x32xf32> to vector<16x32xf32>
    %431 = arith.mulf %425, %430 : vector<16x32xf32>
    %cst_127 = arith.constant dense<0.000000e+00> : vector<16x16xf32>
    %432 = tpu.matmul %422, %431, %cst_127 {dimension_numbers = #tpu.dot_dimension_numbers<[1], [1], [0], [0], [0, 0, 1, 0], [], []>} : vector<16x32xf32>, vector<16x32xf32>, vector<16x16xf32> -> vector<16x16xf32>
    %433 = arith.addf %432, %42 : vector<16x16xf32>
    %cst_128 = arith.constant dense<0xFF800000> : vector<16xf32>
    %434 = vector.multi_reduction <maximumf>, %433, %cst_128 [1] : vector<16x16xf32> to vector<16xf32>
    %435 = vector.shape_cast %434 : vector<16xf32> to vector<16x1xf32>
    %436 = vector.broadcast %435 : vector<16x1xf32> to vector<16x16xf32>
    %437 = arith.subf %433, %436 : vector<16x16xf32>
    %438 = math.exp %437 : vector<16x16xf32>
    %cst_129 = arith.constant dense<0.000000e+00> : vector<16xf32>
    %439 = vector.multi_reduction <add>, %438, %cst_129 [1] : vector<16x16xf32> to vector<16xf32>
    %440 = vector.shape_cast %439 : vector<16xf32> to vector<16x1xf32>
    %441 = vector.broadcast %440 : vector<16x1xf32> to vector<16x16xf32>
    %442 = arith.divf %438, %441 : vector<16x16xf32>
    %443 = vector.broadcast %89 : vector<1x32xf32> to vector<16x32xf32>
    %444 = arith.mulf %428, %443 : vector<16x32xf32>
    %cst_130 = arith.constant dense<0.000000e+00> : vector<16x32xf32>
    %445 = tpu.matmul %442, %444, %cst_130 {dimension_numbers = #tpu.dot_dimension_numbers<[1], [0], [0], [1], [0, 0, 1, 1], [], []>} : vector<16x16xf32>, vector<16x32xf32>, vector<16x32xf32> -> vector<16x32xf32>
    %446 = arith.addf %429, %445 : vector<16x32xf32>
    %447 = vector.broadcast %97 : vector<1x32xf32> to vector<16x32xf32>
    %448 = arith.mulf %425, %447 : vector<16x32xf32>
    %cst_131 = arith.constant dense<0.000000e+00> : vector<16x16xf32>
    %449 = tpu.matmul %422, %448, %cst_131 {dimension_numbers = #tpu.dot_dimension_numbers<[1], [1], [0], [0], [0, 0, 1, 0], [], []>} : vector<16x32xf32>, vector<16x32xf32>, vector<16x16xf32> -> vector<16x16xf32>
    %450 = arith.addf %449, %42 : vector<16x16xf32>
    %cst_132 = arith.constant dense<0xFF800000> : vector<16xf32>
    %451 = vector.multi_reduction <maximumf>, %450, %cst_132 [1] : vector<16x16xf32> to vector<16xf32>
    %452 = vector.shape_cast %451 : vector<16xf32> to vector<16x1xf32>
    %453 = vector.broadcast %452 : vector<16x1xf32> to vector<16x16xf32>
    %454 = arith.subf %450, %453 : vector<16x16xf32>
    %455 = math.exp %454 : vector<16x16xf32>
    %cst_133 = arith.constant dense<0.000000e+00> : vector<16xf32>
    %456 = vector.multi_reduction <add>, %455, %cst_133 [1] : vector<16x16xf32> to vector<16xf32>
    %457 = vector.shape_cast %456 : vector<16xf32> to vector<16x1xf32>
    %458 = vector.broadcast %457 : vector<16x1xf32> to vector<16x16xf32>
    %459 = arith.divf %455, %458 : vector<16x16xf32>
    %460 = vector.broadcast %97 : vector<1x32xf32> to vector<16x32xf32>
    %461 = arith.mulf %428, %460 : vector<16x32xf32>
    %cst_134 = arith.constant dense<0.000000e+00> : vector<16x32xf32>
    %462 = tpu.matmul %459, %461, %cst_134 {dimension_numbers = #tpu.dot_dimension_numbers<[1], [0], [0], [1], [0, 0, 1, 1], [], []>} : vector<16x16xf32>, vector<16x32xf32>, vector<16x32xf32> -> vector<16x32xf32>
    %463 = arith.addf %446, %462 : vector<16x32xf32>
    %464 = vector.broadcast %105 : vector<1x32xf32> to vector<16x32xf32>
    %465 = arith.mulf %425, %464 : vector<16x32xf32>
    %cst_135 = arith.constant dense<0.000000e+00> : vector<16x16xf32>
    %466 = tpu.matmul %422, %465, %cst_135 {dimension_numbers = #tpu.dot_dimension_numbers<[1], [1], [0], [0], [0, 0, 1, 0], [], []>} : vector<16x32xf32>, vector<16x32xf32>, vector<16x16xf32> -> vector<16x16xf32>
    %467 = arith.addf %466, %42 : vector<16x16xf32>
    %cst_136 = arith.constant dense<0xFF800000> : vector<16xf32>
    %468 = vector.multi_reduction <maximumf>, %467, %cst_136 [1] : vector<16x16xf32> to vector<16xf32>
    %469 = vector.shape_cast %468 : vector<16xf32> to vector<16x1xf32>
    %470 = vector.broadcast %469 : vector<16x1xf32> to vector<16x16xf32>
    %471 = arith.subf %467, %470 : vector<16x16xf32>
    %472 = math.exp %471 : vector<16x16xf32>
    %cst_137 = arith.constant dense<0.000000e+00> : vector<16xf32>
    %473 = vector.multi_reduction <add>, %472, %cst_137 [1] : vector<16x16xf32> to vector<16xf32>
    %474 = vector.shape_cast %473 : vector<16xf32> to vector<16x1xf32>
    %475 = vector.broadcast %474 : vector<16x1xf32> to vector<16x16xf32>
    %476 = arith.divf %472, %475 : vector<16x16xf32>
    %477 = vector.broadcast %105 : vector<1x32xf32> to vector<16x32xf32>
    %478 = arith.mulf %428, %477 : vector<16x32xf32>
    %cst_138 = arith.constant dense<0.000000e+00> : vector<16x32xf32>
    %479 = tpu.matmul %476, %478, %cst_138 {dimension_numbers = #tpu.dot_dimension_numbers<[1], [0], [0], [1], [0, 0, 1, 1], [], []>} : vector<16x16xf32>, vector<16x32xf32>, vector<16x32xf32> -> vector<16x32xf32>
    %480 = arith.addf %463, %479 : vector<16x32xf32>
    %481 = vector.broadcast %113 : vector<1x32xf32> to vector<16x32xf32>
    %482 = arith.mulf %425, %481 : vector<16x32xf32>
    %cst_139 = arith.constant dense<0.000000e+00> : vector<16x16xf32>
    %483 = tpu.matmul %422, %482, %cst_139 {dimension_numbers = #tpu.dot_dimension_numbers<[1], [1], [0], [0], [0, 0, 1, 0], [], []>} : vector<16x32xf32>, vector<16x32xf32>, vector<16x16xf32> -> vector<16x16xf32>
    %484 = arith.addf %483, %42 : vector<16x16xf32>
    %cst_140 = arith.constant dense<0xFF800000> : vector<16xf32>
    %485 = vector.multi_reduction <maximumf>, %484, %cst_140 [1] : vector<16x16xf32> to vector<16xf32>
    %486 = vector.shape_cast %485 : vector<16xf32> to vector<16x1xf32>
    %487 = vector.broadcast %486 : vector<16x1xf32> to vector<16x16xf32>
    %488 = arith.subf %484, %487 : vector<16x16xf32>
    %489 = math.exp %488 : vector<16x16xf32>
    %cst_141 = arith.constant dense<0.000000e+00> : vector<16xf32>
    %490 = vector.multi_reduction <add>, %489, %cst_141 [1] : vector<16x16xf32> to vector<16xf32>
    %491 = vector.shape_cast %490 : vector<16xf32> to vector<16x1xf32>
    %492 = vector.broadcast %491 : vector<16x1xf32> to vector<16x16xf32>
    %493 = arith.divf %489, %492 : vector<16x16xf32>
    %494 = vector.broadcast %113 : vector<1x32xf32> to vector<16x32xf32>
    %495 = arith.mulf %428, %494 : vector<16x32xf32>
    %cst_142 = arith.constant dense<0.000000e+00> : vector<16x32xf32>
    %496 = tpu.matmul %493, %495, %cst_142 {dimension_numbers = #tpu.dot_dimension_numbers<[1], [0], [0], [1], [0, 0, 1, 1], [], []>} : vector<16x16xf32>, vector<16x32xf32>, vector<16x32xf32> -> vector<16x32xf32>
    %497 = arith.addf %480, %496 : vector<16x32xf32>
    %cst_143 = arith.constant dense<0.000000e+00> : vector<16x32xf32>
    %498 = tpu.matmul %497, %394, %cst_143 {dimension_numbers = #tpu.dot_dimension_numbers<[1], [0], [0], [1], [0, 0, 1, 1], [], []>} : vector<16x32xf32>, vector<32x32xf32>, vector<16x32xf32> -> vector<16x32xf32>
    %499 = vector.broadcast %404 : vector<1x32xf32> to vector<16x32xf32>
    %500 = arith.addf %498, %499 : vector<16x32xf32>
    %501 = arith.addf %384, %500 : vector<16x32xf32>
    %cst_144 = arith.constant dense<0.000000e+00> : vector<16xf32>
    %502 = vector.multi_reduction <add>, %501, %cst_144 [1] : vector<16x32xf32> to vector<16xf32>
    %503 = vector.shape_cast %502 : vector<16xf32> to vector<16x1xf32>
    %cst_145 = arith.constant 3.200000e+01 : f32
    %504 = vector.broadcast %cst_145 : f32 to vector<16x1xf32>
    %505 = arith.divf %503, %504 : vector<16x1xf32>
    %506 = vector.broadcast %505 : vector<16x1xf32> to vector<16x32xf32>
    %507 = arith.subf %501, %506 : vector<16x32xf32>
    %508 = arith.mulf %507, %507 : vector<16x32xf32>
    %cst_146 = arith.constant dense<0.000000e+00> : vector<16xf32>
    %509 = vector.multi_reduction <add>, %508, %cst_146 [1] : vector<16x32xf32> to vector<16xf32>
    %510 = vector.shape_cast %509 : vector<16xf32> to vector<16x1xf32>
    %cst_147 = arith.constant 3.200000e+01 : f32
    %511 = vector.broadcast %cst_147 : f32 to vector<16x1xf32>
    %512 = arith.divf %510, %511 : vector<16x1xf32>
    %cst_148 = arith.constant 9.99999974E-6 : f32
    %513 = vector.broadcast %cst_148 : f32 to vector<16x1xf32>
    %514 = arith.addf %512, %513 : vector<16x1xf32>
    %515 = math.rsqrt %514 : vector<16x1xf32>
    %516 = vector.broadcast %515 : vector<16x1xf32> to vector<16x32xf32>
    %517 = arith.mulf %507, %516 : vector<16x32xf32>
    %518 = vector.broadcast %411 : vector<1x32xf32> to vector<16x32xf32>
    %519 = arith.mulf %517, %518 : vector<16x32xf32>
    %520 = vector.broadcast %412 : vector<1x32xf32> to vector<16x32xf32>
    %521 = arith.addf %519, %520 : vector<16x32xf32>
    %522 = arith.addf %521, %1 : vector<16x32xf32>
    %cst_149 = arith.constant dense<0.000000e+00> : vector<16x32xf32>
    %523 = tpu.matmul %522, %395, %cst_149 {dimension_numbers = #tpu.dot_dimension_numbers<[1], [0], [0], [1], [0, 0, 1, 1], [], []>} : vector<16x32xf32>, vector<32x32xf32>, vector<16x32xf32> -> vector<16x32xf32>
    %524 = vector.broadcast %405 : vector<1x32xf32> to vector<16x32xf32>
    %525 = arith.addf %523, %524 : vector<16x32xf32>
    %cst_150 = arith.constant 0.353553385 : f32
    %526 = vector.broadcast %cst_150 : f32 to vector<16x32xf32>
    %527 = arith.mulf %525, %526 : vector<16x32xf32>
    %cst_151 = arith.constant dense<0.000000e+00> : vector<32x32xf32>
    %528 = tpu.matmul %4, %396, %cst_151 {dimension_numbers = #tpu.dot_dimension_numbers<[1], [0], [0], [1], [0, 0, 1, 1], [], []>} : vector<32x32xf32>, vector<32x32xf32>, vector<32x32xf32> -> vector<32x32xf32>
    %529 = vector.broadcast %406 : vector<1x32xf32> to vector<32x32xf32>
    %530 = arith.addf %528, %529 : vector<32x32xf32>
    %cst_152 = arith.constant dense<0.000000e+00> : vector<32x32xf32>
    %531 = tpu.matmul %2, %397, %cst_152 {dimension_numbers = #tpu.dot_dimension_numbers<[1], [0], [0], [1], [0, 0, 1, 1], [], []>} : vector<32x32xf32>, vector<32x32xf32>, vector<32x32xf32> -> vector<32x32xf32>
    %532 = vector.broadcast %407 : vector<1x32xf32> to vector<32x32xf32>
    %533 = arith.addf %531, %532 : vector<32x32xf32>
    %cst_153 = arith.constant 0.000000e+00 : f32
    %534 = vector.broadcast %cst_153 : f32 to vector<16x32xf32>
    %535 = vector.broadcast %89 : vector<1x32xf32> to vector<32x32xf32>
    %536 = arith.mulf %530, %535 : vector<32x32xf32>
    %cst_154 = arith.constant dense<0.000000e+00> : vector<16x32xf32>
    %537 = tpu.matmul %527, %536, %cst_154 {dimension_numbers = #tpu.dot_dimension_numbers<[1], [1], [0], [0], [0, 0, 1, 0], [], []>} : vector<16x32xf32>, vector<32x32xf32>, vector<16x32xf32> -> vector<16x32xf32>
    %538 = arith.addf %537, %80 : vector<16x32xf32>
    %cst_155 = arith.constant dense<0xFF800000> : vector<16xf32>
    %539 = vector.multi_reduction <maximumf>, %538, %cst_155 [1] : vector<16x32xf32> to vector<16xf32>
    %540 = vector.shape_cast %539 : vector<16xf32> to vector<16x1xf32>
    %541 = vector.broadcast %540 : vector<16x1xf32> to vector<16x32xf32>
    %542 = arith.subf %538, %541 : vector<16x32xf32>
    %543 = math.exp %542 : vector<16x32xf32>
    %cst_156 = arith.constant dense<0.000000e+00> : vector<16xf32>
    %544 = vector.multi_reduction <add>, %543, %cst_156 [1] : vector<16x32xf32> to vector<16xf32>
    %545 = vector.shape_cast %544 : vector<16xf32> to vector<16x1xf32>
    %546 = vector.broadcast %545 : vector<16x1xf32> to vector<16x32xf32>
    %547 = arith.divf %543, %546 : vector<16x32xf32>
    %548 = vector.broadcast %89 : vector<1x32xf32> to vector<32x32xf32>
    %549 = arith.mulf %533, %548 : vector<32x32xf32>
    %cst_157 = arith.constant dense<0.000000e+00> : vector<16x32xf32>
    %550 = tpu.matmul %547, %549, %cst_157 {dimension_numbers = #tpu.dot_dimension_numbers<[1], [0], [0], [1], [0, 0, 1, 1], [], []>} : vector<16x32xf32>, vector<32x32xf32>, vector<16x32xf32> -> vector<16x32xf32>
    %551 = arith.addf %534, %550 : vector<16x32xf32>
    %552 = vector.broadcast %97 : vector<1x32xf32> to vector<32x32xf32>
    %553 = arith.mulf %530, %552 : vector<32x32xf32>
    %cst_158 = arith.constant dense<0.000000e+00> : vector<16x32xf32>
    %554 = tpu.matmul %527, %553, %cst_158 {dimension_numbers = #tpu.dot_dimension_numbers<[1], [1], [0], [0], [0, 0, 1, 0], [], []>} : vector<16x32xf32>, vector<32x32xf32>, vector<16x32xf32> -> vector<16x32xf32>
    %555 = arith.addf %554, %80 : vector<16x32xf32>
    %cst_159 = arith.constant dense<0xFF800000> : vector<16xf32>
    %556 = vector.multi_reduction <maximumf>, %555, %cst_159 [1] : vector<16x32xf32> to vector<16xf32>
    %557 = vector.shape_cast %556 : vector<16xf32> to vector<16x1xf32>
    %558 = vector.broadcast %557 : vector<16x1xf32> to vector<16x32xf32>
    %559 = arith.subf %555, %558 : vector<16x32xf32>
    %560 = math.exp %559 : vector<16x32xf32>
    %cst_160 = arith.constant dense<0.000000e+00> : vector<16xf32>
    %561 = vector.multi_reduction <add>, %560, %cst_160 [1] : vector<16x32xf32> to vector<16xf32>
    %562 = vector.shape_cast %561 : vector<16xf32> to vector<16x1xf32>
    %563 = vector.broadcast %562 : vector<16x1xf32> to vector<16x32xf32>
    %564 = arith.divf %560, %563 : vector<16x32xf32>
    %565 = vector.broadcast %97 : vector<1x32xf32> to vector<32x32xf32>
    %566 = arith.mulf %533, %565 : vector<32x32xf32>
    %cst_161 = arith.constant dense<0.000000e+00> : vector<16x32xf32>
    %567 = tpu.matmul %564, %566, %cst_161 {dimension_numbers = #tpu.dot_dimension_numbers<[1], [0], [0], [1], [0, 0, 1, 1], [], []>} : vector<16x32xf32>, vector<32x32xf32>, vector<16x32xf32> -> vector<16x32xf32>
    %568 = arith.addf %551, %567 : vector<16x32xf32>
    %569 = vector.broadcast %105 : vector<1x32xf32> to vector<32x32xf32>
    %570 = arith.mulf %530, %569 : vector<32x32xf32>
    %cst_162 = arith.constant dense<0.000000e+00> : vector<16x32xf32>
    %571 = tpu.matmul %527, %570, %cst_162 {dimension_numbers = #tpu.dot_dimension_numbers<[1], [1], [0], [0], [0, 0, 1, 0], [], []>} : vector<16x32xf32>, vector<32x32xf32>, vector<16x32xf32> -> vector<16x32xf32>
    %572 = arith.addf %571, %80 : vector<16x32xf32>
    %cst_163 = arith.constant dense<0xFF800000> : vector<16xf32>
    %573 = vector.multi_reduction <maximumf>, %572, %cst_163 [1] : vector<16x32xf32> to vector<16xf32>
    %574 = vector.shape_cast %573 : vector<16xf32> to vector<16x1xf32>
    %575 = vector.broadcast %574 : vector<16x1xf32> to vector<16x32xf32>
    %576 = arith.subf %572, %575 : vector<16x32xf32>
    %577 = math.exp %576 : vector<16x32xf32>
    %cst_164 = arith.constant dense<0.000000e+00> : vector<16xf32>
    %578 = vector.multi_reduction <add>, %577, %cst_164 [1] : vector<16x32xf32> to vector<16xf32>
    %579 = vector.shape_cast %578 : vector<16xf32> to vector<16x1xf32>
    %580 = vector.broadcast %579 : vector<16x1xf32> to vector<16x32xf32>
    %581 = arith.divf %577, %580 : vector<16x32xf32>
    %582 = vector.broadcast %105 : vector<1x32xf32> to vector<32x32xf32>
    %583 = arith.mulf %533, %582 : vector<32x32xf32>
    %cst_165 = arith.constant dense<0.000000e+00> : vector<16x32xf32>
    %584 = tpu.matmul %581, %583, %cst_165 {dimension_numbers = #tpu.dot_dimension_numbers<[1], [0], [0], [1], [0, 0, 1, 1], [], []>} : vector<16x32xf32>, vector<32x32xf32>, vector<16x32xf32> -> vector<16x32xf32>
    %585 = arith.addf %568, %584 : vector<16x32xf32>
    %586 = vector.broadcast %113 : vector<1x32xf32> to vector<32x32xf32>
    %587 = arith.mulf %530, %586 : vector<32x32xf32>
    %cst_166 = arith.constant dense<0.000000e+00> : vector<16x32xf32>
    %588 = tpu.matmul %527, %587, %cst_166 {dimension_numbers = #tpu.dot_dimension_numbers<[1], [1], [0], [0], [0, 0, 1, 0], [], []>} : vector<16x32xf32>, vector<32x32xf32>, vector<16x32xf32> -> vector<16x32xf32>
    %589 = arith.addf %588, %80 : vector<16x32xf32>
    %cst_167 = arith.constant dense<0xFF800000> : vector<16xf32>
    %590 = vector.multi_reduction <maximumf>, %589, %cst_167 [1] : vector<16x32xf32> to vector<16xf32>
    %591 = vector.shape_cast %590 : vector<16xf32> to vector<16x1xf32>
    %592 = vector.broadcast %591 : vector<16x1xf32> to vector<16x32xf32>
    %593 = arith.subf %589, %592 : vector<16x32xf32>
    %594 = math.exp %593 : vector<16x32xf32>
    %cst_168 = arith.constant dense<0.000000e+00> : vector<16xf32>
    %595 = vector.multi_reduction <add>, %594, %cst_168 [1] : vector<16x32xf32> to vector<16xf32>
    %596 = vector.shape_cast %595 : vector<16xf32> to vector<16x1xf32>
    %597 = vector.broadcast %596 : vector<16x1xf32> to vector<16x32xf32>
    %598 = arith.divf %594, %597 : vector<16x32xf32>
    %599 = vector.broadcast %113 : vector<1x32xf32> to vector<32x32xf32>
    %600 = arith.mulf %533, %599 : vector<32x32xf32>
    %cst_169 = arith.constant dense<0.000000e+00> : vector<16x32xf32>
    %601 = tpu.matmul %598, %600, %cst_169 {dimension_numbers = #tpu.dot_dimension_numbers<[1], [0], [0], [1], [0, 0, 1, 1], [], []>} : vector<16x32xf32>, vector<32x32xf32>, vector<16x32xf32> -> vector<16x32xf32>
    %602 = arith.addf %585, %601 : vector<16x32xf32>
    %cst_170 = arith.constant dense<0.000000e+00> : vector<16x32xf32>
    %603 = tpu.matmul %602, %398, %cst_170 {dimension_numbers = #tpu.dot_dimension_numbers<[1], [0], [0], [1], [0, 0, 1, 1], [], []>} : vector<16x32xf32>, vector<32x32xf32>, vector<16x32xf32> -> vector<16x32xf32>
    %604 = vector.broadcast %408 : vector<1x32xf32> to vector<16x32xf32>
    %605 = arith.addf %603, %604 : vector<16x32xf32>
    %606 = arith.addf %521, %605 : vector<16x32xf32>
    %cst_171 = arith.constant dense<0.000000e+00> : vector<16xf32>
    %607 = vector.multi_reduction <add>, %606, %cst_171 [1] : vector<16x32xf32> to vector<16xf32>
    %608 = vector.shape_cast %607 : vector<16xf32> to vector<16x1xf32>
    %cst_172 = arith.constant 3.200000e+01 : f32
    %609 = vector.broadcast %cst_172 : f32 to vector<16x1xf32>
    %610 = arith.divf %608, %609 : vector<16x1xf32>
    %611 = vector.broadcast %610 : vector<16x1xf32> to vector<16x32xf32>
    %612 = arith.subf %606, %611 : vector<16x32xf32>
    %613 = arith.mulf %612, %612 : vector<16x32xf32>
    %cst_173 = arith.constant dense<0.000000e+00> : vector<16xf32>
    %614 = vector.multi_reduction <add>, %613, %cst_173 [1] : vector<16x32xf32> to vector<16xf32>
    %615 = vector.shape_cast %614 : vector<16xf32> to vector<16x1xf32>
    %cst_174 = arith.constant 3.200000e+01 : f32
    %616 = vector.broadcast %cst_174 : f32 to vector<16x1xf32>
    %617 = arith.divf %615, %616 : vector<16x1xf32>
    %cst_175 = arith.constant 9.99999974E-6 : f32
    %618 = vector.broadcast %cst_175 : f32 to vector<16x1xf32>
    %619 = arith.addf %617, %618 : vector<16x1xf32>
    %620 = math.rsqrt %619 : vector<16x1xf32>
    %621 = vector.broadcast %620 : vector<16x1xf32> to vector<16x32xf32>
    %622 = arith.mulf %612, %621 : vector<16x32xf32>
    %623 = vector.broadcast %413 : vector<1x32xf32> to vector<16x32xf32>
    %624 = arith.mulf %622, %623 : vector<16x32xf32>
    %625 = vector.broadcast %414 : vector<1x32xf32> to vector<16x32xf32>
    %626 = arith.addf %624, %625 : vector<16x32xf32>
    %cst_176 = arith.constant dense<0.000000e+00> : vector<16x64xf32>
    %627 = tpu.matmul %626, %399, %cst_176 {dimension_numbers = #tpu.dot_dimension_numbers<[1], [0], [0], [1], [0, 0, 1, 1], [], []>} : vector<16x32xf32>, vector<32x64xf32>, vector<16x64xf32> -> vector<16x64xf32>
    %628 = vector.broadcast %409 : vector<1x64xf32> to vector<16x64xf32>
    %629 = arith.addf %627, %628 : vector<16x64xf32>
    %cst_177 = arith.constant 0.000000e+00 : f32
    %630 = vector.broadcast %cst_177 : f32 to vector<16x64xf32>
    %631 = arith.maximumf %629, %630 : vector<16x64xf32>
    %cst_178 = arith.constant dense<0.000000e+00> : vector<16x32xf32>
    %632 = tpu.matmul %631, %400, %cst_178 {dimension_numbers = #tpu.dot_dimension_numbers<[1], [0], [0], [1], [0, 0, 1, 1], [], []>} : vector<16x64xf32>, vector<64x32xf32>, vector<16x32xf32> -> vector<16x32xf32>
    %633 = vector.broadcast %410 : vector<1x32xf32> to vector<16x32xf32>
    %634 = arith.addf %632, %633 : vector<16x32xf32>
    %635 = arith.addf %626, %634 : vector<16x32xf32>
    %cst_179 = arith.constant dense<0.000000e+00> : vector<16xf32>
    %636 = vector.multi_reduction <add>, %635, %cst_179 [1] : vector<16x32xf32> to vector<16xf32>
    %637 = vector.shape_cast %636 : vector<16xf32> to vector<16x1xf32>
    %cst_180 = arith.constant 3.200000e+01 : f32
    %638 = vector.broadcast %cst_180 : f32 to vector<16x1xf32>
    %639 = arith.divf %637, %638 : vector<16x1xf32>
    %640 = vector.broadcast %639 : vector<16x1xf32> to vector<16x32xf32>
    %641 = arith.subf %635, %640 : vector<16x32xf32>
    %642 = arith.mulf %641, %641 : vector<16x32xf32>
    %cst_181 = arith.constant dense<0.000000e+00> : vector<16xf32>
    %643 = vector.multi_reduction <add>, %642, %cst_181 [1] : vector<16x32xf32> to vector<16xf32>
    %644 = vector.shape_cast %643 : vector<16xf32> to vector<16x1xf32>
    %cst_182 = arith.constant 3.200000e+01 : f32
    %645 = vector.broadcast %cst_182 : f32 to vector<16x1xf32>
    %646 = arith.divf %644, %645 : vector<16x1xf32>
    %cst_183 = arith.constant 9.99999974E-6 : f32
    %647 = vector.broadcast %cst_183 : f32 to vector<16x1xf32>
    %648 = arith.addf %646, %647 : vector<16x1xf32>
    %649 = math.rsqrt %648 : vector<16x1xf32>
    %650 = vector.broadcast %649 : vector<16x1xf32> to vector<16x32xf32>
    %651 = arith.mulf %641, %650 : vector<16x32xf32>
    %652 = vector.broadcast %415 : vector<1x32xf32> to vector<16x32xf32>
    %653 = arith.mulf %651, %652 : vector<16x32xf32>
    %654 = vector.broadcast %416 : vector<1x32xf32> to vector<16x32xf32>
    %655 = arith.addf %653, %654 : vector<16x32xf32>
    %c0_184 = arith.constant 0 : index
    %c0_185 = arith.constant 0 : index
    %c0_186 = arith.constant 0 : index
    %656 = vector.load %arg6[%c0_184, %c0_185, %c0_186] : memref<2x5x128xf32, #tpu.memory_space<vmem>>, vector<1x5x128xf32>
    %657 = vector.shape_cast %656 : vector<1x5x128xf32> to vector<5x128xf32>
    %658 = vector.extract_strided_slice %657 {offsets = [4, 64], sizes = [1, 32], strides = [1, 1]} : vector<5x128xf32> to vector<1x32xf32>
    %659 = vector.extract_strided_slice %657 {offsets = [4, 96], sizes = [1, 32], strides = [1, 1]} : vector<5x128xf32> to vector<1x32xf32>
    %cst_187 = arith.constant dense<0.000000e+00> : vector<16xf32>
    %660 = vector.multi_reduction <add>, %655, %cst_187 [1] : vector<16x32xf32> to vector<16xf32>
    %661 = vector.shape_cast %660 : vector<16xf32> to vector<16x1xf32>
    %cst_188 = arith.constant 3.200000e+01 : f32
    %662 = vector.broadcast %cst_188 : f32 to vector<16x1xf32>
    %663 = arith.divf %661, %662 : vector<16x1xf32>
    %664 = vector.broadcast %663 : vector<16x1xf32> to vector<16x32xf32>
    %665 = arith.subf %655, %664 : vector<16x32xf32>
    %666 = arith.mulf %665, %665 : vector<16x32xf32>
    %cst_189 = arith.constant dense<0.000000e+00> : vector<16xf32>
    %667 = vector.multi_reduction <add>, %666, %cst_189 [1] : vector<16x32xf32> to vector<16xf32>
    %668 = vector.shape_cast %667 : vector<16xf32> to vector<16x1xf32>
    %cst_190 = arith.constant 3.200000e+01 : f32
    %669 = vector.broadcast %cst_190 : f32 to vector<16x1xf32>
    %670 = arith.divf %668, %669 : vector<16x1xf32>
    %cst_191 = arith.constant 9.99999974E-6 : f32
    %671 = vector.broadcast %cst_191 : f32 to vector<16x1xf32>
    %672 = arith.addf %670, %671 : vector<16x1xf32>
    %673 = math.rsqrt %672 : vector<16x1xf32>
    %674 = vector.broadcast %673 : vector<16x1xf32> to vector<16x32xf32>
    %675 = arith.mulf %665, %674 : vector<16x32xf32>
    %676 = vector.broadcast %658 : vector<1x32xf32> to vector<16x32xf32>
    %677 = arith.mulf %675, %676 : vector<16x32xf32>
    %678 = vector.broadcast %659 : vector<1x32xf32> to vector<16x32xf32>
    %679 = arith.addf %677, %678 : vector<16x32xf32>
    %c0_192 = arith.constant 0 : index
    %c0_193 = arith.constant 0 : index
    %680 = vector.load %arg7[%c0_192, %c0_193] : memref<16x32xf32, #tpu.memory_space<vmem>>, vector<16x32xf32>
    tpu.vector_store %arg7[%c0_192, %c0_193], %679 {strides = array<i32>} : memref<16x32xf32, #tpu.memory_space<vmem>>, vector<16x32xf32>,
    return
  }
}

</mosaic_0001>

<bundles_post_ra>
// kernel: transformer_decoder_forward.1
= control target key start
LH: loop header
LB: loop body
LE: loop exit
PB: predicated region body
PF: predicated region fallthrough
CT: control target
= control target key end

     0   :  { %12 = vsyncpa [#allocation3], 0  ;;  %s8054_s0 = inlined_call_operand.hbm [shape: f32[16,32], index: 0, kind: input, shape index: {}]   ;;  %s8055_s1 = inlined_call_operand.vmem [shape: f32[32,32], index: 1, kind: input, shape index: {}]   ;;  %s8056_s2 = inlined_call_operand.hbm [shape: f32[16,32], index: 2, kind: input, shape index: {}]   ;;  %s8057_s3 = inlined_call_operand.hbm [shape: f32[32,32], index: 3, kind: input, shape index: {}]   ;;  %s8058_s4 = inlined_call_operand.hbm [shape: f32[2,32,256], index: 4, kind: input, shape index: {}]   ;;  %s8059_s5 = inlined_call_operand.hbm [shape: f32[2,64,96], index: 5, kind: input, shape index: {}]   ;;  %s8060_s6 = inlined_call_operand.vmem [shape: f32[2,5,128], index: 6, kind: input, shape index: {}]   ;;  %s8061_s7 = inlined_call_operand.hbm [shape: f32[16,32], index: 7, kind: output, shape index: {}]  }
   0x1   :  { %13 = vsyncpa [#allocation6], 0 }
   0x2   :  { %14 = vsyncpa [#allocation9], 0 }
   0x3   :  { %15 = vsyncpa [#allocation4], 0  ;;  %s6898_s24 = smov [#allocation5]   ;;  %s6899_s26 = smov [#allocation8]  }
   0x4   :  { %s35_s25 = sshll.u32 %s6898_s24, 4  ;;  %s59_s27 = sshll.u32 %s6899_s26, 4  ;;  %s36_s25 = int_to_ptr.vmem [resolvable:$true] %s35_s25  ;;  %s60_s27 = int_to_ptr.vmem [resolvable:$true] %s59_s27 }
   0x5   :  { %s6778_s28 = scalar_lea.vmem %s36_s25, 256  ;;  %p6783_p1 = scmp.lt.s32.totalorder %s36_s25, %s36_s25 }
   0x6   :  { %p6779_p0 = scmp.ne.s32.totalorder %s36_s25, %s6778_s28  ;;  %p6784_p2 = scmp.lt.s32.totalorder %s6778_s28, %s6778_s28 }
   0x8   :  { %p6785_p3 = por %p6784_p2, %p6783_p1 }
   0xa   :  { %p6786_p4 = pnand %p6785_p3, %p6779_p0 }
   0xc   :  { %6789 = shalt.err (!%p6786_p4)
}
   0xd   :  { %s6900_s29 = smov 128   ;;  %s6901_s30 = smov 8  }
   0xe   :  { %41 = dma.hbm_to_vmem [thread:$0]  %s8056_s2, 256, %s36_s25, [#allocation6], %s6900_s29, %s6900_s29, %s6901_s30  }
   0xf   :  { %s6798_s10 = scalar_lea.vmem %s60_s27, 2048  ;;  %p6803_p6 = scmp.lt.s32.totalorder %s60_s27, %s60_s27 }
  0x10   :  { %p6799_p5 = scmp.ne.s32.totalorder %s60_s27, %s6798_s10  ;;  %p6804_p7 = scmp.lt.s32.totalorder %s6798_s10, %s6798_s10 }
  0x12   :  { %p6805_p8 = por %p6804_p7, %p6803_p6 }
  0x14   :  { %p6806_p9 = pnand %p6805_p8, %p6799_p5 }
  0x16   :  { %6809 = shalt.err (!%p6806_p9)
}
  0x17   :  { %s6902_s11 = smov 256   ;;  %s6903_s12 = smov 16  }
  0x18   :  { %65 = dma.hbm_to_vmem [thread:$0]  %s8058_s4, 2048, %s60_s27, [#allocation9], %s6902_s11, %s6902_s11, %s6903_s12  }
  0x19   :  { %s6904_s15 = smov [#allocation2]   ;;  %s6905_s17 = smov [#allocation7]  }
  0x1a   :  { %s21_s16 = sshll.u32 %s6904_s15, 4  ;;  %s47_s18 = sshll.u32 %s6905_s17, 4  ;;  %s22_s16 = int_to_ptr.vmem [resolvable:$true] %s21_s16  ;;  %s48_s18 = int_to_ptr.vmem [resolvable:$true] %s47_s18 }
  0x1b   :  { %s6818_s2 = scalar_lea.vmem %s22_s16, 256  ;;  %p6823_p11 = scmp.lt.s32.totalorder %s22_s16, %s22_s16 }
  0x1c   :  { %p6819_p10 = scmp.ne.s32.totalorder %s22_s16, %s6818_s2  ;;  %p6824_p12 = scmp.lt.s32.totalorder %s6818_s2, %s6818_s2 }
  0x1e   :  { %p6825_p13 = por %p6824_p12, %p6823_p11 }
  0x20   :  { %p6826_p0 = pnand %p6825_p13, %p6819_p10 }
  0x22   :  { %6829 = shalt.err (!%p6826_p0)
}
  0x23   :  { %27 = dma.hbm_to_vmem [thread:$0]  %s8054_s0, 256, %s22_s16, [#allocation3], %s6900_s29, %s6900_s29, %s6901_s30  }
  0x24   :  { %s6838_s4 = scalar_lea.vmem %s48_s18, 512  ;;  %p6843_p2 = scmp.lt.s32.totalorder %s48_s18, %s48_s18 }
  0x25   :  { %p6839_p1 = scmp.ne.s32.totalorder %s48_s18, %s6838_s4  ;;  %p6844_p3 = scmp.lt.s32.totalorder %s6838_s4, %s6838_s4 }
  0x27   :  { %p6845_p4 = por %p6844_p3, %p6843_p2 }
  0x29   :  { %p6846_p5 = pnand %p6845_p4, %p6839_p1 }
  0x2b   :  { %6849 = shalt.err (!%p6846_p5)
}
  0x2c   :  { %53 = dma.hbm_to_vmem [thread:$0]  %s8057_s3, 512, %s48_s18, [#allocation6], %s6900_s29, %s6900_s29, %s6901_s30  }
  0x2d   :  { %s6906_s23 = smov [#allocation10]  }
  0x2e   :  { %s71_s24 = sshll.u32 %s6906_s23, 4  ;;  %s72_s24 = int_to_ptr.vmem [resolvable:$true] %s71_s24 }
  0x2f   :  { %s6858_s25 = scalar_lea.vmem %s72_s24, 2048  ;;  %p6863_p7 = scmp.lt.s32.totalorder %s72_s24, %s72_s24 }
  0x30   :  { %p6859_p6 = scmp.ne.s32.totalorder %s72_s24, %s6858_s25  ;;  %p6864_p8 = scmp.lt.s32.totalorder %s6858_s25, %s6858_s25 }
  0x32   :  { %p6865_p9 = por %p6864_p8, %p6863_p7 }
  0x34   :  { %p6866_p10 = pnand %p6865_p9, %p6859_p6 }
  0x36   :  { %6869 = shalt.err (!%p6866_p10)
}
  0x37   :  { %77 = dma.hbm_to_vmem [thread:$0]  %s8059_s5, 2048, %s72_s24, [#allocation9], %s6900_s29, %s6900_s29, %s6901_s30  }
  0x38   :  { %6890 = dma.done.wait [#allocation3], 256  }
  0x39   :  { %6891 = vsyncadd [#allocation3], 4294967040 }
  0x3a   :  { %6892 = dma.done.wait [#allocation6], 768  }
  0x3b   :  { %6893 = vsyncadd [#allocation6], 4294966528 }
  0x3c   :  { %6894 = dma.done.wait [#allocation9], 4096  }
  0x3d   :  { %6895 = vsyncadd [#allocation9], 4294963200  ;;  %v111_v0 = vlaneseq  ;;  %v6980_v1 = vld [vmem:[#allocation8 + $0x30] sm:$0xff]  ;;  %s6907_s3 = smov 96   ;;  %v6988_v3 = vld [vmem:[#allocation2] sm:$0xff]  ;;  %vm195_vm0 = vcmask 261120  }
  0x3e   :  { %v6982_v2 = vld [vmem:[#allocation8 + $0x10] sm:$0xff]  ;;  %289 = vrot.lane.b32.xlu0 %v6980_v1, %s6907_s3  ;;  %v6994_v6 = vld [vmem:[#allocation8 + $0x20] sm:$0xff]  ;;  %6055 = vmatprep.subr.mxu1 %v6980_v1  ;;  %v7008_v10 = vld [vmem:[#allocation2 + $0x8] sm:$0xff]  ;;  %v6908_v15 = vmov 0.0   ;;  %s6909_s28 = smov 64   ;;  %vm559_vm13 = vcmask 130048  }
  0x3f   :  { %285 = vrot.lane.b32.xlu1 %v6982_v2, %s6907_s3  ;;  %v6990_v4 = vld [vmem:[#allocation5] sm:$0xff]  ;;  %v6992_v5 = vand.u32 127, %v111_v0  ;;  %v6996_v7 = vld [vmem:[#allocation8] sm:$0xff]  ;;  %v7001_v9 = vshrl.u32 %v111_v0, 7  ;;  %6085 = vmatprep.mubr.msk.f32.mxu0 %vm195_vm0, %v6988_v3  ;;  %v7010_v11 = vld [vmem:[#allocation5 + $0x8] sm:$0xff]  ;;  %s6911_s8 = smov 32  }
  0x40   :  { %v189_v8 = vadd.f32 %v6990_v4, %v6988_v3  ;;  %6056 = vmatpush3.msra.mxu1 %v6980_v1  ;;  %v7022_v12 = vld [vmem:[%s8060_s6] sm:$0x1f]  ;;  %v190_v14 = vadd.f32 %v7010_v11, %v7008_v10  ;;  %v6910_v52 = vmov -1e+30   ;;  %vm2747_vm14 = vcmask 523264  }
  0x41   :  { %6057 = vmatprep.subr.mxu1 %v6994_v6  ;;  %vm168_vm1 = vcmp.ge.s32.totalorder %v6992_v5, 24  ;;  %vm169_vm2 = vcmp.lt.s32.totalorder %v6992_v5, 32  ;;  %v193_v13 = vsub.s32 0, %v7001_v9  ;;  %vm160_vm4 = vcmp.ge.s32.totalorder %v6992_v5, 8 }
  0x42   :  { %6063 = vmatprep.mubr.msk.f32.mxu1 %vm195_vm0, %v189_v8  ;;  %287 = vrot.lane.b32.xlu0 %v6994_v6, %s6907_s3  ;;  %vm170_vm3 = vmand %vm168_vm1, %vm169_vm2  ;;  %vm161_vm5 = vcmp.lt.s32.totalorder %v6992_v5, 16  ;;  %vm157_vm6 = vcmp.lt.s32.totalorder %v6992_v5, 8  ;;  %vm164_vm8 = vcmp.ge.s32.totalorder %v6992_v5, 16  ;;  %vm165_vm9 = vcmp.lt.s32.totalorder %v6992_v5, 24 }
  0x43   :  { %283 = vrot.lane.b32.xlu1 %v6996_v7, %s6907_s3  ;;  %6058 = vmatpush3.msra.mxu1 %v6994_v6  ;;  %v7030_v16 = vsel %vm170_vm3, 1.0, %v6908_v15  ;;  %v7038_v17 = vrot.slane %v7022_v12, %v193_v13  ;;  %vm162_vm7 = vmand %vm160_vm4, %vm161_vm5  ;;  %v7065_v31 = vsel %vm157_vm6, 1.0, %v6908_v15  ;;  %v113_v46 = vadd.s32 8, %v7001_v9 }
  0x44   :  { %6059 = vmatprep.subr.mxu1 %v6982_v2  ;;  %v7068_v32 = vsel %vm162_vm7, 1.0, %v6908_v15  ;;  %vm166_vm10 = vmand %vm164_vm8, %vm165_vm9  ;;  %v144_v48 = vand.u32 1, %v6992_v5  ;;  %v118_v49 = vand.u32 1, %v7001_v9 }
  0x45   :  { %6060 = vmatpush3.msra.mxu1 %v6982_v2  ;;  %v7087_v41 = vsel %vm166_vm10, 1.0, %v6908_v15  ;;  %v125_v47 = vand.u32 1, %v113_v46 }
  0x46   :  { %6061 = vmatprep.subr.mxu1 %v6996_v7  ;;  %380 = vrot.lane.b32.xlu0 %v6980_v1, %s6909_s28  ;;  %vm152_vm12 = vcmp.eq.s32.totalorder %v118_v49, %v144_v48 }
  0x47   :  { %6062 = vmatpush3.msra.mxu1 %v6996_v7  ;;  %378 = vrot.lane.b32.xlu1 %v6994_v6, %s6909_s28  ;;  %vm153_vm11 = vcmp.eq.s32.totalorder %v125_v47, %v144_v48  ;;  %v7123_v56 = vsel %vm152_vm12, 0.0, %v6910_v52 }
  0x48   :  { %6064 = vmatmul.mubr.msk.f32.vlgmr.msra.gmra.mxu1 %vm195_vm0, %v190_v14  ;;  %v7121_v53 = vsel %vm153_vm11, 0.0, %v6910_v52 }
  0x49   :  { %6074 = vmatprep.mubr.msk.f32.mxu1 %vm195_vm0, %v189_v8 }
  0x4a   :  { %296 = vrot.lane.b32.xlu0 %v7038_v17, %s6907_s3 }
  0x4b   :  { %376 = vrot.lane.b32.xlu1 %v6982_v2, %s6909_s28 }
  0x4e   :  { %374 = vrot.lane.b32.xlu0 %v6996_v7, %s6909_s28 }
  0xb0   :  { %v290_v18 = vpop.permute.xlu0 %289 }
  0xb1   :  { %v286_v19 = vpop.permute.xlu1 %285  ;;  %6066 = vmatprep.subr.mxu1 %v290_v18 }
  0xb2   :  { %6067 = vmatpush3.msra.mxu1 %v290_v18 }
  0xb4   :  { %v288_v20 = vpop.permute.xlu0 %287 }
  0xb5   :  { %6068 = vmatprep.subr.mxu1 %v288_v20  ;;  %v284_v21 = vpop.permute.xlu1 %283 }
  0xb6   :  { %6069 = vmatpush3.msra.mxu1 %v288_v20 }
  0xb7   :  { %6070 = vmatprep.subr.mxu1 %v286_v19 }
  0xb8   :  { %6071 = vmatpush3.msra.mxu1 %v286_v19  ;;  %v381_v22 = vpop.permute.xlu0 %380 }
  0xb9   :  { %6072 = vmatprep.subr.mxu1 %v284_v21  ;;  %v379_v23 = vpop.permute.xlu1 %378  ;;  %6077 = vmatprep.subr.mxu0 %v381_v22 }
  0xba   :  { %6073 = vmatpush3.msra.mxu1 %v284_v21  ;;  %6078 = vmatpush3.msra.mxu0 %v381_v22 }
  0xbb   :  { %6075 = vmatmul.mubr.msk.f32.vlgmr.msra.gmra.mxu1 %vm195_vm0, %v190_v14  ;;  %6079 = vmatprep.subr.mxu0 %v379_v23 }
  0xbc   :  { %v297_v24 = vpop.permute.xlu0 %296  ;;  %6080 = vmatpush3.msra.mxu0 %v379_v23 }
  0xbd   :  { %v377_v25 = vpop.permute.xlu1 %376 }
  0xbe   :  { %6081 = vmatprep.subr.mxu0 %v377_v25 }
  0xbf   :  { %6082 = vmatpush3.msra.mxu0 %v377_v25 }
  0xc0   :  { %v375_v26 = vpop.permute.xlu0 %374 }
  0xc1   :  { %6083 = vmatprep.subr.mxu0 %v375_v26 }
  0xc2   :  { %6084 = vmatpush3.msra.mxu0 %v375_v26 }
  0xc3   :  { %6086 = vmatmul.mubr.msk.f32.vlgmr.msra.gmra.mxu0 %vm195_vm0, %v7008_v10 }
 0x108   :  { %v6065_v27 = vpop.f32.mrf.mxu1 }
 0x109   :  { %v274_v42 = vadd.f32 %v6065_v27, %v7038_v17 }
 0x10a   :  { %v268_v28 = vpop.f32.mrf.mxu1 }
 0x10b   :  { %v269_v29 = vadd.f32 %v268_v28, %v7038_v17  ;;  %v7098_v44 = vmul.f32 0.35355338, %v274_v42 }
 0x10d   :  { %v7055_v30 = vmul.f32 0.35355338, %v269_v29 }
 0x10f   :  { %6092 = vmatprep.mubr.msk.f32.mxu1 %vm195_vm0, %v7055_v30  ;;  %6099 = vmatprep.mubr.msk.f32.mxu0 %vm195_vm0, %v7055_v30 }
 0x17b   :  { %v6076_v33 = vpop.f32.mrf.mxu1 }
 0x17c   :  { %v7072_v34 = vadd.f32 %v6076_v33, %v297_v24 }
 0x17d   :  { %v365_v35 = vpop.f32.mrf.mxu1 }
 0x17e   :  { %v7074_v36 = vadd.f32 %v365_v35, %v297_v24  ;;  %v471_v37 = vmul.f32 %v7072_v34, %v7065_v31  ;;  %v585_v38 = vmul.f32 %v7072_v34, %v7068_v32  ;;  %v854_v43 = vmul.f32 %v7072_v34, %v7087_v41 }
 0x180   :  { %6088 = vmatprep.subr.msk.mxu1 %vm195_vm0, %v471_v37  ;;  %6095 = vmatprep.subr.msk.mxu0 %vm195_vm0, %v585_v38  ;;  %v470_v39 = vmul.f32 %v7074_v36, %v7065_v31  ;;  %v584_v40 = vmul.f32 %v7074_v36, %v7068_v32  ;;  %v853_v45 = vmul.f32 %v7074_v36, %v7087_v41 }
 0x181   :  { %6089 = vmatpush3.xpose.msk.msra.mxu1 %vm195_vm0, %v471_v37  ;;  %6096 = vmatpush3.xpose.msk.msra.mxu0 %vm195_vm0, %v585_v38 }
 0x182   :  { %6090 = vmatprep.subr.msk.mxu1 %vm195_vm0, %v470_v39  ;;  %6097 = vmatprep.subr.msk.mxu0 %vm195_vm0, %v584_v40 }
 0x183   :  { %v7117_v50 = vpop.f32.mrf.mxu0 }
 0x185   :  { %6091 = vmatpush3.xpose.msk.msra.mxu1 %vm195_vm0, %v470_v39  ;;  %6098 = vmatpush3.xpose.msk.msra.mxu0 %vm195_vm0, %v584_v40  ;;  %v7119_v51 = vpop.f32.mrf.mxu0 }
 0x186   :  { %6116 = vmatprep.subr.msk.mxu0 %vm195_vm0, %v854_v43 }
 0x188   :  { %6093 = vmatmul.mubr.msk.f32.vlgmr.msra.gmra.mxu1 %vm195_vm0, %v7098_v44  ;;  %6100 = vmatmul.mubr.msk.f32.vlgmr.msra.gmra.mxu0 %vm195_vm0, %v7098_v44 }
 0x189   :  { %6117 = vmatpush3.xpose.msk.msra.mxu0 %vm195_vm0, %v854_v43  ;;  %6120 = vmatprep.mubr.msk.f32.mxu0 %vm195_vm0, %v7055_v30 }
 0x18a   :  { %6118 = vmatprep.subr.msk.mxu0 %vm195_vm0, %v853_v45 }
 0x18d   :  { %6119 = vmatpush3.xpose.msk.msra.mxu0 %vm195_vm0, %v853_v45 }
 0x190   :  { %6121 = vmatmul.mubr.msk.f32.vlgmr.msra.gmra.mxu0 %vm195_vm0, %v7098_v44 }
 0x248   :  { %v6094_v54 = vpop.f32.mrf.mxu1  ;;  %v6101_v55 = vpop.f32.mrf.mxu0 }
 0x249   :  { %v664_v57 = vadd.f32 %v6101_v55, %v7121_v53  ;;  %v556_v63 = vadd.f32 %v6094_v54, %v7121_v53 }
 0x24a   :  { %v550_v58 = vpop.f32.mrf.mxu1  ;;  %v658_v59 = vpop.f32.mrf.mxu0 }
 0x24b   :  { %v551_v60 = vadd.f32 %v550_v58, %v7123_v56  ;;  %v659_v61 = vadd.f32 %v658_v59, %v7123_v56  ;;  %v670_v62 = vsel %vm559_vm13, %v664_v57, -inf  ;;  %v563_v15 = vsel %vm559_vm13, %v556_v63, -inf }
 0x24c   :  { %671 = vmax.xlane.f32.xlu0 %v670_v62 }
 0x24d   :  { %v667_v0 = vsel %vm559_vm13, %v659_v61, -inf  ;;  %v560_v5 = vsel %vm559_vm13, %v551_v60, -inf }
 0x24e   :  { %668 = vmax.xlane.f32.xlu1 %v667_v0 }
 0x250   :  { %v6122_v8 = vpop.f32.mrf.mxu0  ;;  %561 = vmax.xlane.f32.xlu0 %v560_v5 }
 0x251   :  { %v933_v14 = vadd.f32 %v6122_v8, %v7121_v53 }
 0x252   :  { %v927_v18 = vpop.f32.mrf.mxu0  ;;  %564 = vmax.xlane.f32.xlu1 %v563_v15 }
 0x253   :  { %v928_v19 = vadd.f32 %v927_v18, %v7123_v56  ;;  %v939_v20 = vsel %vm559_vm13, %v933_v14, -inf }
 0x255   :  { %v936_v21 = vsel %vm559_vm13, %v928_v19, -inf }
 0x256   :  { %940 = vmax.xlane.f32.xlu1 %v939_v20  ;;  %937 = vmax.xlane.f32.xlu0 %v936_v21 }
 0x2d5   :  { %v672_v22 = vpop.xlane.xlu0 %671 }
 0x2d6   :  { %v674_v23 = vsub.f32 %v664_v57, %v672_v22 }
 0x2d7   :  { %v669_v24 = vpop.xlane.xlu1 %668 }
 0x2d8   :  { %v677_v25 = vmul.f32 1.442695, %v674_v23  ;;  %v673_v26 = vsub.f32 %v659_v61, %v669_v24 }
 0x2d9   :  { %v562_v27 = vpop.xlane.xlu0 %561 }
 0x2da   :  { %6606 = vpow2.f32 %v677_v25  ;;  %v675_v28 = vmul.f32 1.442695, %v673_v26  ;;  %v566_v29 = vsub.f32 %v551_v60, %v562_v27 }
 0x2db   :  { %v565_v33 = vpop.xlane.xlu1 %564 }
 0x2dc   :  { %6608 = vpow2.f32 %v675_v28  ;;  %v568_v35 = vmul.f32 1.442695, %v566_v29  ;;  %v567_v37 = vsub.f32 %v556_v63, %v565_v33 }
 0x2de   :  { %6610 = vpow2.f32 %v568_v35  ;;  %v570_v38 = vmul.f32 1.442695, %v567_v37 }
 0x2df   :  { %v941_v39 = vpop.xlane.xlu1 %940  ;;  %v938_v40 = vpop.xlane.xlu0 %937 }
 0x2e0   :  { %6612 = vpow2.f32 %v570_v38  ;;  %v943_v42 = vsub.f32 %v933_v14, %v941_v39  ;;  %v942_v43 = vsub.f32 %v928_v19, %v938_v40 }
 0x2e2   :  { %v946_v45 = vmul.f32 1.442695, %v943_v42  ;;  %v944_v46 = vmul.f32 1.442695, %v942_v43 }
 0x2e4   :  { %6614 = vpow2.f32 %v946_v45 }
 0x2e5   :  { %6616 = vpow2.f32 %v944_v46  ;;  %v1044_v46 = vmul.f32 %v7072_v34, %v7030_v16 }
 0x2e7   :  { %v6607_v47 = vpop.eup %6606 }
 0x2e8   :  { %v682_v48 = vsel %vm559_vm13, %v6607_v47, 0.0 }
 0x2e9   :  { %v6609_v49 = vpop.eup %6608  ;;  %683 = vadd.xlane.f32.xlu1 %v682_v48 }
 0x2ea   :  { %v679_v52 = vsel %vm559_vm13, %v6609_v49, 0.0 }
 0x2eb   :  { %v6611_v54 = vpop.eup %6610  ;;  %680 = vadd.xlane.f32.xlu0 %v679_v52 }
 0x2ec   :  { %v572_v58 = vsel %vm559_vm13, %v6611_v54, 0.0 }
 0x2ed   :  { %v6613_v55 = vpop.eup %6612 }
 0x2ee   :  { %v575_v57 = vsel %vm559_vm13, %v6613_v55, 0.0 }
 0x2ef   :  { %576 = vadd.xlane.f32.xlu1 %v575_v57  ;;  %573 = vadd.xlane.f32.xlu0 %v572_v58 }
 0x2f1   :  { %v6615_v59 = vpop.eup %6614 }
 0x2f2   :  { %v6617_v60 = vpop.eup %6616  ;;  %v951_v61 = vsel %vm559_vm13, %v6615_v59, 0.0 }
 0x2f3   :  { %952 = vadd.xlane.f32.xlu1 %v951_v61  ;;  %v948_v62 = vsel %vm559_vm13, %v6617_v60, 0.0 }
 0x2f4   :  { %949 = vadd.xlane.f32.xlu0 %v948_v62 }
 0x30a   :  { %386 = vrot.lane.b32.xlu0 %v7038_v17, %s6909_s28 }
 0x30e   :  { %1237 = vrot.lane.b32.xlu0 %v6994_v6, %s6911_s8 }
 0x312   :  { %1235 = vrot.lane.b32.xlu0 %v6982_v2, %s6911_s8 }
 0x316   :  { %1233 = vrot.lane.b32.xlu0 %v6996_v7, %s6911_s8 }
 0x31a   :  { %1245 = vrot.lane.b32.xlu0 %v7038_v17, %s6911_s8 }
 0x372   :  { %v684_v63 = vpop.xlane.xlu1 %683 }
 0x374   :  { %v681_v0 = vpop.xlane.xlu0 %680 }
 0x375   :  { %6618 = vrcp.f32 %v681_v0 }
 0x376   :  { %6620 = vrcp.f32 %v684_v63 }
 0x378   :  { %v577_v5 = vpop.xlane.xlu1 %576  ;;  %v574_v8 = vpop.xlane.xlu0 %573 }
 0x379   :  { %6622 = vrcp.f32 %v574_v8 }
 0x37a   :  { %6624 = vrcp.f32 %v577_v5 }
 0x37c   :  { %v953_v14 = vpop.xlane.xlu1 %952 }
 0x37d   :  { %v950_v15 = vpop.xlane.xlu0 %949 }
 0x37e   :  { %6626 = vrcp.f32 %v950_v15 }
 0x37f   :  { %6628 = vrcp.f32 %v953_v14 }
 0x381   :  { %v387_v18 = vpop.permute.xlu0 %386 }
 0x382   :  { %v6619_v19 = vpop.eup %6618  ;;  %v462_v20 = vadd.f32 %v7119_v51, %v387_v18  ;;  %v467_v21 = vadd.f32 %v7117_v50, %v387_v18 }
 0x383   :  { %v686_v22 = vmul.f32 %v6619_v19, %v6609_v49  ;;  %v6621_v25 = vpop.eup %6620 }
 0x384   :  { %v690_v23 = vmul.f32 %v467_v21, %v7068_v32  ;;  %v1149_v24 = vmul.f32 %v467_v21, %v7030_v16  ;;  %v689_v26 = vmul.f32 %v462_v20, %v7068_v32  ;;  %v1148_v27 = vmul.f32 %v462_v20, %v7030_v16 }
 0x385   :  { %6106 = vmatprep.mubr.msk.f32.mxu1 %vm559_vm13, %v686_v22  ;;  %v688_v50 = vmul.f32 %v6621_v25, %v6607_v47  ;;  %v583_v51 = vmul.f32 %v467_v21, %v7065_v31  ;;  %v582_v35 = vmul.f32 %v462_v20, %v7065_v31  ;;  %v959_v39 = vmul.f32 %v467_v21, %v7087_v41 }
 0x386   :  { %6102 = vmatprep.subr.mxu1 %v690_v23  ;;  %6137 = vmatprep.subr.mxu0 %v1149_v24  ;;  %v6623_v28 = vpop.eup %6622  ;;  %v958_v43 = vmul.f32 %v462_v20, %v7087_v41  ;;  %v1043_v47 = vmul.f32 %v7074_v36, %v7030_v16 }
 0x387   :  { %6103 = vmatpush3.msra.mxu1 %v690_v23  ;;  %6138 = vmatpush3.msra.mxu0 %v1149_v24  ;;  %v579_v29 = vmul.f32 %v6623_v28, %v6611_v54  ;;  %v6625_v33 = vpop.eup %6624 }
 0x388   :  { %6104 = vmatprep.subr.mxu1 %v689_v26  ;;  %6139 = vmatprep.subr.mxu0 %v1148_v27  ;;  %v581_v38 = vmul.f32 %v6625_v33, %v6613_v55  ;;  %v7193_v33 = vld [vmem:[#allocation8 + $0x38] sm:$0xff] }
 0x389   :  { %6105 = vmatpush3.msra.mxu1 %v689_v26  ;;  %6140 = vmatpush3.msra.mxu0 %v1148_v27  ;;  %v1238_v27 = vpop.permute.xlu0 %1237 }
 0x38a   :  { %6107 = vmatmul.mubr.msk.f32.vlgmr.msra.gmra.mxu1 %vm559_vm13, %v688_v50  ;;  %6109 = vmatprep.subr.mxu1 %v583_v51 }
 0x38b   :  { %v6627_v37 = vpop.eup %6626  ;;  %6110 = vmatpush3.msra.mxu1 %v583_v51  ;;  %6113 = vmatprep.mubr.msk.f32.mxu1 %vm559_vm13, %v579_v29 }
 0x38c   :  { %6111 = vmatprep.subr.mxu1 %v582_v35  ;;  %v955_v40 = vmul.f32 %v6627_v37, %v6617_v60  ;;  %v6629_v42 = vpop.eup %6628  ;;  %v7200_v37 = vld [vmem:[#allocation8 + $0x18] sm:$0xff] }
 0x38d   :  { %6112 = vmatpush3.msra.mxu1 %v582_v35  ;;  %v957_v45 = vmul.f32 %v6629_v42, %v6615_v59  ;;  %v1236_v2 = vpop.permute.xlu0 %1235  ;;  %v7197_v35 = vld [vmem:[#allocation8 + $0x28] sm:$0xff] }
 0x38e   :  { %6114 = vmatmul.mubr.msk.f32.vlgmr.msra.gmra.mxu1 %vm559_vm13, %v581_v38  ;;  %6123 = vmatprep.subr.mxu1 %v959_v39 }
 0x38f   :  { %6124 = vmatpush3.msra.mxu1 %v959_v39  ;;  %6127 = vmatprep.mubr.msk.f32.mxu1 %vm559_vm13, %v955_v40 }
 0x390   :  { %6125 = vmatprep.subr.mxu1 %v958_v43 }
 0x391   :  { %6126 = vmatpush3.msra.mxu1 %v958_v43  ;;  %v1234_v7 = vpop.permute.xlu0 %1233 }
 0x392   :  { %6128 = vmatmul.mubr.msk.f32.vlgmr.msra.gmra.mxu1 %vm559_vm13, %v957_v45  ;;  %6130 = vmatprep.subr.msk.mxu1 %vm195_vm0, %v1044_v46 }
 0x393   :  { %6131 = vmatpush3.xpose.msk.msra.mxu1 %vm195_vm0, %v1044_v46  ;;  %6134 = vmatprep.mubr.msk.f32.mxu1 %vm195_vm0, %v7055_v30 }
 0x394   :  { %6132 = vmatprep.subr.msk.mxu1 %vm195_vm0, %v1043_v47 }
 0x395   :  { %v1246_v38 = vpop.permute.xlu0 %1245 }
 0x397   :  { %6133 = vmatpush3.xpose.msk.msra.mxu1 %vm195_vm0, %v1043_v47 }
 0x398   :  { %6155 = vmatprep.subr.mxu1 %v7193_v33 }
 0x39a   :  { %6135 = vmatmul.mubr.msk.f32.vlgmr.msra.gmra.mxu1 %vm195_vm0, %v7098_v44 }
 0x39b   :  { %6156 = vmatpush3.msra.mxu1 %v7193_v33 }
 0x39c   :  { %6157 = vmatprep.subr.mxu1 %v7197_v35 }
 0x39d   :  { %6158 = vmatpush3.msra.mxu1 %v7197_v35 }
 0x39e   :  { %6159 = vmatprep.subr.mxu1 %v7200_v37 }
 0x39f   :  { %6160 = vmatpush3.msra.mxu1 %v7200_v37 }
 0x44a   :  { %v6108_v34 = vpop.f32.mrf.mxu1 }
 0x44c   :  { %v763_v48 = vpop.f32.mrf.mxu1 }
 0x44e   :  { %v6115_v49 = vpop.f32.mrf.mxu1 }
 0x44f   :  { %v850_v52 = vadd.f32 %v6115_v49, %v6108_v34 }
 0x450   :  { %v844_v54 = vpop.f32.mrf.mxu1 }
 0x451   :  { %v845_v55 = vadd.f32 %v844_v54, %v763_v48  ;;  %v7211_v48 = vld [vmem:[#allocation8 + $0x8] sm:$0xff] }
 0x452   :  { %v6129_v57 = vpop.f32.mrf.mxu1  ;;  %6161 = vmatprep.subr.mxu1 %v7211_v48 }
 0x453   :  { %v1042_v36 = vadd.f32 %v6129_v57, %v850_v52  ;;  %6162 = vmatpush3.msra.mxu1 %v7211_v48 }
 0x454   :  { %v1032_v58 = vpop.f32.mrf.mxu1 }
 0x455   :  { %v1041_v59 = vadd.f32 %v1032_v58, %v845_v55 }
 0x45a   :  { %v6136_v60 = vpop.f32.mrf.mxu1 }
 0x45b   :  { %v1123_v62 = vadd.f32 %v6136_v60, %v7121_v53 }
 0x45c   :  { %v1117_v61 = vpop.f32.mrf.mxu1 }
 0x45d   :  { %v1118_v30 = vadd.f32 %v1117_v61, %v7123_v56  ;;  %v1129_v44 = vsel %vm559_vm13, %v1123_v62, -inf }
 0x45f   :  { %v1126_v63 = vsel %vm559_vm13, %v1118_v30, -inf }
 0x460   :  { %1127 = vmax.xlane.f32.xlu1 %v1126_v63 }
 0x464   :  { %1130 = vmax.xlane.f32.xlu1 %v1129_v44  ;;  %v99_v44 = vld [vmem:[%s8055_s1] sm:$0xff] }
 0x4e9   :  { %v1128_v0 = vpop.xlane.xlu1 %1127 }
 0x4ea   :  { %v1132_v5 = vsub.f32 %v1118_v30, %v1128_v0  ;;  %v103_v0 = vld [vmem:[#allocation7] sm:$0xff] }
 0x4ec   :  { %v1134_v8 = vmul.f32 1.442695, %v1132_v5  ;;  %v7230_v5 = vadd.f32 %v103_v0, %v99_v44 }
 0x4ed   :  { %v1131_v14 = vpop.xlane.xlu1 %1130 }
 0x4ee   :  { %6630 = vpow2.f32 %v1134_v8  ;;  %v1133_v15 = vsub.f32 %v1123_v62, %v1131_v14  ;;  %v1360_v62 = vsub.s32 3, %v7001_v9  ;;  %v1374_v8 = vsub.s32 1, %v7001_v9 }
 0x4f0   :  { %v1136_v18 = vmul.f32 1.442695, %v1133_v15  ;;  %v7225_v63 = vrot.slane %v7022_v12, %v1360_v62  ;;  %v7248_v14 = vrot.slane %v7022_v12, %v1374_v8  ;;  %v101_v12 = vld [vmem:[%s8055_s1 + $0x10] sm:$0xff] }
 0x4f2   :  { %6632 = vpow2.f32 %v1136_v18 }
 0x4fb   :  { %v6631_v19 = vpop.eup %6630 }
 0x4fc   :  { %v1138_v20 = vsel %vm559_vm13, %v6631_v19, 0.0 }
 0x4fd   :  { %1139 = vadd.xlane.f32.xlu1 %v1138_v20  ;;  %v100_v20 = vld [vmem:[%s8055_s1 + $0x8] sm:$0xff] }
 0x4ff   :  { %v6633_v21 = vpop.eup %6632 }
 0x500   :  { %v1141_v22 = vsel %vm559_vm13, %v6633_v21, 0.0 }
 0x501   :  { %1142 = vadd.xlane.f32.xlu1 %v1141_v22 }
 0x512   :  { %1239 = vrot.lane.b32.xlu1 %v6980_v1, %s6911_s8 }
 0x586   :  { %v1140_v23 = vpop.xlane.xlu1 %1139 }
 0x587   :  { %6634 = vrcp.f32 %v1140_v23 }
 0x58a   :  { %v1143_v24 = vpop.xlane.xlu1 %1142 }
 0x58b   :  { %6636 = vrcp.f32 %v1143_v24  ;;  %v105_v24 = vld [vmem:[#allocation7 + $0x10] sm:$0xff] }
 0x58e   :  { %v1240_v25 = vpop.permute.xlu1 %1239 }
 0x58f   :  { %6144 = vmatprep.subr.mxu0 %v1240_v25 }
 0x594   :  { %v6635_v26 = vpop.eup %6634 }
 0x595   :  { %v1145_v1 = vmul.f32 %v6635_v26, %v6631_v19 }
 0x597   :  { %6141 = vmatprep.mubr.msk.f32.mxu0 %vm559_vm13, %v1145_v1 }
 0x598   :  { %v6637_v6 = vpop.eup %6636 }
 0x599   :  { %v1147_v28 = vmul.f32 %v6637_v6, %v6633_v21  ;;  %v104_v21 = vld [vmem:[#allocation7 + $0x8] sm:$0xff]  ;;  %v102_v6 = vld [vmem:[%s8055_s1 + $0x18] sm:$0xff] }
 0x59a   :  { %v7260_v26 = vadd.f32 %v104_v21, %v100_v20 }
 0x59b   :  { %6142 = vmatmul.mubr.msk.f32.vlgmr.msra.gmra.mxu0 %vm559_vm13, %v1147_v28  ;;  %v106_v28 = vld [vmem:[#allocation7 + $0x18] sm:$0xff] }
 0x59c   :  { %6145 = vmatpush3.msra.mxu0 %v1240_v25 }
 0x59d   :  { %6146 = vmatprep.subr.mxu0 %v1238_v27 }
 0x59e   :  { %6147 = vmatpush3.msra.mxu0 %v1238_v27  ;;  %v7262_v27 = vadd.f32 %v105_v24, %v101_v12 }
 0x59f   :  { %6148 = vmatprep.subr.mxu0 %v1236_v2 }
 0x5a0   :  { %6149 = vmatpush3.msra.mxu0 %v1236_v2  ;;  %v7269_v2 = vadd.f32 %v106_v28, %v102_v6 }
 0x5a1   :  { %6150 = vmatprep.subr.mxu0 %v1234_v7 }
 0x5a2   :  { %6151 = vmatpush3.msra.mxu0 %v1234_v7 }
 0x65b   :  { %v6143_v17 = vpop.f32.mrf.mxu0 }
 0x65c   :  { %v1232_v29 = vadd.f32 %v6143_v17, %v1042_v36 }
 0x65d   :  { %v1222_v50 = vpop.f32.mrf.mxu0 }
 0x65e   :  { %v1231_v51 = vadd.f32 %v1222_v50, %v1041_v59 }
 0x660   :  { %6152 = vmatprep.mubr.msk.f32.mxu0 %vm195_vm0, %v1231_v51 }
 0x661   :  { %6153 = vmatmul.mubr.msk.f32.vlgmr.msra.gmra.mxu0 %vm195_vm0, %v1232_v29 }
 0x662   :  { %6174 = vmatprep.mubr.msk.f32.mxu0 %vm195_vm0, %v7230_v5 }
 0x721   :  { %v6154_v39 = vpop.f32.mrf.mxu0 }
 0x722   :  { %v1326_v40 = vadd.f32 %v6154_v39, %v1246_v38 }
 0x723   :  { %v1320_v42 = vpop.f32.mrf.mxu0 }
 0x724   :  { %v1321_v43 = vadd.f32 %v1320_v42, %v1246_v38  ;;  %v1330_v45 = vadd.f32 %v1326_v40, %v7008_v10 }
 0x726   :  { %v1334_v46 = vsel %vm195_vm0, %v1330_v45, 0.0  ;;  %v1329_v47 = vadd.f32 %v1321_v43, %v6988_v3 }
 0x727   :  { %1335 = vadd.xlane.f32.xlu0 %v1334_v46 }
 0x728   :  { %v1331_v34 = vsel %vm195_vm0, %v1329_v47, 0.0 }
 0x729   :  { %1332 = vadd.xlane.f32.xlu1 %v1331_v34 }
 0x73a   :  { %1467 = vrot.lane.b32.xlu1 %v7197_v35, %s6907_s3 }
 0x73d   :  { %1469 = vrot.lane.b32.xlu0 %v7193_v33, %s6907_s3 }
 0x73e   :  { %1465 = vrot.lane.b32.xlu1 %v7200_v37, %s6907_s3 }
 0x7b0   :  { %v1336_v3 = vpop.xlane.xlu0 %1335 }
 0x7b1   :  { %v1339_v10 = vmul.f32 0.03125, %v1336_v3 }
 0x7b2   :  { %v1333_v49 = vpop.xlane.xlu1 %1332 }
 0x7b3   :  { %v1341_v52 = vsub.f32 %v1330_v45, %v1339_v10  ;;  %v1338_v54 = vmul.f32 0.03125, %v1333_v49 }
 0x7b4   :  { %v1470_v55 = vpop.permute.xlu0 %1469 }
 0x7b5   :  { %v1340_v57 = vsub.f32 %v1329_v47, %v1338_v54  ;;  %v1343_v36 = vmul.f32 %v1341_v52, %v1341_v52  ;;  %6166 = vmatprep.subr.mxu0 %v1470_v55 }
 0x7b6   :  { %6167 = vmatpush3.msra.mxu0 %v1470_v55  ;;  %v1468_v58 = vpop.permute.xlu1 %1467 }
 0x7b7   :  { %v1347_v59 = vsel %vm195_vm0, %v1343_v36, 0.0  ;;  %v1342_v60 = vmul.f32 %v1340_v57, %v1340_v57  ;;  %6168 = vmatprep.subr.mxu0 %v1468_v58 }
 0x7b8   :  { %1348 = vadd.xlane.f32.xlu1 %v1347_v59  ;;  %6169 = vmatpush3.msra.mxu0 %v1468_v58 }
 0x7b9   :  { %v1344_v61 = vsel %vm195_vm0, %v1342_v60, 0.0 }
 0x7ba   :  { %1345 = vadd.xlane.f32.xlu0 %v1344_v61  ;;  %v1466_v30 = vpop.permute.xlu1 %1465 }
 0x7bb   :  { %6170 = vmatprep.subr.mxu0 %v1466_v30 }
 0x7bc   :  { %6171 = vmatpush3.msra.mxu0 %v1466_v30 }
 0x7c9   :  { %1365 = vrot.lane.b32.xlu1 %v7225_v63, %s6907_s3 }
 0x7cd   :  { %1580 = vrot.lane.b32.xlu1 %v7197_v35, %s6909_s28 }
 0x7d0   :  { %1463 = vrot.lane.b32.xlu0 %v7211_v48, %s6907_s3 }
 0x7d1   :  { %1578 = vrot.lane.b32.xlu1 %v7200_v37, %s6909_s28 }
 0x7d4   :  { %1582 = vrot.lane.b32.xlu0 %v7193_v33, %s6909_s28 }
 0x7d8   :  { %1476 = vrot.lane.b32.xlu0 %v7248_v14, %s6907_s3 }
 0x7dc   :  { %1576 = vrot.lane.b32.xlu0 %v7211_v48, %s6909_s28 }
 0x841   :  { %v1349_v15 = vpop.xlane.xlu1 %1348 }
 0x842   :  { %v1351_v18 = vmul.f32 0.03125, %v1349_v15 }
 0x843   :  { %v1346_v19 = vpop.xlane.xlu0 %1345 }
 0x844   :  { %v1353_v22 = vadd.f32 1e-05, %v1351_v18  ;;  %v1350_v23 = vmul.f32 0.03125, %v1346_v19 }
 0x845   :  { %v1366_v39 = vpop.permute.xlu1 %1365 }
 0x846   :  { %6638 = vrsqrt.f32 %v1353_v22  ;;  %v1352_v25 = vadd.f32 1e-05, %v1350_v23 }
 0x847   :  { %v1464_v1 = vpop.permute.xlu0 %1463 }
 0x848   :  { %6640 = vrsqrt.f32 %v1352_v25  ;;  %6172 = vmatprep.subr.mxu0 %v1464_v1 }
 0x849   :  { %6173 = vmatpush3.msra.mxu0 %v1464_v1  ;;  %v1581_v47 = vpop.permute.xlu1 %1580 }
 0x84a   :  { %6175 = vmatmul.mubr.msk.f32.vlgmr.msra.gmra.mxu0 %vm195_vm0, %v7260_v26 }
 0x84b   :  { %6177 = vmatprep.mubr.msk.f32.mxu0 %vm195_vm0, %v7262_v27  ;;  %v1583_v7 = vpop.permute.xlu0 %1582 }
 0x84c   :  { %6180 = vmatprep.subr.mxu1 %v1583_v7 }
 0x84d   :  { %v1579_v3 = vpop.permute.xlu1 %1578 }
 0x84e   :  { %6178 = vmatmul.mubr.msk.f32.gmra.mxu0 %vm195_vm0, %v7269_v2 }
 0x84f   :  { %v1477_v34 = vpop.permute.xlu0 %1476 }
 0x853   :  { %v6639_v17 = vpop.eup %6638  ;;  %v1577_v10 = vpop.permute.xlu0 %1576 }
 0x854   :  { %v1357_v50 = vmul.f32 %v6639_v17, %v1341_v52 }
 0x855   :  { %v6641_v51 = vpop.eup %6640 }
 0x856   :  { %v1356_v29 = vmul.f32 %v6641_v51, %v1340_v57  ;;  %v1363_v38 = vmul.f32 %v7225_v63, %v1357_v50 }
 0x858   :  { %v1362_v40 = vmul.f32 %v7225_v63, %v1356_v29  ;;  %v7277_v42 = vadd.f32 %v1366_v39, %v1363_v38 }
 0x85a   :  { %v7279_v43 = vadd.f32 %v1366_v39, %v1362_v40  ;;  %v1371_v46 = vadd.f32 %v7277_v42, %v7010_v11 }
 0x85c   :  { %v1370_v45 = vadd.f32 %v7279_v43, %v6990_v4 }
 0x85e   :  { %6163 = vmatprep.mubr.msk.f32.mxu1 %vm195_vm0, %v1370_v45 }
 0x85f   :  { %6164 = vmatmul.mubr.msk.f32.vlgmr.msra.gmra.mxu1 %vm195_vm0, %v1371_v46 }
 0x860   :  { %6181 = vmatpush3.msra.mxu1 %v1583_v7  ;;  %6188 = vmatprep.mubr.msk.f32.mxu1 %vm195_vm0, %v99_v44 }
 0x861   :  { %6182 = vmatprep.subr.mxu1 %v1581_v47 }
 0x862   :  { %6183 = vmatpush3.msra.mxu1 %v1581_v47 }
 0x863   :  { %6184 = vmatprep.subr.mxu1 %v1579_v3 }
 0x864   :  { %6185 = vmatpush3.msra.mxu1 %v1579_v3 }
 0x865   :  { %6186 = vmatprep.subr.mxu1 %v1577_v10 }
 0x866   :  { %6187 = vmatpush3.msra.mxu1 %v1577_v10 }
 0x867   :  { %6189 = vmatmul.mubr.msk.f32.vlgmr.msra.gmra.mxu1 %vm195_vm0, %v100_v20 }
 0x868   :  { %6191 = vmatprep.mubr.msk.f32.mxu1 %vm195_vm0, %v101_v12 }
 0x86b   :  { %6192 = vmatmul.mubr.msk.f32.gmra.mxu1 %vm195_vm0, %v102_v6 }
 0x90a   :  { %v6176_v4 = vpop.f32.mrf.mxu0 }
 0x90b   :  { %v7299_v58 = vadd.f32 %v6176_v4, %v1477_v34 }
 0x90c   :  { %v1557_v11 = vpop.f32.mrf.mxu0 }
 0x90d   :  { %v7311_v61 = vadd.f32 %v1557_v11, %v1477_v34  ;;  %v1689_v30 = vmul.f32 %v7299_v58, %v7065_v31  ;;  %v1812_v44 = vmul.f32 %v7299_v58, %v7068_v32 }
 0x90e   :  { %v6179_v49 = vpop.f32.mrf.mxu0 }
 0x90f   :  { %v7291_v52 = vadd.f32 %v6179_v49, %v1477_v34  ;;  %v1688_v0 = vmul.f32 %v7311_v61, %v7065_v31  ;;  %v1811_v15 = vmul.f32 %v7311_v61, %v7068_v32 }
 0x910   :  { %v1567_v54 = vpop.f32.mrf.mxu0 }
 0x911   :  { %v7293_v55 = vadd.f32 %v1567_v54, %v1477_v34  ;;  %v1691_v57 = vmul.f32 %v7291_v52, %v7065_v31  ;;  %v1814_v36 = vmul.f32 %v7291_v52, %v7068_v32 }
 0x913   :  { %6194 = vmatprep.subr.msk.mxu0 %vm195_vm0, %v1691_v57  ;;  %6205 = vmatprep.subr.msk.mxu1 %vm195_vm0, %v1814_v36  ;;  %v1690_v59 = vmul.f32 %v7293_v55, %v7065_v31  ;;  %v1813_v60 = vmul.f32 %v7293_v55, %v7068_v32 }
 0x914   :  { %6195 = vmatpush3.xpose.msk.msra.mxu0 %vm195_vm0, %v1691_v57  ;;  %6206 = vmatpush3.xpose.msk.msra.mxu1 %vm195_vm0, %v1814_v36 }
 0x915   :  { %6196 = vmatprep.subr.msk.mxu0 %vm195_vm0, %v1690_v59  ;;  %6207 = vmatprep.subr.msk.mxu1 %vm195_vm0, %v1813_v60 }
 0x918   :  { %6197 = vmatpush3.xpose.msk.msra.mxu0 %vm195_vm0, %v1690_v59  ;;  %6208 = vmatpush3.xpose.msk.msra.mxu1 %vm195_vm0, %v1813_v60 }
 0x919   :  { %6198 = vmatprep.subr.msk.mxu0 %vm195_vm0, %v1689_v30  ;;  %6209 = vmatprep.subr.msk.mxu1 %vm195_vm0, %v1812_v44 }
 0x91c   :  { %6199 = vmatpush3.xpose.msk.msra.mxu0 %vm195_vm0, %v1689_v30  ;;  %6210 = vmatpush3.xpose.msk.msra.mxu1 %vm195_vm0, %v1812_v44 }
 0x91d   :  { %6200 = vmatprep.subr.msk.mxu0 %vm195_vm0, %v1688_v0  ;;  %6211 = vmatprep.subr.msk.mxu1 %vm195_vm0, %v1811_v15 }
 0x91f   :  { %v6165_v18 = vpop.f32.mrf.mxu1 }
 0x920   :  { %6201 = vmatpush3.xpose.msk.msra.mxu0 %vm195_vm0, %v1688_v0  ;;  %6212 = vmatpush3.xpose.msk.msra.mxu1 %vm195_vm0, %v1811_v15  ;;  %v1454_v19 = vadd.f32 %v6165_v18, %v7248_v14 }
 0x921   :  { %v1448_v20 = vpop.f32.mrf.mxu1 }
 0x922   :  { %v1449_v21 = vadd.f32 %v1448_v20, %v7248_v14  ;;  %v7335_v23 = vmul.f32 0.35355338, %v1454_v19 }
 0x924   :  { %v7333_v22 = vmul.f32 0.35355338, %v1449_v21 }
 0x926   :  { %6202 = vmatprep.mubr.msk.f32.mxu0 %vm195_vm0, %v7333_v22  ;;  %6213 = vmatprep.mubr.msk.f32.mxu1 %vm195_vm0, %v7333_v22 }
 0x927   :  { %6203 = vmatmul.mubr.msk.f32.vlgmr.msra.gmra.mxu0 %vm195_vm0, %v7335_v23  ;;  %6214 = vmatmul.mubr.msk.f32.vlgmr.msra.gmra.mxu1 %vm195_vm0, %v7335_v23  ;;  %v6190_v12 = vpop.f32.mrf.mxu1 }
 0x929   :  { %v1669_v24 = vpop.f32.mrf.mxu1 }
 0x92b   :  { %v6193_v25 = vpop.f32.mrf.mxu1 }
 0x92d   :  { %v1679_v1 = vpop.f32.mrf.mxu1 }
 0x9e7   :  { %v6215_v6 = vpop.f32.mrf.mxu1  ;;  %v6204_v47 = vpop.f32.mrf.mxu0 }
 0x9e8   :  { %v1899_v28 = vadd.f32 %v6215_v6, %v7121_v53  ;;  %v7355_v54 = vadd.f32 %v6204_v47, %v7121_v53 }
 0x9e9   :  { %v1893_v7 = vpop.f32.mrf.mxu1  ;;  %v1776_v34 = vpop.f32.mrf.mxu0 }
 0x9ea   :  { %v1894_v17 = vadd.f32 %v1893_v7, %v7123_v56  ;;  %v1905_v50 = vsel %vm195_vm0, %v1899_v28, -inf  ;;  %v7350_v10 = vadd.f32 %v1776_v34, %v7123_v56  ;;  %v1788_v36 = vsel %vm195_vm0, %v7355_v54, -inf }
 0x9eb   :  { %1906 = vmax.xlane.f32.xlu0 %v1905_v50  ;;  %v2093_v50 = vmul.f32 %v7291_v52, %v7087_v41 }
 0x9ec   :  { %v1902_v51 = vsel %vm195_vm0, %v1894_v17, -inf  ;;  %v1785_v57 = vsel %vm195_vm0, %v7350_v10, -inf }
 0x9ed   :  { %1903 = vmax.xlane.f32.xlu1 %v1902_v51 }
 0xa74   :  { %v1907_v29 = vpop.xlane.xlu0 %1906 }
 0xa75   :  { %v1909_v38 = vsub.f32 %v1899_v28, %v1907_v29 }
 0xa76   :  { %v1904_v39 = vpop.xlane.xlu1 %1903 }
 0xa77   :  { %v1912_v40 = vmul.f32 1.442695, %v1909_v38  ;;  %v1908_v45 = vsub.f32 %v1894_v17, %v1904_v39  ;;  %v2092_v38 = vmul.f32 %v7293_v55, %v7087_v41  ;;  %v2091_v39 = vmul.f32 %v7299_v58, %v7087_v41 }
 0xa79   :  { %6642 = vpow2.f32 %v1912_v40  ;;  %v1910_v46 = vmul.f32 1.442695, %v1908_v45  ;;  %v2090_v40 = vmul.f32 %v7311_v61, %v7087_v41 }
 0xa7b   :  { %6644 = vpow2.f32 %v1910_v46 }
 0xa86   :  { %v6643_v3 = vpop.eup %6642 }
 0xa87   :  { %v1917_v4 = vsel %vm195_vm0, %v6643_v3, 0.0 }
 0xa88   :  { %v6645_v11 = vpop.eup %6644  ;;  %1918 = vadd.xlane.f32.xlu1 %v1917_v4 }
 0xa89   :  { %v1914_v49 = vsel %vm195_vm0, %v6645_v11, 0.0 }
 0xa8a   :  { %1915 = vadd.xlane.f32.xlu0 %v1914_v49 }
 0xa8c   :  { %1786 = vmax.xlane.f32.xlu1 %v1785_v57 }
 0xa90   :  { %1789 = vmax.xlane.f32.xlu1 %v1788_v36 }
 0xaa0   :  { %1588 = vrot.lane.b32.xlu0 %v7248_v14, %s6909_s28 }
 0xb11   :  { %v1919_v59 = vpop.xlane.xlu1 %1918 }
 0xb12   :  { %6646 = vrcp.f32 %v1919_v59 }
 0xb13   :  { %v1916_v60 = vpop.xlane.xlu0 %1915 }
 0xb14   :  { %6648 = vrcp.f32 %v1916_v60 }
 0xb17   :  { %v1589_v30 = vpop.permute.xlu0 %1588 }
 0xb18   :  { %v7363_v44 = vadd.f32 %v1679_v1, %v1589_v30  ;;  %v1685_v0 = vadd.f32 %v6193_v25, %v1589_v30  ;;  %v7365_v15 = vadd.f32 %v6190_v12, %v1589_v30  ;;  %v7369_v20 = vadd.f32 %v1669_v24, %v1589_v30 }
 0xb1a   :  { %v1927_v18 = vmul.f32 %v1685_v0, %v7068_v32  ;;  %v1810_v19 = vmul.f32 %v1685_v0, %v7065_v31  ;;  %v1926_v21 = vmul.f32 %v7363_v44, %v7068_v32  ;;  %v1809_v6 = vmul.f32 %v7363_v44, %v7065_v31 }
 0xb1b   :  { %v1925_v12 = vmul.f32 %v7365_v15, %v7068_v32  ;;  %v1808_v25 = vmul.f32 %v7365_v15, %v7065_v31  ;;  %v1924_v28 = vmul.f32 %v7369_v20, %v7068_v32  ;;  %v1807_v7 = vmul.f32 %v7369_v20, %v7065_v31 }
 0xb1c   :  { %6216 = vmatprep.subr.mxu0 %v1927_v18  ;;  %6227 = vmatprep.subr.mxu1 %v1810_v19  ;;  %v7386_v51 = vmul.f32 %v1685_v0, %v7087_v41  ;;  %v2406_v45 = vmul.f32 %v1685_v0, %v7030_v16  ;;  %v2405_v46 = vmul.f32 %v7363_v44, %v7030_v16 }
 0xb1d   :  { %6217 = vmatpush3.msra.mxu0 %v1927_v18  ;;  %6228 = vmatpush3.msra.mxu1 %v1810_v19  ;;  %v2404_v47 = vmul.f32 %v7365_v15, %v7030_v16  ;;  %v2403_v34 = vmul.f32 %v7369_v20, %v7030_v16 }
 0xb1e   :  { %6218 = vmatprep.subr.mxu0 %v1926_v21  ;;  %6229 = vmatprep.subr.mxu1 %v1809_v6 }
 0xb1f   :  { %v6647_v24 = vpop.eup %6646  ;;  %6219 = vmatpush3.msra.mxu0 %v1926_v21  ;;  %6230 = vmatpush3.msra.mxu1 %v1809_v6 }
 0xb20   :  { %6220 = vmatprep.subr.mxu0 %v1925_v12  ;;  %6231 = vmatprep.subr.mxu1 %v1808_v25  ;;  %v1923_v29 = vmul.f32 %v6647_v24, %v6643_v3  ;;  %v1787_v3 = vpop.xlane.xlu1 %1786 }
 0xb21   :  { %v6649_v1 = vpop.eup %6648  ;;  %6221 = vmatpush3.msra.mxu0 %v1925_v12  ;;  %6232 = vmatpush3.msra.mxu1 %v1808_v25  ;;  %v1791_v4 = vsub.f32 %v7350_v10, %v1787_v3 }
 0xb22   :  { %v1921_v17 = vmul.f32 %v6649_v1, %v6645_v11  ;;  %6222 = vmatprep.subr.mxu0 %v1924_v28  ;;  %6233 = vmatprep.subr.mxu1 %v1807_v7 }
 0xb23   :  { %6223 = vmatpush3.msra.mxu0 %v1924_v28  ;;  %6234 = vmatpush3.msra.mxu1 %v1807_v7  ;;  %v1793_v49 = vmul.f32 1.442695, %v1791_v4 }
 0xb24   :  { %6224 = vmatprep.mubr.msk.f32.mxu0 %vm195_vm0, %v1921_v17  ;;  %6238 = vmatprep.subr.msk.mxu0 %vm195_vm0, %v2093_v50  ;;  %v1790_v11 = vpop.xlane.xlu1 %1789 }
 0xb25   :  { %6249 = vmatprep.subr.mxu1 %v7386_v51  ;;  %6225 = vmatmul.mubr.msk.f32.vlgmr.msra.gmra.mxu0 %vm195_vm0, %v1923_v29  ;;  %v1792_v57 = vsub.f32 %v7355_v54, %v1790_v11  ;;  %6650 = vpow2.f32 %v1793_v49  ;;  %v2205_v11 = vmul.f32 %v7363_v44, %v7087_v41  ;;  %v2204_v49 = vmul.f32 %v7365_v15, %v7087_v41 }
 0xb26   :  { %6239 = vmatpush3.xpose.msk.msra.mxu0 %vm195_vm0, %v2093_v50  ;;  %6246 = vmatprep.mubr.msk.f32.mxu0 %vm195_vm0, %v7333_v22 }
 0xb27   :  { %6240 = vmatprep.subr.msk.mxu0 %vm195_vm0, %v2092_v38  ;;  %v1795_v59 = vmul.f32 1.442695, %v1792_v57  ;;  %v2203_v57 = vmul.f32 %v7369_v20, %v7087_v41 }
 0xb29   :  { %6652 = vpow2.f32 %v1795_v59  ;;  %v2293_v59 = vmul.f32 %v7291_v52, %v7030_v16  ;;  %v2292_v52 = vmul.f32 %v7293_v55, %v7030_v16 }
 0xb2a   :  { %6241 = vmatpush3.xpose.msk.msra.mxu0 %vm195_vm0, %v2092_v38 }
 0xb2b   :  { %6242 = vmatprep.subr.msk.mxu0 %vm195_vm0, %v2091_v39 }
 0xb2e   :  { %6243 = vmatpush3.xpose.msk.msra.mxu0 %vm195_vm0, %v2091_v39 }
 0xb2f   :  { %6244 = vmatprep.subr.msk.mxu0 %vm195_vm0, %v2090_v40 }
 0xb32   :  { %6245 = vmatpush3.xpose.msk.msra.mxu0 %vm195_vm0, %v2090_v40  ;;  %v6651_v6 = vpop.eup %6650 }
 0xb33   :  { %6271 = vmatprep.subr.mxu0 %v2406_v45  ;;  %v1797_v54 = vsel %vm195_vm0, %v6651_v6, 0.0 }
 0xb35   :  { %6247 = vmatmul.mubr.msk.f32.vlgmr.msra.gmra.mxu0 %vm195_vm0, %v7335_v23 }
 0xb36   :  { %6272 = vmatpush3.msra.mxu0 %v2406_v45  ;;  %v6653_v12 = vpop.eup %6652 }
 0xb37   :  { %6273 = vmatprep.subr.mxu0 %v2405_v46  ;;  %v1800_v25 = vsel %vm195_vm0, %v6653_v12, 0.0 }
 0xb38   :  { %6274 = vmatpush3.msra.mxu0 %v2405_v46 }
 0xb39   :  { %6275 = vmatprep.subr.mxu0 %v2404_v47 }
 0xb3a   :  { %6276 = vmatpush3.msra.mxu0 %v2404_v47 }
 0xb3b   :  { %6277 = vmatprep.subr.mxu0 %v2403_v34 }
 0xb3c   :  { %6278 = vmatpush3.msra.mxu0 %v2403_v34 }
 0xbe5   :  { %v7418_v36 = vpop.f32.mrf.mxu0 }
 0xbe7   :  { %v7420_v60 = vpop.f32.mrf.mxu0 }
 0xbf5   :  { %v6248_v30 = vpop.f32.mrf.mxu0 }
 0xbf6   :  { %v2178_v19 = vadd.f32 %v6248_v30, %v7121_v53 }
 0xbf7   :  { %v2172_v0 = vpop.f32.mrf.mxu0 }
 0xbf8   :  { %v2173_v18 = vadd.f32 %v2172_v0, %v7123_v56  ;;  %v2184_v10 = vsel %vm195_vm0, %v2178_v19, -inf }
 0xbfa   :  { %v2181_v21 = vsel %vm195_vm0, %v2173_v18, -inf }
 0xbfb   :  { %2182 = vmax.xlane.f32.xlu1 %v2181_v21 }
 0xbff   :  { %2185 = vmax.xlane.f32.xlu1 %v2184_v10 }
 0xc03   :  { %1798 = vadd.xlane.f32.xlu1 %v1797_v54 }
 0xc07   :  { %1801 = vadd.xlane.f32.xlu1 %v1800_v25 }
 0xc84   :  { %v2183_v24 = vpop.xlane.xlu1 %2182 }
 0xc85   :  { %v2187_v1 = vsub.f32 %v2173_v18, %v2183_v24  ;;  %v2290_v18 = vmul.f32 %v7311_v61, %v7030_v16 }
 0xc87   :  { %v2189_v28 = vmul.f32 1.442695, %v2187_v1 }
 0xc88   :  { %v2186_v7 = vpop.xlane.xlu1 %2185 }
 0xc89   :  { %6654 = vpow2.f32 %v2189_v28  ;;  %v2188_v17 = vsub.f32 %v2178_v19, %v2186_v7 }
 0xc8b   :  { %v2191_v50 = vmul.f32 1.442695, %v2188_v17 }
 0xc8c   :  { %v1799_v29 = vpop.xlane.xlu1 %1798 }
 0xc8d   :  { %6656 = vpow2.f32 %v2191_v50 }
 0xc8e   :  { %6658 = vrcp.f32 %v1799_v29 }
 0xc90   :  { %v1802_v38 = vpop.xlane.xlu1 %1801 }
 0xc91   :  { %6660 = vrcp.f32 %v1802_v38 }
 0xc96   :  { %v6655_v39 = vpop.eup %6654 }
 0xc97   :  { %v2193_v40 = vsel %vm195_vm0, %v6655_v39, 0.0 }
 0xc98   :  { %2194 = vadd.xlane.f32.xlu0 %v2193_v40 }
 0xc9a   :  { %v6657_v45 = vpop.eup %6656 }
 0xc9b   :  { %v6659_v46 = vpop.eup %6658  ;;  %v2196_v47 = vsel %vm195_vm0, %v6657_v45, 0.0 }
 0xc9c   :  { %2197 = vadd.xlane.f32.xlu1 %v2196_v47  ;;  %v1804_v34 = vmul.f32 %v6659_v46, %v6651_v6 }
 0xc9e   :  { %v6661_v3 = vpop.eup %6660  ;;  %6235 = vmatprep.mubr.msk.f32.mxu1 %vm195_vm0, %v1804_v34 }
 0xc9f   :  { %v1806_v4 = vmul.f32 %v6661_v3, %v6653_v12 }
 0xca1   :  { %6236 = vmatmul.mubr.msk.f32.vlgmr.msra.gmra.mxu1 %vm195_vm0, %v1806_v4 }
 0xca2   :  { %6250 = vmatpush3.msra.mxu1 %v7386_v51 }
 0xca3   :  { %6251 = vmatprep.subr.mxu1 %v2205_v11 }
 0xca4   :  { %6252 = vmatpush3.msra.mxu1 %v2205_v11 }
 0xca5   :  { %6253 = vmatprep.subr.mxu1 %v2204_v49 }
 0xca6   :  { %6254 = vmatpush3.msra.mxu1 %v2204_v49 }
 0xca7   :  { %6255 = vmatprep.subr.mxu1 %v2203_v57 }
 0xca8   :  { %6256 = vmatpush3.msra.mxu1 %v2203_v57 }
 0xca9   :  { %6260 = vmatprep.subr.msk.mxu1 %vm195_vm0, %v2293_v59 }
 0xcae   :  { %2494 = vrot.lane.b32.xlu0 %v7197_v35, %s6911_s8  ;;  %v2291_v35 = vmul.f32 %v7299_v58, %v7030_v16 }
 0xd21   :  { %v2195_v44 = vpop.xlane.xlu0 %2194 }
 0xd22   :  { %6662 = vrcp.f32 %v2195_v44 }
 0xd25   :  { %v2198_v51 = vpop.xlane.xlu1 %2197  ;;  %v2495_v4 = vpop.permute.xlu0 %2494 }
 0xd26   :  { %6664 = vrcp.f32 %v2198_v51 }
 0xd2f   :  { %v6663_v15 = vpop.eup %6662 }
 0xd30   :  { %v2200_v30 = vmul.f32 %v6663_v15, %v6655_v39 }
 0xd32   :  { %6257 = vmatprep.mubr.msk.f32.mxu1 %vm195_vm0, %v2200_v30 }
 0xd33   :  { %v6665_v20 = vpop.eup %6664 }
 0xd34   :  { %v2202_v0 = vmul.f32 %v6665_v20, %v6657_v45 }
 0xd36   :  { %6258 = vmatmul.mubr.msk.f32.vlgmr.msra.gmra.mxu1 %vm195_vm0, %v2202_v0 }
 0xd37   :  { %6261 = vmatpush3.xpose.msk.msra.mxu1 %vm195_vm0, %v2293_v59  ;;  %6268 = vmatprep.mubr.msk.f32.mxu1 %vm195_vm0, %v7333_v22 }
 0xd38   :  { %6262 = vmatprep.subr.msk.mxu1 %vm195_vm0, %v2292_v52 }
 0xd3b   :  { %6263 = vmatpush3.xpose.msk.msra.mxu1 %vm195_vm0, %v2292_v52 }
 0xd3c   :  { %6264 = vmatprep.subr.msk.mxu1 %vm195_vm0, %v2291_v35 }
 0xd3f   :  { %6265 = vmatpush3.xpose.msk.msra.mxu1 %vm195_vm0, %v2291_v35 }
 0xd40   :  { %6266 = vmatprep.subr.msk.mxu1 %vm195_vm0, %v2290_v18 }
 0xd43   :  { %6267 = vmatpush3.xpose.msk.msra.mxu1 %vm195_vm0, %v2290_v18 }
 0xd46   :  { %6269 = vmatmul.mubr.msk.f32.vlgmr.msra.gmra.mxu1 %vm195_vm0, %v7335_v23 }
 0xd61   :  { %v6237_v55 = vpop.f32.mrf.mxu1 }
 0xd62   :  { %v2087_v58 = vadd.f32 %v6237_v55, %v7418_v36 }
 0xd63   :  { %v2081_v22 = vpop.f32.mrf.mxu1 }
 0xdf6   :  { %v6259_v19 = vpop.f32.mrf.mxu1 }
 0xdf7   :  { %v2289_v21 = vadd.f32 %v6259_v19, %v2087_v58 }
 0xdf8   :  { %v2279_v10 = vpop.f32.mrf.mxu1 }
 0xe06   :  { %v6270_v6 = vpop.f32.mrf.mxu1 }
 0xe07   :  { %v2378_v12 = vadd.f32 %v6270_v6, %v7121_v53 }
 0xe08   :  { %v2372_v54 = vpop.f32.mrf.mxu1 }
 0xe09   :  { %v2373_v61 = vadd.f32 %v2372_v54, %v7123_v56  ;;  %v2384_v24 = vsel %vm195_vm0, %v2378_v12, -inf }
 0xe0b   :  { %v2381_v25 = vsel %vm195_vm0, %v2373_v61, -inf }
 0xe0c   :  { %2382 = vmax.xlane.f32.xlu1 %v2381_v25  ;;  %v181_v25 = vld [vmem:[#allocation10 + $0x8] sm:$0xff] }
 0xe10   :  { %2385 = vmax.xlane.f32.xlu1 %v2384_v24  ;;  %v180_v24 = vld [vmem:[#allocation10] sm:$0xff] }
 0xe95   :  { %v2383_v23 = vpop.xlane.xlu1 %2382 }
 0xe96   :  { %v2387_v1 = vsub.f32 %v2373_v61, %v2383_v23  ;;  %v183_v61 = vld [vmem:[#allocation10 + $0x18] sm:$0xff] }
 0xe97   :  { %6293 = vmatprep.subr.mxu1 %v183_v61  ;;  %v187_v23 = vld [vmem:[#allocation10 + $0x38] sm:$0xff] }
 0xe98   :  { %v2389_v28 = vmul.f32 1.442695, %v2387_v1  ;;  %6294 = vmatpush3.msra.mxu1 %v183_v61  ;;  %v184_v1 = vld [vmem:[#allocation10 + $0x20] sm:$0xff] }
 0xe99   :  { %v2386_v7 = vpop.xlane.xlu1 %2385 }
 0xe9a   :  { %6666 = vpow2.f32 %v2389_v28  ;;  %v2388_v36 = vsub.f32 %v2378_v12, %v2386_v7  ;;  %v182_v12 = vld [vmem:[#allocation10 + $0x10] sm:$0xff]  ;;  %v2626_v7 = vsub.s32 2, %v7001_v9 }
 0xe9b   :  { %6295 = vmatprep.subr.mxu1 %v182_v12  ;;  %v186_v28 = vld [vmem:[#allocation10 + $0x30] sm:$0xff] }
 0xe9c   :  { %v2391_v17 = vmul.f32 1.442695, %v2388_v36  ;;  %6296 = vmatpush3.msra.mxu1 %v182_v12  ;;  %v7505_v36 = vld [vmem:[%s8060_s6] sm:$0x1f] }
 0xe9d   :  { %6297 = vmatprep.subr.mxu1 %v181_v25 }
 0xe9e   :  { %6668 = vpow2.f32 %v2391_v17  ;;  %6298 = vmatpush3.msra.mxu1 %v181_v25  ;;  %v2627_v17 = vrot.slane %v7505_v36, %v2626_v7 }
 0xe9f   :  { %6299 = vmatprep.subr.mxu1 %v180_v24 }
 0xea0   :  { %6300 = vmatpush3.msra.mxu1 %v180_v24 }
 0xea7   :  { %v6667_v50 = vpop.eup %6666 }
 0xea8   :  { %v2393_v29 = vsel %vm195_vm0, %v6667_v50, 0.0 }
 0xea9   :  { %2394 = vadd.xlane.f32.xlu1 %v2393_v29 }
 0xeab   :  { %v6669_v38 = vpop.eup %6668 }
 0xeac   :  { %v2396_v39 = vsel %vm195_vm0, %v6669_v38, 0.0 }
 0xead   :  { %2397 = vadd.xlane.f32.xlu1 %v2396_v39 }
 0xebe   :  { %2496 = vrot.lane.b32.xlu1 %v7193_v33, %s6911_s8 }
 0xec2   :  { %2492 = vrot.lane.b32.xlu1 %v7200_v37, %s6911_s8 }
 0xec6   :  { %2490 = vrot.lane.b32.xlu1 %v7211_v48, %s6911_s8 }
 0xeca   :  { %2502 = vrot.lane.b32.xlu1 %v7248_v14, %s6911_s8  ;;  %v2082_v14 = vadd.f32 %v2081_v22, %v7420_v60 }
 0xecc   :  { %v2288_v49 = vadd.f32 %v2279_v10, %v2082_v14 }
 0xf32   :  { %v2395_v40 = vpop.xlane.xlu1 %2394 }
 0xf33   :  { %6670 = vrcp.f32 %v2395_v40 }
 0xf36   :  { %v2398_v45 = vpop.xlane.xlu1 %2397 }
 0xf37   :  { %6672 = vrcp.f32 %v2398_v45 }
 0xf3a   :  { %v2497_v46 = vpop.permute.xlu1 %2496 }
 0xf3b   :  { %6282 = vmatprep.subr.mxu0 %v2497_v46 }
 0xf3e   :  { %v2493_v37 = vpop.permute.xlu1 %2492 }
 0xf40   :  { %v6671_v47 = vpop.eup %6670 }
 0xf41   :  { %v2400_v34 = vmul.f32 %v6671_v47, %v6667_v50 }
 0xf42   :  { %v2491_v48 = vpop.permute.xlu1 %2490 }
 0xf43   :  { %6279 = vmatprep.mubr.msk.f32.mxu0 %vm195_vm0, %v2400_v34 }
 0xf44   :  { %v6673_v33 = vpop.eup %6672 }
 0xf45   :  { %v2402_v3 = vmul.f32 %v6673_v33, %v6669_v38 }
 0xf46   :  { %v2503_v51 = vpop.permute.xlu1 %2502 }
 0xf47   :  { %6280 = vmatmul.mubr.msk.f32.vlgmr.msra.gmra.mxu0 %vm195_vm0, %v2402_v3 }
 0xf48   :  { %6283 = vmatpush3.msra.mxu0 %v2497_v46 }
 0xf49   :  { %6284 = vmatprep.subr.mxu0 %v2495_v4 }
 0xf4a   :  { %6285 = vmatpush3.msra.mxu0 %v2495_v4 }
 0xf4b   :  { %6286 = vmatprep.subr.mxu0 %v2493_v37 }
 0xf4c   :  { %6287 = vmatpush3.msra.mxu0 %v2493_v37 }
 0xf4d   :  { %6288 = vmatprep.subr.mxu0 %v2491_v48 }
 0xf4e   :  { %6289 = vmatpush3.msra.mxu0 %v2491_v48 }
0x1007   :  { %v6281_v11 = vpop.f32.mrf.mxu0 }
0x1008   :  { %v2489_v44 = vadd.f32 %v6281_v11, %v2289_v21 }
0x1009   :  { %v2479_v57 = vpop.f32.mrf.mxu0 }
0x100a   :  { %v2488_v59 = vadd.f32 %v2479_v57, %v2288_v49 }
0x100c   :  { %6290 = vmatprep.mubr.msk.f32.mxu0 %vm195_vm0, %v2488_v59 }
0x100d   :  { %6291 = vmatmul.mubr.msk.f32.vlgmr.msra.gmra.mxu0 %vm195_vm0, %v2489_v44 }
0x10cd   :  { %v6292_v15 = vpop.f32.mrf.mxu0 }
0x10ce   :  { %v2583_v30 = vadd.f32 %v6292_v15, %v2503_v51 }
0x10cf   :  { %v2577_v20 = vpop.f32.mrf.mxu0 }
0x10d0   :  { %v2578_v0 = vadd.f32 %v2577_v20, %v2503_v51  ;;  %v2587_v52 = vadd.f32 %v2583_v30, %v7277_v42 }
0x10d2   :  { %v2591_v35 = vsel %vm195_vm0, %v2587_v52, 0.0  ;;  %v2586_v60 = vadd.f32 %v2578_v0, %v7279_v43 }
0x10d3   :  { %2592 = vadd.xlane.f32.xlu0 %v2591_v35 }
0x10d4   :  { %v2588_v18 = vsel %vm195_vm0, %v2586_v60, 0.0 }
0x10d5   :  { %2589 = vadd.xlane.f32.xlu1 %v2588_v18 }
0x10e6   :  { %2614 = vrot.lane.b32.xlu1 %v7225_v63, %s6909_s28 }
0x10ea   :  { %2733 = vrot.lane.b32.xlu1 %v187_v23, %s6909_s28  ;;  %v7544_v23 = vld [vmem:[%s8060_s6 + $0x8] sm:$0x1f] }
0x10ee   :  { %2731 = vrot.lane.b32.xlu1 %v186_v28, %s6909_s28 }
0x115c   :  { %v2593_v55 = vpop.xlane.xlu0 %2592 }
0x115d   :  { %v2595_v22 = vmul.f32 0.03125, %v2593_v55 }
0x115e   :  { %v2590_v58 = vpop.xlane.xlu1 %2589 }
0x115f   :  { %v2594_v19 = vmul.f32 0.03125, %v2590_v58  ;;  %v2597_v21 = vsub.f32 %v2587_v52, %v2595_v22 }
0x1161   :  { %v2596_v10 = vsub.f32 %v2586_v60, %v2594_v19  ;;  %v2599_v54 = vmul.f32 %v2597_v21, %v2597_v21 }
0x1162   :  { %v2615_v46 = vpop.permute.xlu1 %2614 }
0x1163   :  { %v2598_v6 = vmul.f32 %v2596_v10, %v2596_v10  ;;  %v2603_v43 = vsel %vm195_vm0, %v2599_v54, 0.0 }
0x1165   :  { %v2600_v42 = vsel %vm195_vm0, %v2598_v6, 0.0 }
0x1166   :  { %2601 = vadd.xlane.f32.xlu0 %v2600_v42  ;;  %v2734_v47 = vpop.permute.xlu1 %2733 }
0x1167   :  { %6304 = vmatprep.subr.mxu0 %v2734_v47 }
0x1168   :  { %6305 = vmatpush3.msra.mxu0 %v2734_v47  ;;  %v2859_v47 = vsub.s32 4, %v7001_v9 }
0x116a   :  { %2604 = vadd.xlane.f32.xlu0 %v2603_v43  ;;  %v2732_v4 = vpop.permute.xlu1 %2731 }
0x116b   :  { %6306 = vmatprep.subr.mxu0 %v2732_v4 }
0x116c   :  { %6307 = vmatpush3.msra.mxu0 %v2732_v4 }
0x1180   :  { %2619 = vrot.lane.b32.xlu0 %v7225_v63, %s6911_s8  ;;  %v185_v63 = vld [vmem:[#allocation10 + $0x28] sm:$0xff] }
0x1181   :  { %2729 = vrot.lane.b32.xlu1 %v185_v63, %s6909_s28 }
0x1184   :  { %2727 = vrot.lane.b32.xlu0 %v184_v1, %s6909_s28  ;;  %v7549_v1 = vrot.slane %v7544_v23, %v193_v13 }
0x1185   :  { %2725 = vrot.lane.b32.xlu1 %v183_v61, %s6909_s28  ;;  %v7517_v61 = vld [vmem:[#allocation8 + $0x70] sm:$0xff] }
0x1186   :  { %6323 = vmatprep.subr.mxu1 %v7517_v61 }
0x1188   :  { %2723 = vrot.lane.b32.xlu0 %v182_v12, %s6909_s28  ;;  %v7522_v12 = vld [vmem:[#allocation8 + $0x60] sm:$0xff] }
0x1189   :  { %2721 = vrot.lane.b32.xlu1 %v181_v25, %s6909_s28  ;;  %v7529_v25 = vld [vmem:[#allocation8 + $0x50] sm:$0xff] }
0x118c   :  { %2719 = vrot.lane.b32.xlu0 %v180_v24, %s6909_s28  ;;  %v7534_v24 = vld [vmem:[#allocation8 + $0x40] sm:$0xff] }
0x118d   :  { %2744 = vrot.lane.b32.xlu1 %v2627_v17, %s6909_s28 }
0x11ef   :  { %v2602_v50 = vpop.xlane.xlu0 %2601 }
0x11f0   :  { %v2606_v29 = vmul.f32 0.03125, %v2602_v50 }
0x11f2   :  { %v2608_v38 = vadd.f32 1e-05, %v2606_v29 }
0x11f3   :  { %v2605_v39 = vpop.xlane.xlu0 %2604  ;;  %v2730_v57 = vpop.permute.xlu1 %2729 }
0x11f4   :  { %6674 = vrsqrt.f32 %v2608_v38  ;;  %v2607_v40 = vmul.f32 0.03125, %v2605_v39  ;;  %6308 = vmatprep.subr.mxu0 %v2730_v57 }
0x11f5   :  { %6309 = vmatpush3.msra.mxu0 %v2730_v57 }
0x11f6   :  { %v2609_v45 = vadd.f32 1e-05, %v2607_v40 }
0x11f7   :  { %v2620_v33 = vpop.permute.xlu0 %2619  ;;  %v2726_v51 = vpop.permute.xlu1 %2725 }
0x11f8   :  { %6676 = vrsqrt.f32 %v2609_v45 }
0x11fb   :  { %v2728_v14 = vpop.permute.xlu0 %2727  ;;  %v2722_v30 = vpop.permute.xlu1 %2721 }
0x11fc   :  { %6310 = vmatprep.subr.mxu0 %v2728_v14 }
0x11fd   :  { %6311 = vmatpush3.msra.mxu0 %v2728_v14 }
0x11fe   :  { %6312 = vmatprep.subr.mxu0 %v2726_v51 }
0x11ff   :  { %v2724_v15 = vpop.permute.xlu0 %2723  ;;  %6313 = vmatpush3.msra.mxu0 %v2726_v51  ;;  %v2745_v22 = vpop.permute.xlu1 %2744 }
0x1200   :  { %6314 = vmatprep.subr.mxu0 %v2724_v15 }
0x1201   :  { %v6675_v34 = vpop.eup %6674  ;;  %6315 = vmatpush3.msra.mxu0 %v2724_v15 }
0x1202   :  { %v2612_v3 = vmul.f32 %v6675_v34, %v2596_v10  ;;  %6316 = vmatprep.subr.mxu0 %v2722_v30 }
0x1203   :  { %v2720_v20 = vpop.permute.xlu0 %2719  ;;  %6317 = vmatpush3.msra.mxu0 %v2722_v30 }
0x1204   :  { %v2617_v37 = vmul.f32 %v2615_v46, %v2612_v3  ;;  %6318 = vmatprep.subr.mxu0 %v2720_v20 }
0x1205   :  { %v6677_v48 = vpop.eup %6676  ;;  %6319 = vmatpush3.msra.mxu0 %v2720_v20 }
0x1206   :  { %v2613_v11 = vmul.f32 %v6677_v48, %v2597_v21  ;;  %v2622_v49 = vadd.f32 %v2620_v33, %v2617_v37 }
0x1208   :  { %v2618_v59 = vmul.f32 %v2615_v46, %v2613_v11  ;;  %6301 = vmatprep.mubr.msk.f32.mxu1 %vm195_vm0, %v2622_v49 }
0x120a   :  { %v2623_v44 = vadd.f32 %v2620_v33, %v2618_v59  ;;  %v7561_v33 = vrot.slane %v7505_v36, %v2859_v47 }
0x120c   :  { %6302 = vmatmul.mubr.msk.f32.vlgmr.msra.gmra.mxu1 %vm195_vm0, %v2623_v44 }
0x120d   :  { %6324 = vmatpush3.msra.mxu1 %v7517_v61 }
0x120e   :  { %6325 = vmatprep.subr.mxu1 %v7522_v12 }
0x120f   :  { %6326 = vmatpush3.msra.mxu1 %v7522_v12 }
0x1210   :  { %6327 = vmatprep.subr.mxu1 %v7529_v25 }
0x1211   :  { %6328 = vmatpush3.msra.mxu1 %v7529_v25 }
0x1212   :  { %6329 = vmatprep.subr.mxu1 %v7534_v24 }
0x1213   :  { %6330 = vmatpush3.msra.mxu1 %v7534_v24 }
0x12cc   :  { %v6303_v0 = vpop.f32.mrf.mxu1 }
0x12cd   :  { %v2706_v52 = vadd.f32 %v6303_v0, %v2627_v17 }
0x12ce   :  { %v2700_v35 = vpop.f32.mrf.mxu1 }
0x12cf   :  { %v2701_v60 = vadd.f32 %v2700_v35, %v2627_v17  ;;  %v2710_v55 = vmax.f32 %v2706_v52, 0.0 }
0x12d1   :  { %v2709_v18 = vmax.f32 %v2701_v60, 0.0 }
0x12d3   :  { %6320 = vmatprep.mubr.msk.f32.mxu0 %vm2747_vm14, %v2709_v18 }
0x12d4   :  { %6321 = vmatmul.mubr.msk.f32.vlgmr.msra.gmra.mxu0 %vm2747_vm14, %v2710_v55 }
0x1394   :  { %v6322_v58 = vpop.f32.mrf.mxu0 }
0x1395   :  { %v2826_v19 = vadd.f32 %v6322_v58, %v2745_v22 }
0x1396   :  { %v2820_v21 = vpop.f32.mrf.mxu0 }
0x1397   :  { %v2821_v10 = vadd.f32 %v2820_v21, %v2745_v22  ;;  %v2830_v6 = vadd.f32 %v2826_v19, %v2623_v44  ;;  %v7575_v22 = vld [vmem:[#allocation5] sm:$0xff]  ;;  %v7584_v21 = vld [vmem:[#allocation5 + $0x8] sm:$0xff] }
0x1399   :  { %v2834_v42 = vsel %vm195_vm0, %v2830_v6, 0.0  ;;  %v2829_v54 = vadd.f32 %v2821_v10, %v2622_v49 }
0x139a   :  { %2835 = vadd.xlane.f32.xlu1 %v2834_v42 }
0x139b   :  { %v2831_v43 = vsel %vm195_vm0, %v2829_v54, 0.0 }
0x139c   :  { %2832 = vadd.xlane.f32.xlu0 %v2831_v43 }
0x13ab   :  { %2988 = vrot.lane.b32.xlu1 %v7517_v61, %s6907_s3 }
0x13af   :  { %2986 = vrot.lane.b32.xlu1 %v7522_v12, %s6907_s3 }
0x13b3   :  { %2984 = vrot.lane.b32.xlu1 %v7529_v25, %s6907_s3 }
0x13b7   :  { %3079 = vrot.lane.b32.xlu1 %v7517_v61, %s6909_s28 }
0x13bb   :  { %2995 = vrot.lane.b32.xlu1 %v7549_v1, %s6907_s3 }
0x13bf   :  { %3073 = vrot.lane.b32.xlu1 %v7534_v24, %s6909_s28 }
0x1423   :  { %v2836_v28 = vpop.xlane.xlu1 %2835 }
0x1424   :  { %v2838_v63 = vmul.f32 0.03125, %v2836_v28 }
0x1425   :  { %v2833_v17 = vpop.xlane.xlu0 %2832 }
0x1426   :  { %v2837_v50 = vmul.f32 0.03125, %v2833_v17  ;;  %v2840_v29 = vsub.f32 %v2830_v6, %v2838_v63 }
0x1427   :  { %v2989_v46 = vpop.permute.xlu1 %2988 }
0x1428   :  { %v2839_v38 = vsub.f32 %v2829_v54, %v2837_v50  ;;  %v2842_v45 = vmul.f32 %v2840_v29, %v2840_v29  ;;  %6334 = vmatprep.subr.mxu1 %v2989_v46 }
0x142a   :  { %v2841_v39 = vmul.f32 %v2839_v38, %v2839_v38  ;;  %v2846_v13 = vsel %vm195_vm0, %v2842_v45, 0.0 }
0x142b   :  { %v2987_v34 = vpop.permute.xlu1 %2986 }
0x142c   :  { %v2843_v40 = vsel %vm195_vm0, %v2841_v39, 0.0 }
0x142d   :  { %2844 = vadd.xlane.f32.xlu0 %v2843_v40 }
0x142f   :  { %v2985_v3 = vpop.permute.xlu1 %2984 }
0x1431   :  { %2847 = vadd.xlane.f32.xlu0 %v2846_v13 }
0x1433   :  { %v3080_v4 = vpop.permute.xlu1 %3079 }
0x1434   :  { %6345 = vmatprep.subr.mxu0 %v3080_v4 }
0x1435   :  { %6346 = vmatpush3.msra.mxu0 %v3080_v4 }
0x1437   :  { %v2996_v44 = vpop.permute.xlu1 %2995 }
0x143b   :  { %v3074_v0 = vpop.permute.xlu1 %3073 }
0x1447   :  { %2864 = vrot.lane.b32.xlu0 %v7561_v33, %s6907_s3 }
0x144b   :  { %2982 = vrot.lane.b32.xlu0 %v7534_v24, %s6907_s3 }
0x144f   :  { %3077 = vrot.lane.b32.xlu0 %v7522_v12, %s6909_s28 }
0x1453   :  { %3075 = vrot.lane.b32.xlu0 %v7529_v25, %s6909_s28 }
0x14b6   :  { %v2845_v37 = vpop.xlane.xlu0 %2844 }
0x14b7   :  { %v2849_v48 = vmul.f32 0.03125, %v2845_v37 }
0x14b9   :  { %v2851_v36 = vadd.f32 1e-05, %v2849_v48 }
0x14ba   :  { %v2848_v14 = vpop.xlane.xlu0 %2847 }
0x14bb   :  { %6678 = vrsqrt.f32 %v2851_v36  ;;  %v2850_v11 = vmul.f32 0.03125, %v2848_v14 }
0x14bd   :  { %v2852_v49 = vadd.f32 1e-05, %v2850_v11 }
0x14be   :  { %v2865_v57 = vpop.permute.xlu0 %2864 }
0x14bf   :  { %6680 = vrsqrt.f32 %v2852_v49 }
0x14c2   :  { %v2983_v59 = vpop.permute.xlu0 %2982 }
0x14c6   :  { %v3078_v51 = vpop.permute.xlu0 %3077 }
0x14c7   :  { %6347 = vmatprep.subr.mxu0 %v3078_v51 }
0x14c8   :  { %v6679_v15 = vpop.eup %6678  ;;  %6348 = vmatpush3.msra.mxu0 %v3078_v51 }
0x14c9   :  { %v2855_v30 = vmul.f32 %v6679_v15, %v2839_v38 }
0x14ca   :  { %v3076_v20 = vpop.permute.xlu0 %3075 }
0x14cb   :  { %v2861_v52 = vmul.f32 %v7561_v33, %v2855_v30  ;;  %6349 = vmatprep.subr.mxu0 %v3076_v20 }
0x14cc   :  { %v6681_v35 = vpop.eup %6680  ;;  %6350 = vmatpush3.msra.mxu0 %v3076_v20 }
0x14cd   :  { %v2856_v60 = vmul.f32 %v6681_v35, %v2840_v29  ;;  %v7572_v18 = vadd.f32 %v2865_v57, %v2861_v52  ;;  %6351 = vmatprep.subr.mxu0 %v3074_v0 }
0x14ce   :  { %6352 = vmatpush3.msra.mxu0 %v3074_v0 }
0x14cf   :  { %v2862_v55 = vmul.f32 %v7561_v33, %v2856_v60  ;;  %v2889_v58 = vadd.f32 %v7575_v22, %v7572_v18  ;;  %6353 = vmatprep.mubr.msk.f32.mxu0 %vm195_vm0, %v7572_v18 }
0x14d1   :  { %v7581_v19 = vadd.f32 %v2865_v57, %v2862_v55  ;;  %6331 = vmatprep.mubr.msk.f32.mxu1 %vm195_vm0, %v2889_v58 }
0x14d3   :  { %v2890_v10 = vadd.f32 %v7584_v21, %v7581_v19  ;;  %6354 = vmatmul.mubr.msk.f32.vlgmr.msra.gmra.mxu0 %vm195_vm0, %v7581_v19 }
0x14d5   :  { %6332 = vmatmul.mubr.msk.f32.vlgmr.msra.gmra.mxu1 %vm195_vm0, %v2890_v10 }
0x14d6   :  { %6335 = vmatpush3.msra.mxu1 %v2989_v46  ;;  %6342 = vmatprep.mubr.msk.f32.mxu1 %vm195_vm0, %v2889_v58 }
0x14d7   :  { %6336 = vmatprep.subr.mxu1 %v2987_v34 }
0x14d8   :  { %6337 = vmatpush3.msra.mxu1 %v2987_v34 }
0x14d9   :  { %6338 = vmatprep.subr.mxu1 %v2985_v3 }
0x14da   :  { %6339 = vmatpush3.msra.mxu1 %v2985_v3 }
0x14db   :  { %6340 = vmatprep.subr.mxu1 %v2983_v59 }
0x14dc   :  { %6341 = vmatpush3.msra.mxu1 %v2983_v59 }
0x14dd   :  { %6343 = vmatmul.mubr.msk.f32.vlgmr.msra.gmra.mxu1 %vm195_vm0, %v2890_v10 }
0x1593   :  { %v7639_v3 = vpop.f32.mrf.mxu0 }
0x1595   :  { %v6333_v6 = vpop.f32.mrf.mxu1  ;;  %v7641_v4 = vpop.f32.mrf.mxu0 }
0x1596   :  { %v2973_v45 = vadd.f32 %v6333_v6, %v7549_v1 }
0x1597   :  { %v2967_v42 = vpop.f32.mrf.mxu1 }
0x1598   :  { %v2968_v54 = vadd.f32 %v2967_v42, %v7549_v1  ;;  %v7623_v46 = vmul.f32 0.35355338, %v2973_v45 }
0x159a   :  { %v7594_v43 = vmul.f32 0.35355338, %v2968_v54 }
0x159c   :  { %6360 = vmatprep.mubr.msk.f32.mxu1 %vm195_vm0, %v7594_v43  ;;  %6367 = vmatprep.mubr.msk.f32.mxu0 %vm195_vm0, %v7594_v43 }
0x159d   :  { %v6344_v28 = vpop.f32.mrf.mxu1 }
0x159e   :  { %v7600_v63 = vadd.f32 %v6344_v28, %v2996_v44 }
0x159f   :  { %v3064_v17 = vpop.f32.mrf.mxu1 }
0x15a0   :  { %v7602_v50 = vadd.f32 %v3064_v17, %v2996_v44  ;;  %v3170_v29 = vmul.f32 %v7600_v63, %v7065_v31  ;;  %v3283_v38 = vmul.f32 %v7600_v63, %v7068_v32  ;;  %v3552_v13 = vmul.f32 %v7600_v63, %v7087_v41 }
0x15a2   :  { %6356 = vmatprep.subr.msk.mxu1 %vm195_vm0, %v3170_v29  ;;  %6363 = vmatprep.subr.msk.mxu0 %vm195_vm0, %v3283_v38  ;;  %v3169_v39 = vmul.f32 %v7602_v50, %v7065_v31  ;;  %v3282_v40 = vmul.f32 %v7602_v50, %v7068_v32  ;;  %v3551_v34 = vmul.f32 %v7602_v50, %v7087_v41 }
0x15a3   :  { %6357 = vmatpush3.xpose.msk.msra.mxu1 %vm195_vm0, %v3170_v29  ;;  %6364 = vmatpush3.xpose.msk.msra.mxu0 %vm195_vm0, %v3283_v38 }
0x15a4   :  { %6358 = vmatprep.subr.msk.mxu1 %vm195_vm0, %v3169_v39  ;;  %6365 = vmatprep.subr.msk.mxu0 %vm195_vm0, %v3282_v40 }
0x15a7   :  { %6359 = vmatpush3.xpose.msk.msra.mxu1 %vm195_vm0, %v3169_v39  ;;  %6366 = vmatpush3.xpose.msk.msra.mxu0 %vm195_vm0, %v3282_v40 }
0x15a8   :  { %6384 = vmatprep.subr.msk.mxu0 %vm195_vm0, %v3552_v13 }
0x15aa   :  { %6361 = vmatmul.mubr.msk.f32.vlgmr.msra.gmra.mxu1 %vm195_vm0, %v7623_v46  ;;  %6368 = vmatmul.mubr.msk.f32.vlgmr.msra.gmra.mxu0 %vm195_vm0, %v7623_v46 }
0x15ab   :  { %6385 = vmatpush3.xpose.msk.msra.mxu0 %vm195_vm0, %v3552_v13  ;;  %6388 = vmatprep.mubr.msk.f32.mxu0 %vm195_vm0, %v7594_v43 }
0x15ac   :  { %6386 = vmatprep.subr.msk.mxu0 %vm195_vm0, %v3551_v34 }
0x15af   :  { %6387 = vmatpush3.xpose.msk.msra.mxu0 %vm195_vm0, %v3551_v34 }
0x15b2   :  { %6389 = vmatmul.mubr.msk.f32.vlgmr.msra.gmra.mxu0 %vm195_vm0, %v7623_v46 }
0x166a   :  { %v6362_v37 = vpop.f32.mrf.mxu1  ;;  %v6369_v48 = vpop.f32.mrf.mxu0 }
0x166b   :  { %v3255_v36 = vadd.f32 %v6362_v37, %v7121_v53  ;;  %v3362_v14 = vadd.f32 %v6369_v48, %v7121_v53 }
0x166c   :  { %v3356_v11 = vpop.f32.mrf.mxu0  ;;  %v3249_v44 = vpop.f32.mrf.mxu1 }
0x166d   :  { %v3357_v49 = vadd.f32 %v3356_v11, %v7123_v56  ;;  %v3261_v57 = vsel %vm559_vm13, %v3255_v36, -inf  ;;  %v3368_v59 = vsel %vm559_vm13, %v3362_v14, -inf  ;;  %v3250_v51 = vadd.f32 %v3249_v44, %v7123_v56 }
0x166e   :  { %3262 = vmax.xlane.f32.xlu0 %v3261_v57  ;;  %3369 = vmax.xlane.f32.xlu1 %v3368_v59 }
0x166f   :  { %v3365_v15 = vsel %vm559_vm13, %v3357_v49, -inf  ;;  %v3258_v60 = vsel %vm559_vm13, %v3250_v51, -inf }
0x1672   :  { %v6390_v30 = vpop.f32.mrf.mxu0  ;;  %3366 = vmax.xlane.f32.xlu0 %v3365_v15 }
0x1673   :  { %v3631_v20 = vadd.f32 %v6390_v30, %v7121_v53 }
0x1674   :  { %v3625_v0 = vpop.f32.mrf.mxu0 }
0x1675   :  { %v3626_v52 = vadd.f32 %v3625_v0, %v7123_v56  ;;  %v3637_v35 = vsel %vm559_vm13, %v3631_v20, -inf }
0x1676   :  { %3638 = vmax.xlane.f32.xlu1 %v3637_v35  ;;  %3259 = vmax.xlane.f32.xlu0 %v3258_v60 }
0x1677   :  { %v3634_v55 = vsel %vm559_vm13, %v3626_v52, -inf }
0x167a   :  { %3635 = vmax.xlane.f32.xlu0 %v3634_v55 }
0x16f7   :  { %v3370_v58 = vpop.xlane.xlu1 %3369  ;;  %v3263_v10 = vpop.xlane.xlu0 %3262 }
0x16f8   :  { %v3372_v6 = vsub.f32 %v3362_v14, %v3370_v58  ;;  %v3265_v42 = vsub.f32 %v3255_v36, %v3263_v10 }
0x16fa   :  { %v3375_v54 = vmul.f32 1.442695, %v3372_v6  ;;  %v3268_v28 = vmul.f32 1.442695, %v3265_v42 }
0x16fb   :  { %v3367_v17 = vpop.xlane.xlu0 %3366 }
0x16fc   :  { %6682 = vpow2.f32 %v3375_v54  ;;  %v3371_v29 = vsub.f32 %v3357_v49, %v3367_v17 }
0x16fd   :  { %6684 = vpow2.f32 %v3268_v28 }
0x16fe   :  { %v3373_v38 = vmul.f32 1.442695, %v3371_v29 }
0x16ff   :  { %v3639_v39 = vpop.xlane.xlu1 %3638  ;;  %v3260_v40 = vpop.xlane.xlu0 %3259 }
0x1700   :  { %6686 = vpow2.f32 %v3373_v38  ;;  %v3641_v45 = vsub.f32 %v3631_v20, %v3639_v39  ;;  %v3264_v13 = vsub.f32 %v3250_v51, %v3260_v40 }
0x1702   :  { %v3644_v34 = vmul.f32 1.442695, %v3641_v45  ;;  %v3266_v37 = vmul.f32 1.442695, %v3264_v13 }
0x1703   :  { %v3636_v48 = vpop.xlane.xlu0 %3635 }
0x1704   :  { %6688 = vpow2.f32 %v3644_v34  ;;  %v3640_v11 = vsub.f32 %v3626_v52, %v3636_v48 }
0x1705   :  { %6690 = vpow2.f32 %v3266_v37 }
0x1706   :  { %v3642_v14 = vmul.f32 1.442695, %v3640_v11 }
0x1708   :  { %6692 = vpow2.f32 %v3642_v14 }
0x1709   :  { %v6683_v36 = vpop.eup %6682 }
0x170a   :  { %v3380_v57 = vsel %vm559_vm13, %v6683_v36, 0.0  ;;  %v7656_v59 = vpop.eup %6684 }
0x170b   :  { %3381 = vadd.xlane.f32.xlu1 %v3380_v57  ;;  %v3273_v44 = vsel %vm559_vm13, %v7656_v59, 0.0 }
0x170d   :  { %v6687_v49 = vpop.eup %6686 }
0x170e   :  { %v3377_v51 = vsel %vm559_vm13, %v6687_v49, 0.0 }
0x170f   :  { %3274 = vadd.xlane.f32.xlu1 %v3273_v44  ;;  %3378 = vadd.xlane.f32.xlu0 %v3377_v51  ;;  %v3742_v51 = vmul.f32 %v7600_v63, %v7030_v16 }
0x1711   :  { %v7661_v15 = vpop.eup %6688 }
0x1712   :  { %v6691_v30 = vpop.eup %6690  ;;  %v3649_v20 = vsel %vm559_vm13, %v7661_v15, 0.0 }
0x1713   :  { %3650 = vadd.xlane.f32.xlu1 %v3649_v20  ;;  %v3270_v0 = vsel %vm559_vm13, %v6691_v30, 0.0 }
0x1714   :  { %3271 = vadd.xlane.f32.xlu0 %v3270_v0 }
0x1715   :  { %v6693_v52 = vpop.eup %6692 }
0x1716   :  { %v3646_v35 = vsel %vm559_vm13, %v6693_v52, 0.0 }
0x1718   :  { %3647 = vadd.xlane.f32.xlu0 %v3646_v35 }
0x172e   :  { %3085 = vrot.lane.b32.xlu0 %v7549_v1, %s6909_s28 }
0x1732   :  { %3935 = vrot.lane.b32.xlu0 %v7522_v12, %s6911_s8 }
0x1736   :  { %3933 = vrot.lane.b32.xlu0 %v7529_v25, %s6911_s8 }
0x173a   :  { %3931 = vrot.lane.b32.xlu0 %v7534_v24, %s6911_s8 }
0x1794   :  { %v3382_v60 = vpop.xlane.xlu1 %3381 }
0x1798   :  { %v3379_v55 = vpop.xlane.xlu0 %3378  ;;  %v3275_v58 = vpop.xlane.xlu1 %3274 }
0x1799   :  { %6694 = vrcp.f32 %v3379_v55 }
0x179a   :  { %6696 = vrcp.f32 %v3382_v60 }
0x179c   :  { %v3651_v42 = vpop.xlane.xlu1 %3650 }
0x179d   :  { %v3272_v10 = vpop.xlane.xlu0 %3271 }
0x179e   :  { %6698 = vrcp.f32 %v3272_v10 }
0x179f   :  { %6700 = vrcp.f32 %v3275_v58 }
0x17a1   :  { %v3648_v6 = vpop.xlane.xlu0 %3647 }
0x17a2   :  { %6702 = vrcp.f32 %v3648_v6 }
0x17a3   :  { %6704 = vrcp.f32 %v3651_v42 }
0x17a5   :  { %v3086_v54 = vpop.permute.xlu0 %3085 }
0x17a6   :  { %v3161_v12 = vadd.f32 %v7641_v4, %v3086_v54  ;;  %v3166_v25 = vadd.f32 %v7639_v3, %v3086_v54  ;;  %v6695_v28 = vpop.eup %6694 }
0x17a7   :  { %v3384_v17 = vmul.f32 %v6695_v28, %v6687_v49  ;;  %v6697_v38 = vpop.eup %6696 }
0x17a8   :  { %v3388_v24 = vmul.f32 %v3166_v25, %v7068_v32  ;;  %v3847_v29 = vmul.f32 %v3166_v25, %v7030_v16  ;;  %v3387_v39 = vmul.f32 %v3161_v12, %v7068_v32  ;;  %v3846_v45 = vmul.f32 %v3161_v12, %v7030_v16 }
0x17a9   :  { %6374 = vmatprep.mubr.msk.f32.mxu1 %vm559_vm13, %v3384_v17  ;;  %v3386_v3 = vmul.f32 %v6697_v38, %v6683_v36  ;;  %v3281_v13 = vmul.f32 %v3166_v25, %v7065_v31  ;;  %v3280_v48 = vmul.f32 %v3161_v12, %v7065_v31  ;;  %v3657_v36 = vmul.f32 %v3166_v25, %v7087_v41 }
0x17aa   :  { %6370 = vmatprep.subr.mxu1 %v3388_v24  ;;  %6405 = vmatprep.subr.mxu0 %v3847_v29  ;;  %v3656_v49 = vmul.f32 %v3161_v12, %v7087_v41 }
0x17ab   :  { %v6699_v40 = vpop.eup %6698  ;;  %6371 = vmatpush3.msra.mxu1 %v3388_v24  ;;  %6406 = vmatpush3.msra.mxu0 %v3847_v29 }
0x17ac   :  { %6372 = vmatprep.subr.mxu1 %v3387_v39  ;;  %v3277_v4 = vmul.f32 %v6699_v40, %v6691_v30  ;;  %6407 = vmatprep.subr.mxu0 %v3846_v45  ;;  %v6701_v34 = vpop.eup %6700 }
0x17ad   :  { %6373 = vmatpush3.msra.mxu1 %v3387_v39  ;;  %6408 = vmatpush3.msra.mxu0 %v3846_v45  ;;  %v3279_v14 = vmul.f32 %v6701_v34, %v7656_v59  ;;  %v3741_v59 = vmul.f32 %v7602_v50, %v7030_v16 }
0x17ae   :  { %6375 = vmatmul.mubr.msk.f32.vlgmr.msra.gmra.mxu1 %vm559_vm13, %v3386_v3  ;;  %6377 = vmatprep.subr.mxu1 %v3281_v13 }
0x17af   :  { %v6703_v37 = vpop.eup %6702  ;;  %6381 = vmatprep.mubr.msk.f32.mxu1 %vm559_vm13, %v3277_v4  ;;  %6378 = vmatpush3.msra.mxu1 %v3281_v13 }
0x17b0   :  { %v3653_v11 = vmul.f32 %v6703_v37, %v6693_v52  ;;  %6379 = vmatprep.subr.mxu1 %v3280_v48  ;;  %v6705_v57 = vpop.eup %6704  ;;  %v3936_v37 = vpop.permute.xlu0 %3935 }
0x17b1   :  { %6380 = vmatpush3.msra.mxu1 %v3280_v48  ;;  %v3655_v44 = vmul.f32 %v6705_v57, %v7661_v15 }
0x17b2   :  { %6382 = vmatmul.mubr.msk.f32.vlgmr.msra.gmra.mxu1 %vm559_vm13, %v3279_v14  ;;  %6391 = vmatprep.subr.mxu1 %v3657_v36 }
0x17b3   :  { %6392 = vmatpush3.msra.mxu1 %v3657_v36  ;;  %6395 = vmatprep.mubr.msk.f32.mxu1 %vm559_vm13, %v3653_v11 }
0x17b4   :  { %6393 = vmatprep.subr.mxu1 %v3656_v49 }
0x17b5   :  { %6394 = vmatpush3.msra.mxu1 %v3656_v49 }
0x17b6   :  { %6396 = vmatmul.mubr.msk.f32.vlgmr.msra.gmra.mxu1 %vm559_vm13, %v3655_v44  ;;  %6398 = vmatprep.subr.msk.mxu1 %vm195_vm0, %v3742_v51 }
0x17b7   :  { %6399 = vmatpush3.xpose.msk.msra.mxu1 %vm195_vm0, %v3742_v51  ;;  %6402 = vmatprep.mubr.msk.f32.mxu1 %vm195_vm0, %v7594_v43 }
0x17b8   :  { %6400 = vmatprep.subr.msk.mxu1 %vm195_vm0, %v3741_v59 }
0x17bb   :  { %6401 = vmatpush3.xpose.msk.msra.mxu1 %vm195_vm0, %v3741_v59 }
0x17be   :  { %6403 = vmatmul.mubr.msk.f32.vlgmr.msra.gmra.mxu1 %vm195_vm0, %v7623_v46 }
0x186e   :  { %v6376_v63 = vpop.f32.mrf.mxu1 }
0x1870   :  { %v3461_v15 = vpop.f32.mrf.mxu1 }
0x1872   :  { %v6383_v30 = vpop.f32.mrf.mxu1 }
0x1873   :  { %v3548_v20 = vadd.f32 %v6383_v30, %v6376_v63 }
0x1874   :  { %v3542_v0 = vpop.f32.mrf.mxu1 }
0x1875   :  { %v3543_v52 = vadd.f32 %v3542_v0, %v3461_v15 }
0x1876   :  { %v6397_v35 = vpop.f32.mrf.mxu1 }
0x1877   :  { %v3740_v50 = vadd.f32 %v6397_v35, %v3548_v20  ;;  %v7725_v35 = vld [vmem:[#allocation8 + $0x68] sm:$0xff] }
0x1878   :  { %v3730_v60 = vpop.f32.mrf.mxu1 }
0x1879   :  { %v3739_v55 = vadd.f32 %v3730_v60, %v3543_v52 }
0x187e   :  { %v6404_v58 = vpop.f32.mrf.mxu1 }
0x187f   :  { %v3821_v6 = vadd.f32 %v6404_v58, %v7121_v53 }
0x1880   :  { %v3815_v10 = vpop.f32.mrf.mxu1 }
0x1881   :  { %v3816_v43 = vadd.f32 %v3815_v10, %v7123_v56  ;;  %v3827_v46 = vsel %vm559_vm13, %v3821_v6, -inf }
0x1883   :  { %v3824_v42 = vsel %vm559_vm13, %v3816_v43, -inf }
0x1884   :  { %3825 = vmax.xlane.f32.xlu1 %v3824_v42 }
0x1888   :  { %3828 = vmax.xlane.f32.xlu1 %v3827_v46 }
0x190d   :  { %v3826_v54 = vpop.xlane.xlu1 %3825 }
0x190e   :  { %v3830_v12 = vsub.f32 %v3816_v43, %v3826_v54 }
0x1910   :  { %v3832_v25 = vmul.f32 1.442695, %v3830_v12 }
0x1911   :  { %v3829_v28 = vpop.xlane.xlu1 %3828 }
0x1912   :  { %6706 = vpow2.f32 %v3832_v25  ;;  %v3831_v24 = vsub.f32 %v3821_v6, %v3829_v28  ;;  %v7756_v25 = vrot.slane %v7544_v23, %v1360_v62 }
0x1914   :  { %v3834_v17 = vmul.f32 1.442695, %v3831_v24 }
0x1916   :  { %6708 = vpow2.f32 %v3834_v17  ;;  %v7767_v17 = vrot.slane %v7544_v23, %v1374_v8 }
0x191f   :  { %v6707_v29 = vpop.eup %6706 }
0x1920   :  { %v3836_v38 = vsel %vm559_vm13, %v6707_v29, 0.0 }
0x1921   :  { %3837 = vadd.xlane.f32.xlu1 %v3836_v38 }
0x1923   :  { %v6709_v39 = vpop.eup %6708 }
0x1924   :  { %v3839_v40 = vsel %vm559_vm13, %v6709_v39, 0.0 }
0x1925   :  { %3840 = vadd.xlane.f32.xlu1 %v3839_v40 }
0x1936   :  { %3937 = vrot.lane.b32.xlu1 %v7517_v61, %s6911_s8  ;;  %v3934_v61 = vpop.permute.xlu0 %3933 }
0x193a   :  { %3943 = vrot.lane.b32.xlu1 %v7549_v1, %s6911_s8  ;;  %v3932_v1 = vpop.permute.xlu0 %3931 }
0x19aa   :  { %v3838_v45 = vpop.xlane.xlu1 %3837 }
0x19ab   :  { %6710 = vrcp.f32 %v3838_v45 }
0x19ae   :  { %v3841_v3 = vpop.xlane.xlu1 %3840 }
0x19af   :  { %6712 = vrcp.f32 %v3841_v3 }
0x19b2   :  { %v3938_v4 = vpop.permute.xlu1 %3937 }
0x19b3   :  { %6412 = vmatprep.subr.mxu0 %v3938_v4 }
0x19b6   :  { %v3944_v44 = vpop.permute.xlu1 %3943 }
0x19b8   :  { %v6711_v13 = vpop.eup %6710 }
0x19b9   :  { %v3843_v34 = vmul.f32 %v6711_v13, %v6707_v29 }
0x19bb   :  { %6409 = vmatprep.mubr.msk.f32.mxu0 %vm559_vm13, %v3843_v34 }
0x19bc   :  { %v6713_v48 = vpop.eup %6712 }
0x19bd   :  { %v3845_v11 = vmul.f32 %v6713_v48, %v6709_v39 }
0x19bf   :  { %6410 = vmatmul.mubr.msk.f32.vlgmr.msra.gmra.mxu0 %vm559_vm13, %v3845_v11 }
0x19c0   :  { %6413 = vmatpush3.msra.mxu0 %v3938_v4 }
0x19c1   :  { %6414 = vmatprep.subr.mxu0 %v3936_v37 }
0x19c2   :  { %6415 = vmatpush3.msra.mxu0 %v3936_v37 }
0x19c3   :  { %6416 = vmatprep.subr.mxu0 %v3934_v61 }
0x19c4   :  { %6417 = vmatpush3.msra.mxu0 %v3934_v61 }
0x19c5   :  { %6418 = vmatprep.subr.mxu0 %v3932_v1 }
0x19c6   :  { %6419 = vmatpush3.msra.mxu0 %v3932_v1 }
0x1a7f   :  { %v6411_v14 = vpop.f32.mrf.mxu0 }
0x1a80   :  { %v3930_v49 = vadd.f32 %v6411_v14, %v3740_v50  ;;  %v7727_v50 = vld [vmem:[#allocation8 + $0x78] sm:$0xff]  ;;  %v6765_v14 = vld [vmem:[%s8055_s1] sm:$0xff] }
0x1a81   :  { %v3920_v36 = vpop.f32.mrf.mxu0  ;;  %6423 = vmatprep.subr.mxu1 %v7727_v50 }
0x1a82   :  { %v3929_v57 = vadd.f32 %v3920_v36, %v3739_v55  ;;  %6424 = vmatpush3.msra.mxu1 %v7727_v50 }
0x1a83   :  { %6425 = vmatprep.subr.mxu1 %v7725_v35 }
0x1a84   :  { %6420 = vmatprep.mubr.msk.f32.mxu0 %vm195_vm0, %v3929_v57  ;;  %6426 = vmatpush3.msra.mxu1 %v7725_v35 }
0x1a85   :  { %6421 = vmatmul.mubr.msk.f32.vlgmr.msra.gmra.mxu0 %vm195_vm0, %v3930_v49  ;;  %v6767_v49 = vld [vmem:[%s8055_s1 + $0x10] sm:$0xff] }
0x1a86   :  { %6442 = vmatprep.mubr.msk.f32.mxu0 %vm195_vm0, %v7230_v5  ;;  %v7735_v5 = vld [vmem:[#allocation8 + $0x58] sm:$0xff] }
0x1a87   :  { %6427 = vmatprep.subr.mxu1 %v7735_v5 }
0x1a88   :  { %6428 = vmatpush3.msra.mxu1 %v7735_v5 }
0x1b45   :  { %v6422_v51 = vpop.f32.mrf.mxu0 }
0x1b46   :  { %v4024_v59 = vadd.f32 %v6422_v51, %v3944_v44 }
0x1b47   :  { %v4018_v63 = vpop.f32.mrf.mxu0 }
0x1b48   :  { %v4028_v15 = vadd.f32 %v4024_v59, %v7581_v19  ;;  %v4019_v30 = vadd.f32 %v4018_v63, %v3944_v44  ;;  %v6768_v44 = vld [vmem:[%s8055_s1 + $0x18] sm:$0xff] }
0x1b4a   :  { %v4027_v20 = vadd.f32 %v4019_v30, %v7572_v18  ;;  %v4032_v0 = vsel %vm195_vm0, %v4028_v15, 0.0  ;;  %v7740_v18 = vld [vmem:[#allocation8 + $0x48] sm:$0xff] }
0x1b4b   :  { %4033 = vadd.xlane.f32.xlu1 %v4032_v0  ;;  %6429 = vmatprep.subr.mxu1 %v7740_v18 }
0x1b4c   :  { %v4029_v52 = vsel %vm195_vm0, %v4027_v20, 0.0  ;;  %6430 = vmatpush3.msra.mxu1 %v7740_v18 }
0x1b4d   :  { %4030 = vadd.xlane.f32.xlu0 %v4029_v52 }
0x1b5c   :  { %4164 = vrot.lane.b32.xlu1 %v7725_v35, %s6907_s3 }
0x1b60   :  { %4162 = vrot.lane.b32.xlu1 %v7735_v5, %s6907_s3 }
0x1b64   :  { %4160 = vrot.lane.b32.xlu1 %v7740_v18, %s6907_s3 }
0x1b68   :  { %4267 = vrot.lane.b32.xlu1 %v7727_v50, %s6909_s28 }
0x1b6c   :  { %4173 = vrot.lane.b32.xlu1 %v7767_v17, %s6907_s3 }
0x1b70   :  { %4261 = vrot.lane.b32.xlu1 %v7740_v18, %s6909_s28 }
0x1bd4   :  { %v4034_v19 = vpop.xlane.xlu1 %4033 }
0x1bd5   :  { %v4036_v60 = vmul.f32 0.03125, %v4034_v19 }
0x1bd6   :  { %v4031_v55 = vpop.xlane.xlu0 %4030 }
0x1bd7   :  { %v4038_v58 = vsub.f32 %v4028_v15, %v4036_v60  ;;  %v4035_v10 = vmul.f32 0.03125, %v4031_v55 }
0x1bd8   :  { %v4165_v12 = vpop.permute.xlu1 %4164 }
0x1bd9   :  { %v4037_v43 = vsub.f32 %v4027_v20, %v4035_v10  ;;  %v4040_v6 = vmul.f32 %v4038_v58, %v4038_v58 }
0x1bdb   :  { %v4044_v42 = vsel %vm195_vm0, %v4040_v6, 0.0  ;;  %v4039_v46 = vmul.f32 %v4037_v43, %v4037_v43 }
0x1bdc   :  { %4045 = vadd.xlane.f32.xlu0 %v4044_v42  ;;  %v4163_v28 = vpop.permute.xlu1 %4162 }
0x1bdd   :  { %v4041_v54 = vsel %vm195_vm0, %v4039_v46, 0.0 }
0x1be0   :  { %4042 = vadd.xlane.f32.xlu0 %v4041_v54  ;;  %v4161_v24 = vpop.permute.xlu1 %4160 }
0x1be4   :  { %v4268_v29 = vpop.permute.xlu1 %4267 }
0x1be5   :  { %6448 = vmatprep.subr.mxu1 %v4268_v29 }
0x1be8   :  { %v4174_v36 = vpop.permute.xlu1 %4173 }
0x1bf6   :  { %4166 = vrot.lane.b32.xlu0 %v7727_v50, %s6907_s3 }
0x1bfa   :  { %4062 = vrot.lane.b32.xlu0 %v7756_v25, %s6907_s3 }
0x1bfe   :  { %4265 = vrot.lane.b32.xlu0 %v7725_v35, %s6909_s28 }
0x1c02   :  { %4263 = vrot.lane.b32.xlu0 %v7735_v5, %s6909_s28 }
0x1c65   :  { %v4046_v62 = vpop.xlane.xlu0 %4045 }
0x1c66   :  { %v4048_v38 = vmul.f32 0.03125, %v4046_v62 }
0x1c68   :  { %v4050_v39 = vadd.f32 1e-05, %v4048_v38 }
0x1c69   :  { %v4043_v40 = vpop.xlane.xlu0 %4042 }
0x1c6a   :  { %6714 = vrsqrt.f32 %v4050_v39  ;;  %v4047_v45 = vmul.f32 0.03125, %v4043_v40 }
0x1c6c   :  { %v4049_v3 = vadd.f32 1e-05, %v4047_v45 }
0x1c6d   :  { %v4167_v4 = vpop.permute.xlu0 %4166 }
0x1c6e   :  { %6716 = vrsqrt.f32 %v4049_v3  ;;  %6434 = vmatprep.subr.mxu0 %v4167_v4 }
0x1c6f   :  { %6435 = vmatpush3.msra.mxu0 %v4167_v4 }
0x1c70   :  { %6436 = vmatprep.subr.mxu0 %v4165_v12 }
0x1c71   :  { %6437 = vmatpush3.msra.mxu0 %v4165_v12  ;;  %v4063_v48 = vpop.permute.xlu0 %4062 }
0x1c72   :  { %6438 = vmatprep.subr.mxu0 %v4163_v28 }
0x1c73   :  { %6439 = vmatpush3.msra.mxu0 %v4163_v28 }
0x1c74   :  { %6440 = vmatprep.subr.mxu0 %v4161_v24 }
0x1c75   :  { %6441 = vmatpush3.msra.mxu0 %v4161_v24 }
0x1c76   :  { %6443 = vmatmul.mubr.msk.f32.vlgmr.msra.gmra.mxu0 %vm195_vm0, %v7260_v26 }
0x1c77   :  { %v6715_v8 = vpop.eup %6714  ;;  %6445 = vmatprep.mubr.msk.f32.mxu0 %vm195_vm0, %v7262_v27 }
0x1c78   :  { %v4054_v23 = vmul.f32 %v6715_v8, %v4038_v58 }
0x1c7a   :  { %6446 = vmatmul.mubr.msk.f32.gmra.mxu0 %vm195_vm0, %v7269_v2  ;;  %v4060_v34 = vmul.f32 %v7756_v25, %v4054_v23  ;;  %v4266_v2 = vpop.permute.xlu0 %4265 }
0x1c7b   :  { %v6717_v13 = vpop.eup %6716 }
0x1c7c   :  { %v4053_v37 = vmul.f32 %v6717_v13, %v4037_v43  ;;  %v7781_v61 = vadd.f32 %v4063_v48, %v4060_v34 }
0x1c7e   :  { %v4059_v11 = vmul.f32 %v7756_v25, %v4053_v37  ;;  %v4068_v27 = vadd.f32 %v7584_v21, %v7781_v61  ;;  %v4264_v57 = vpop.permute.xlu0 %4263  ;;  %v6766_v21 = vld [vmem:[%s8055_s1 + $0x8] sm:$0xff] }
0x1c80   :  { %v7783_v1 = vadd.f32 %v4063_v48, %v4059_v11 }
0x1c82   :  { %v4067_v26 = vadd.f32 %v7575_v22, %v7783_v1  ;;  %v4262_v22 = vpop.permute.xlu1 %4261 }
0x1c84   :  { %6431 = vmatprep.mubr.msk.f32.mxu1 %vm195_vm0, %v4067_v26 }
0x1c85   :  { %6432 = vmatmul.mubr.msk.f32.vlgmr.msra.gmra.mxu1 %vm195_vm0, %v4068_v27 }
0x1c86   :  { %6449 = vmatpush3.msra.mxu1 %v4268_v29  ;;  %6456 = vmatprep.mubr.msk.f32.mxu1 %vm195_vm0, %v6765_v14 }
0x1c87   :  { %6450 = vmatprep.subr.mxu1 %v4266_v2 }
0x1c88   :  { %6451 = vmatpush3.msra.mxu1 %v4266_v2 }
0x1c89   :  { %6452 = vmatprep.subr.mxu1 %v4264_v57 }
0x1c8a   :  { %6453 = vmatpush3.msra.mxu1 %v4264_v57 }
0x1c8b   :  { %6454 = vmatprep.subr.mxu1 %v4262_v22 }
0x1c8c   :  { %6455 = vmatpush3.msra.mxu1 %v4262_v22 }
0x1c8d   :  { %6457 = vmatmul.mubr.msk.f32.vlgmr.msra.gmra.mxu1 %vm195_vm0, %v6766_v21 }
0x1c8e   :  { %6459 = vmatprep.mubr.msk.f32.mxu1 %vm195_vm0, %v6767_v49 }
0x1c91   :  { %6460 = vmatmul.mubr.msk.f32.gmra.mxu1 %vm195_vm0, %v6768_v44 }
0x1d36   :  { %v6444_v51 = vpop.f32.mrf.mxu0 }
0x1d37   :  { %v7815_v19 = vadd.f32 %v6444_v51, %v4174_v36 }
0x1d38   :  { %v4242_v59 = vpop.f32.mrf.mxu0 }
0x1d39   :  { %v7827_v58 = vadd.f32 %v4242_v59, %v4174_v36  ;;  %v4362_v10 = vmul.f32 %v7815_v19, %v7065_v31  ;;  %v4485_v43 = vmul.f32 %v7815_v19, %v7068_v32 }
0x1d3a   :  { %v6447_v63 = vpop.f32.mrf.mxu0 }
0x1d3b   :  { %v7807_v15 = vadd.f32 %v6447_v63, %v4174_v36  ;;  %v4361_v46 = vmul.f32 %v7827_v58, %v7065_v31  ;;  %v4484_v54 = vmul.f32 %v7827_v58, %v7068_v32 }
0x1d3c   :  { %v4252_v30 = vpop.f32.mrf.mxu0 }
0x1d3d   :  { %v7809_v20 = vadd.f32 %v4252_v30, %v4174_v36  ;;  %v4364_v0 = vmul.f32 %v7807_v15, %v7065_v31  ;;  %v4487_v52 = vmul.f32 %v7807_v15, %v7068_v32 }
0x1d3f   :  { %6462 = vmatprep.subr.msk.mxu0 %vm195_vm0, %v4364_v0  ;;  %6473 = vmatprep.subr.msk.mxu1 %vm195_vm0, %v4487_v52  ;;  %v4363_v60 = vmul.f32 %v7809_v20, %v7065_v31  ;;  %v4486_v55 = vmul.f32 %v7809_v20, %v7068_v32 }
0x1d40   :  { %6463 = vmatpush3.xpose.msk.msra.mxu0 %vm195_vm0, %v4364_v0  ;;  %6474 = vmatpush3.xpose.msk.msra.mxu1 %vm195_vm0, %v4487_v52 }
0x1d41   :  { %6464 = vmatprep.subr.msk.mxu0 %vm195_vm0, %v4363_v60  ;;  %6475 = vmatprep.subr.msk.mxu1 %vm195_vm0, %v4486_v55 }
0x1d44   :  { %6465 = vmatpush3.xpose.msk.msra.mxu0 %vm195_vm0, %v4363_v60  ;;  %6476 = vmatpush3.xpose.msk.msra.mxu1 %vm195_vm0, %v4486_v55 }
0x1d45   :  { %v6433_v6 = vpop.f32.mrf.mxu1  ;;  %6466 = vmatprep.subr.msk.mxu0 %vm195_vm0, %v4362_v10  ;;  %6477 = vmatprep.subr.msk.mxu1 %vm195_vm0, %v4485_v43 }
0x1d46   :  { %v4151_v28 = vadd.f32 %v6433_v6, %v7767_v17 }
0x1d47   :  { %v4145_v42 = vpop.f32.mrf.mxu1 }
0x1d48   :  { %v4146_v12 = vadd.f32 %v4145_v42, %v7767_v17  ;;  %6467 = vmatpush3.xpose.msk.msra.mxu0 %vm195_vm0, %v4362_v10  ;;  %6478 = vmatpush3.xpose.msk.msra.mxu1 %vm195_vm0, %v4485_v43  ;;  %v7852_v29 = vmul.f32 0.35355338, %v4151_v28 }
0x1d49   :  { %6468 = vmatprep.subr.msk.mxu0 %vm195_vm0, %v4361_v46  ;;  %6479 = vmatprep.subr.msk.mxu1 %vm195_vm0, %v4484_v54 }
0x1d4a   :  { %v7847_v24 = vmul.f32 0.35355338, %v4146_v12 }
0x1d4c   :  { %6469 = vmatpush3.xpose.msk.msra.mxu0 %vm195_vm0, %v4361_v46  ;;  %6470 = vmatprep.mubr.msk.f32.mxu0 %vm195_vm0, %v7847_v24 }
0x1d4d   :  { %6480 = vmatpush3.xpose.msk.msra.mxu1 %vm195_vm0, %v4484_v54  ;;  %6481 = vmatprep.mubr.msk.f32.mxu1 %vm195_vm0, %v7847_v24  ;;  %v6458_v62 = vpop.f32.mrf.mxu1 }
0x1d4f   :  { %6471 = vmatmul.mubr.msk.f32.vlgmr.msra.gmra.mxu0 %vm195_vm0, %v7852_v29  ;;  %v4342_v38 = vpop.f32.mrf.mxu1 }
0x1d50   :  { %6482 = vmatmul.mubr.msk.f32.vlgmr.msra.gmra.mxu1 %vm195_vm0, %v7852_v29 }
0x1d51   :  { %v6461_v39 = vpop.f32.mrf.mxu1 }
0x1d53   :  { %v4352_v40 = vpop.f32.mrf.mxu1 }
0x1e0f   :  { %v6472_v45 = vpop.f32.mrf.mxu0 }
0x1e10   :  { %v6483_v3 = vpop.f32.mrf.mxu1  ;;  %v7869_v11 = vadd.f32 %v6472_v45, %v7121_v53  ;;  %v4766_v45 = vmul.f32 %v7807_v15, %v7087_v41 }
0x1e11   :  { %v4572_v4 = vadd.f32 %v6483_v3, %v7121_v53  ;;  %v4449_v8 = vpop.f32.mrf.mxu0 }
0x1e12   :  { %v4566_v23 = vpop.f32.mrf.mxu1  ;;  %v7863_v13 = vadd.f32 %v4449_v8, %v7123_v56  ;;  %v4461_v27 = vsel %vm195_vm0, %v7869_v11, -inf  ;;  %v4763_v8 = vmul.f32 %v7827_v58, %v7087_v41 }
0x1e13   :  { %v4567_v34 = vadd.f32 %v4566_v23, %v7123_v56  ;;  %v4578_v37 = vsel %vm195_vm0, %v4572_v4, -inf }
0x1e14   :  { %4579 = vmax.xlane.f32.xlu1 %v4578_v37  ;;  %v4458_v26 = vsel %vm195_vm0, %v7863_v13, -inf }
0x1e15   :  { %v4575_v48 = vsel %vm195_vm0, %v4567_v34, -inf }
0x1e16   :  { %4576 = vmax.xlane.f32.xlu0 %v4575_v48 }
0x1e18   :  { %4459 = vmax.xlane.f32.xlu1 %v4458_v26 }
0x1e1c   :  { %4462 = vmax.xlane.f32.xlu1 %v4461_v27 }
0x1e9d   :  { %v4580_v2 = vpop.xlane.xlu1 %4579 }
0x1e9e   :  { %v4582_v14 = vsub.f32 %v4572_v4, %v4580_v2 }
0x1e9f   :  { %v4577_v36 = vpop.xlane.xlu0 %4576 }
0x1ea0   :  { %v4585_v57 = vmul.f32 1.442695, %v4582_v14  ;;  %v4581_v22 = vsub.f32 %v4567_v34, %v4577_v36 }
0x1ea1   :  { %v4460_v26 = vpop.xlane.xlu1 %4459 }
0x1ea2   :  { %6718 = vpow2.f32 %v4585_v57  ;;  %v4583_v21 = vmul.f32 1.442695, %v4581_v22  ;;  %v4464_v27 = vsub.f32 %v7863_v13, %v4460_v26 }
0x1ea4   :  { %6720 = vpow2.f32 %v4583_v21  ;;  %v4466_v14 = vmul.f32 1.442695, %v4464_v27  ;;  %v4963_v27 = vmul.f32 %v7827_v58, %v7030_v16 }
0x1ea5   :  { %v4463_v2 = vpop.xlane.xlu1 %4462 }
0x1ea6   :  { %v4465_v36 = vsub.f32 %v7869_v11, %v4463_v2 }
0x1ea8   :  { %v4468_v22 = vmul.f32 1.442695, %v4465_v36 }
0x1eaf   :  { %v6719_v49 = vpop.eup %6718 }
0x1eb0   :  { %v4590_v44 = vsel %vm195_vm0, %v6719_v49, 0.0 }
0x1eb1   :  { %v6721_v51 = vpop.eup %6720  ;;  %4591 = vadd.xlane.f32.xlu0 %v4590_v44 }
0x1eb2   :  { %v4587_v59 = vsel %vm195_vm0, %v6721_v51, 0.0 }
0x1eb5   :  { %4588 = vadd.xlane.f32.xlu0 %v4587_v59 }
0x1ecb   :  { %4273 = vrot.lane.b32.xlu0 %v7767_v17, %s6909_s28 }
0x1f3a   :  { %v4592_v63 = vpop.xlane.xlu0 %4591 }
0x1f3b   :  { %6722 = vrcp.f32 %v4592_v63 }
0x1f3e   :  { %v4589_v30 = vpop.xlane.xlu0 %4588 }
0x1f3f   :  { %6724 = vrcp.f32 %v4589_v30 }
0x1f40   :  { %6726 = vpow2.f32 %v4466_v14 }
0x1f41   :  { %6728 = vpow2.f32 %v4468_v22 }
0x1f42   :  { %v4274_v0 = vpop.permute.xlu0 %4273 }
0x1f43   :  { %v7879_v52 = vadd.f32 %v4352_v40, %v4274_v0  ;;  %v4358_v60 = vadd.f32 %v6461_v39, %v4274_v0  ;;  %v7881_v55 = vadd.f32 %v6458_v62, %v4274_v0  ;;  %v7885_v6 = vadd.f32 %v4342_v38, %v4274_v0 }
0x1f45   :  { %v4600_v10 = vmul.f32 %v4358_v60, %v7068_v32  ;;  %v4483_v43 = vmul.f32 %v4358_v60, %v7065_v31  ;;  %v4599_v42 = vmul.f32 %v7879_v52, %v7068_v32  ;;  %v4482_v46 = vmul.f32 %v7879_v52, %v7065_v31 }
0x1f46   :  { %v4598_v54 = vmul.f32 %v7881_v55, %v7068_v32  ;;  %v4481_v12 = vmul.f32 %v7881_v55, %v7065_v31  ;;  %v4597_v62 = vmul.f32 %v7885_v6, %v7068_v32  ;;  %v4480_v38 = vmul.f32 %v7885_v6, %v7065_v31 }
0x1f47   :  { %6484 = vmatprep.subr.mxu0 %v4600_v10  ;;  %6495 = vmatprep.subr.mxu1 %v4483_v43  ;;  %v7902_v3 = vmul.f32 %v4358_v60, %v7087_v41  ;;  %v4765_v31 = vmul.f32 %v7809_v20, %v7087_v41  ;;  %v4764_v32 = vmul.f32 %v7815_v19, %v7087_v41 }
0x1f48   :  { %6485 = vmatpush3.msra.mxu0 %v4600_v10  ;;  %6496 = vmatpush3.msra.mxu1 %v4483_v43  ;;  %v6723_v28 = vpop.eup %6722  ;;  %v5079_v23 = vmul.f32 %v4358_v60, %v7030_v16  ;;  %v5078_v34 = vmul.f32 %v7879_v52, %v7030_v16  ;;  %v5077_v37 = vmul.f32 %v7881_v55, %v7030_v16 }
0x1f49   :  { %6486 = vmatprep.subr.mxu0 %v4599_v42  ;;  %6497 = vmatprep.subr.mxu1 %v4482_v46  ;;  %v4596_v4 = vmul.f32 %v6723_v28, %v6719_v49  ;;  %v5076_v48 = vmul.f32 %v7885_v6, %v7030_v16 }
0x1f4a   :  { %6487 = vmatpush3.msra.mxu0 %v4599_v42  ;;  %6498 = vmatpush3.msra.mxu1 %v4482_v46 }
0x1f4b   :  { %6488 = vmatprep.subr.mxu0 %v4598_v54  ;;  %6499 = vmatprep.subr.mxu1 %v4481_v12 }
0x1f4c   :  { %v6725_v39 = vpop.eup %6724  ;;  %6489 = vmatpush3.msra.mxu0 %v4598_v54  ;;  %6500 = vmatpush3.msra.mxu1 %v4481_v12 }
0x1f4d   :  { %6490 = vmatprep.subr.mxu0 %v4597_v62  ;;  %6501 = vmatprep.subr.mxu1 %v4480_v38  ;;  %v4594_v40 = vmul.f32 %v6725_v39, %v6721_v51  ;;  %v6727_v30 = vpop.eup %6726 }
0x1f4e   :  { %6491 = vmatpush3.msra.mxu0 %v4597_v62  ;;  %6502 = vmatpush3.msra.mxu1 %v4480_v38  ;;  %v4470_v11 = vsel %vm195_vm0, %v6727_v30, 0.0  ;;  %v6729_v0 = vpop.eup %6728 }
0x1f4f   :  { %6492 = vmatprep.mubr.msk.f32.mxu0 %vm195_vm0, %v4594_v40  ;;  %6506 = vmatprep.subr.msk.mxu0 %vm195_vm0, %v4766_v45  ;;  %v4473_v60 = vsel %vm195_vm0, %v6729_v0, 0.0 }
0x1f50   :  { %6517 = vmatprep.subr.mxu1 %v7902_v3  ;;  %6493 = vmatmul.mubr.msk.f32.vlgmr.msra.gmra.mxu0 %vm195_vm0, %v4596_v4 }
0x1f51   :  { %6507 = vmatpush3.xpose.msk.msra.mxu0 %vm195_vm0, %v4766_v45  ;;  %6514 = vmatprep.mubr.msk.f32.mxu0 %vm195_vm0, %v7847_v24 }
0x1f52   :  { %6508 = vmatprep.subr.msk.mxu0 %vm195_vm0, %v4765_v31 }
0x1f55   :  { %6509 = vmatpush3.xpose.msk.msra.mxu0 %vm195_vm0, %v4765_v31 }
0x1f56   :  { %6510 = vmatprep.subr.msk.mxu0 %vm195_vm0, %v4764_v32 }
0x1f59   :  { %6511 = vmatpush3.xpose.msk.msra.mxu0 %vm195_vm0, %v4764_v32 }
0x1f5a   :  { %6512 = vmatprep.subr.msk.mxu0 %vm195_vm0, %v4763_v8 }
0x1f5d   :  { %6513 = vmatpush3.xpose.msk.msra.mxu0 %vm195_vm0, %v4763_v8 }
0x1f5e   :  { %6539 = vmatprep.subr.mxu0 %v5079_v23 }
0x1f60   :  { %6515 = vmatmul.mubr.msk.f32.vlgmr.msra.gmra.mxu0 %vm195_vm0, %v7852_v29 }
0x1f61   :  { %6540 = vmatpush3.msra.mxu0 %v5079_v23  ;;  %v4878_v23 = vmul.f32 %v7879_v52, %v7087_v41 }
0x1f62   :  { %6541 = vmatprep.subr.mxu0 %v5078_v34 }
0x1f63   :  { %6542 = vmatpush3.msra.mxu0 %v5078_v34  ;;  %v4877_v34 = vmul.f32 %v7881_v55, %v7087_v41 }
0x1f64   :  { %6543 = vmatprep.subr.mxu0 %v5077_v37 }
0x1f65   :  { %6544 = vmatpush3.msra.mxu0 %v5077_v37  ;;  %v4876_v37 = vmul.f32 %v7885_v6, %v7087_v41 }
0x1f66   :  { %6545 = vmatprep.subr.mxu0 %v5076_v48 }
0x1f67   :  { %6546 = vmatpush3.msra.mxu0 %v5076_v48  ;;  %v4966_v48 = vmul.f32 %v7807_v15, %v7030_v16  ;;  %v4965_v15 = vmul.f32 %v7809_v20, %v7030_v16 }
0x2010   :  { %v7934_v57 = vpop.f32.mrf.mxu0 }
0x2012   :  { %v7936_v21 = vpop.f32.mrf.mxu0 }
0x2020   :  { %v6516_v49 = vpop.f32.mrf.mxu0 }
0x2021   :  { %v4851_v59 = vadd.f32 %v6516_v49, %v7121_v53 }
0x2022   :  { %v4845_v44 = vpop.f32.mrf.mxu0 }
0x2023   :  { %v4846_v51 = vadd.f32 %v4845_v44, %v7123_v56  ;;  %v4857_v13 = vsel %vm195_vm0, %v4851_v59, -inf }
0x2025   :  { %v4854_v63 = vsel %vm195_vm0, %v4846_v51, -inf }
0x2026   :  { %4855 = vmax.xlane.f32.xlu1 %v4854_v63 }
0x202a   :  { %4858 = vmax.xlane.f32.xlu1 %v4857_v13 }
0x202e   :  { %4471 = vadd.xlane.f32.xlu1 %v4470_v11 }
0x2032   :  { %4474 = vadd.xlane.f32.xlu1 %v4473_v60 }
0x20af   :  { %v4856_v10 = vpop.xlane.xlu1 %4855 }
0x20b0   :  { %v4860_v43 = vsub.f32 %v4846_v51, %v4856_v10 }
0x20b2   :  { %v4862_v42 = vmul.f32 1.442695, %v4860_v43 }
0x20b3   :  { %v4859_v46 = vpop.xlane.xlu1 %4858 }
0x20b4   :  { %6730 = vpow2.f32 %v4862_v42  ;;  %v4861_v54 = vsub.f32 %v4851_v59, %v4859_v46 }
0x20b6   :  { %v4864_v12 = vmul.f32 1.442695, %v4861_v54 }
0x20b7   :  { %v4472_v28 = vpop.xlane.xlu1 %4471 }
0x20b8   :  { %6732 = vpow2.f32 %v4864_v12 }
0x20b9   :  { %6734 = vrcp.f32 %v4472_v28 }
0x20bb   :  { %v4475_v62 = vpop.xlane.xlu1 %4474 }
0x20bc   :  { %6736 = vrcp.f32 %v4475_v62 }
0x20c1   :  { %v6731_v38 = vpop.eup %6730 }
0x20c2   :  { %v4866_v39 = vsel %vm195_vm0, %v6731_v38, 0.0 }
0x20c3   :  { %4867 = vadd.xlane.f32.xlu0 %v4866_v39 }
0x20c5   :  { %v6733_v40 = vpop.eup %6732 }
0x20c6   :  { %v6735_v45 = vpop.eup %6734  ;;  %v4869_v4 = vsel %vm195_vm0, %v6733_v40, 0.0 }
0x20c7   :  { %4870 = vadd.xlane.f32.xlu1 %v4869_v4  ;;  %v4477_v31 = vmul.f32 %v6735_v45, %v6727_v30 }
0x20c9   :  { %v6737_v32 = vpop.eup %6736  ;;  %6503 = vmatprep.mubr.msk.f32.mxu1 %vm195_vm0, %v4477_v31 }
0x20ca   :  { %v4479_v8 = vmul.f32 %v6737_v32, %v6729_v0 }
0x20cc   :  { %6504 = vmatmul.mubr.msk.f32.vlgmr.msra.gmra.mxu1 %vm195_vm0, %v4479_v8 }
0x20cd   :  { %6518 = vmatpush3.msra.mxu1 %v7902_v3 }
0x20ce   :  { %6519 = vmatprep.subr.mxu1 %v4878_v23 }
0x20cf   :  { %6520 = vmatpush3.msra.mxu1 %v4878_v23 }
0x20d0   :  { %6521 = vmatprep.subr.mxu1 %v4877_v34 }
0x20d1   :  { %6522 = vmatpush3.msra.mxu1 %v4877_v34 }
0x20d2   :  { %6523 = vmatprep.subr.mxu1 %v4876_v37 }
0x20d3   :  { %6524 = vmatpush3.msra.mxu1 %v4876_v37 }
0x20d4   :  { %6528 = vmatprep.subr.msk.mxu1 %vm195_vm0, %v4966_v48 }
0x20d9   :  { %5167 = vrot.lane.b32.xlu0 %v7725_v35, %s6911_s8  ;;  %v4964_v35 = vmul.f32 %v7815_v19, %v7030_v16 }
0x214c   :  { %v4868_v52 = vpop.xlane.xlu0 %4867 }
0x214d   :  { %6738 = vrcp.f32 %v4868_v52 }
0x2150   :  { %v4871_v3 = vpop.xlane.xlu1 %4870  ;;  %v5168_v12 = vpop.permute.xlu0 %5167 }
0x2151   :  { %6740 = vrcp.f32 %v4871_v3 }
0x215a   :  { %v6739_v55 = vpop.eup %6738 }
0x215b   :  { %v4873_v26 = vmul.f32 %v6739_v55, %v6731_v38 }
0x215d   :  { %6525 = vmatprep.mubr.msk.f32.mxu1 %vm195_vm0, %v4873_v26 }
0x215e   :  { %v6741_v41 = vpop.eup %6740 }
0x215f   :  { %v4875_v6 = vmul.f32 %v6741_v41, %v6733_v40 }
0x2161   :  { %6526 = vmatmul.mubr.msk.f32.vlgmr.msra.gmra.mxu1 %vm195_vm0, %v4875_v6 }
0x2162   :  { %6529 = vmatpush3.xpose.msk.msra.mxu1 %vm195_vm0, %v4966_v48  ;;  %6536 = vmatprep.mubr.msk.f32.mxu1 %vm195_vm0, %v7847_v24 }
0x2163   :  { %6530 = vmatprep.subr.msk.mxu1 %vm195_vm0, %v4965_v15 }
0x2166   :  { %6531 = vmatpush3.xpose.msk.msra.mxu1 %vm195_vm0, %v4965_v15 }
0x2167   :  { %6532 = vmatprep.subr.msk.mxu1 %vm195_vm0, %v4964_v35 }
0x216a   :  { %6533 = vmatpush3.xpose.msk.msra.mxu1 %vm195_vm0, %v4964_v35 }
0x216b   :  { %6534 = vmatprep.subr.msk.mxu1 %vm195_vm0, %v4963_v27 }
0x216e   :  { %6535 = vmatpush3.xpose.msk.msra.mxu1 %vm195_vm0, %v4963_v27  ;;  %v2881_v27 = vld [vmem:[#allocation10 + $0x50] sm:$0xff] }
0x2171   :  { %6537 = vmatmul.mubr.msk.f32.vlgmr.msra.gmra.mxu1 %vm195_vm0, %v7852_v29 }
0x218c   :  { %v6505_v20 = vpop.f32.mrf.mxu1 }
0x218d   :  { %v4760_v19 = vadd.f32 %v6505_v20, %v7934_v57  ;;  %v2880_v20 = vld [vmem:[#allocation10 + $0x48] sm:$0xff] }
0x218e   :  { %v4754_v24 = vpop.f32.mrf.mxu1 }
0x2221   :  { %v6527_v2 = vpop.f32.mrf.mxu1 }
0x2222   :  { %v4962_v14 = vadd.f32 %v6527_v2, %v4760_v19  ;;  %v2886_v19 = vld [vmem:[#allocation10 + $0x78] sm:$0xff]  ;;  %v2885_v2 = vld [vmem:[#allocation10 + $0x70] sm:$0xff] }
0x2223   :  { %v4952_v36 = vpop.f32.mrf.mxu1 }
0x2231   :  { %v6538_v22 = vpop.f32.mrf.mxu1 }
0x2232   :  { %v5051_v58 = vadd.f32 %v6538_v22, %v7121_v53 }
0x2233   :  { %v5045_v49 = vpop.f32.mrf.mxu1 }
0x2234   :  { %v5046_v16 = vadd.f32 %v5045_v49, %v7123_v56  ;;  %v5057_v51 = vsel %vm195_vm0, %v5051_v58, -inf }
0x2236   :  { %v5054_v44 = vsel %vm195_vm0, %v5046_v16, -inf }
0x2237   :  { %5055 = vmax.xlane.f32.xlu1 %v5054_v44 }
0x223b   :  { %5058 = vmax.xlane.f32.xlu1 %v5057_v51 }
0x22c0   :  { %v5056_v29 = vpop.xlane.xlu1 %5055 }
0x22c1   :  { %v5060_v59 = vsub.f32 %v5046_v16, %v5056_v29 }
0x22c3   :  { %v5062_v63 = vmul.f32 1.442695, %v5060_v59 }
0x22c4   :  { %v5059_v13 = vpop.xlane.xlu1 %5058 }
0x22c5   :  { %6742 = vpow2.f32 %v5062_v63  ;;  %v5061_v57 = vsub.f32 %v5051_v58, %v5059_v13 }
0x22c7   :  { %v5064_v30 = vmul.f32 1.442695, %v5061_v57 }
0x22c9   :  { %6744 = vpow2.f32 %v5064_v30 }
0x22d2   :  { %v6743_v11 = vpop.eup %6742 }
0x22d3   :  { %v5066_v0 = vsel %vm195_vm0, %v6743_v11, 0.0 }
0x22d4   :  { %5067 = vadd.xlane.f32.xlu1 %v5066_v0 }
0x22d6   :  { %v6745_v56 = vpop.eup %6744 }
0x22d7   :  { %v5069_v53 = vsel %vm195_vm0, %v6745_v56, 0.0 }
0x22d8   :  { %5070 = vadd.xlane.f32.xlu1 %v5069_v53 }
0x22e9   :  { %5169 = vrot.lane.b32.xlu1 %v7727_v50, %s6911_s8 }
0x22ed   :  { %5165 = vrot.lane.b32.xlu1 %v7735_v5, %s6911_s8 }
0x22f1   :  { %5163 = vrot.lane.b32.xlu1 %v7740_v18, %s6911_s8 }
0x22f5   :  { %5175 = vrot.lane.b32.xlu1 %v7767_v17, %s6911_s8  ;;  %v4755_v17 = vadd.f32 %v4754_v24, %v7936_v21  ;;  %v2879_v24 = vld [vmem:[#allocation10 + $0x40] sm:$0xff] }
0x22f7   :  { %v4961_v62 = vadd.f32 %v4952_v36, %v4755_v17  ;;  %v2883_v36 = vld [vmem:[#allocation10 + $0x60] sm:$0xff] }
0x235d   :  { %v5068_v60 = vpop.xlane.xlu1 %5067 }
0x235e   :  { %6746 = vrcp.f32 %v5068_v60 }
0x2361   :  { %v5071_v10 = vpop.xlane.xlu1 %5070 }
0x2362   :  { %6748 = vrcp.f32 %v5071_v10 }
0x2365   :  { %v5170_v43 = vpop.permute.xlu1 %5169 }
0x2366   :  { %6550 = vmatprep.subr.mxu0 %v5170_v43 }
0x2369   :  { %v5166_v5 = vpop.permute.xlu1 %5165 }
0x236b   :  { %v6747_v42 = vpop.eup %6746 }
0x236c   :  { %v5073_v46 = vmul.f32 %v6747_v42, %v6743_v11 }
0x236d   :  { %v5164_v18 = vpop.permute.xlu1 %5163 }
0x236e   :  { %6547 = vmatprep.mubr.msk.f32.mxu0 %vm195_vm0, %v5073_v46 }
0x236f   :  { %v6749_v50 = vpop.eup %6748 }
0x2370   :  { %v5075_v54 = vmul.f32 %v6749_v50, %v6745_v56 }
0x2371   :  { %v5176_v45 = vpop.permute.xlu1 %5175 }
0x2372   :  { %6548 = vmatmul.mubr.msk.f32.vlgmr.msra.gmra.mxu0 %vm195_vm0, %v5075_v54 }
0x2373   :  { %6551 = vmatpush3.msra.mxu0 %v5170_v43 }
0x2374   :  { %6552 = vmatprep.subr.mxu0 %v5168_v12 }
0x2375   :  { %6553 = vmatpush3.msra.mxu0 %v5168_v12 }
0x2376   :  { %6554 = vmatprep.subr.mxu0 %v5166_v5 }
0x2377   :  { %6555 = vmatpush3.msra.mxu0 %v5166_v5 }
0x2378   :  { %6556 = vmatprep.subr.mxu0 %v5164_v18 }
0x2379   :  { %6557 = vmatpush3.msra.mxu0 %v5164_v18 }
0x2432   :  { %v6549_v28 = vpop.f32.mrf.mxu0 }
0x2433   :  { %v5162_v40 = vadd.f32 %v6549_v28, %v4962_v14  ;;  %v2884_v14 = vld [vmem:[#allocation10 + $0x68] sm:$0xff] }
0x2434   :  { %v5152_v38 = vpop.f32.mrf.mxu0 }
0x2435   :  { %v5161_v39 = vadd.f32 %v5152_v38, %v4961_v62 }
0x2437   :  { %6558 = vmatprep.mubr.msk.f32.mxu0 %vm195_vm0, %v5161_v39 }
0x2438   :  { %6559 = vmatmul.mubr.msk.f32.vlgmr.msra.gmra.mxu0 %vm195_vm0, %v5162_v40 }
0x24f8   :  { %v6560_v4 = vpop.f32.mrf.mxu0 }
0x24f9   :  { %v5256_v31 = vadd.f32 %v6560_v4, %v5176_v45 }
0x24fa   :  { %v5250_v32 = vpop.f32.mrf.mxu0 }
0x24fb   :  { %v5260_v8 = vadd.f32 %v5256_v31, %v7781_v61  ;;  %v5251_v23 = vadd.f32 %v5250_v32, %v5176_v45 }
0x24fd   :  { %v5259_v34 = vadd.f32 %v5251_v23, %v7783_v1  ;;  %v5264_v21 = vsel %vm195_vm0, %v5260_v8, 0.0  ;;  %v2882_v1 = vld [vmem:[#allocation10 + $0x58] sm:$0xff] }
0x24fe   :  { %5265 = vadd.xlane.f32.xlu0 %v5264_v21  ;;  %6561 = vmatprep.subr.mxu1 %v2882_v1 }
0x24ff   :  { %v5261_v37 = vsel %vm195_vm0, %v5259_v34, 0.0  ;;  %6562 = vmatpush3.msra.mxu1 %v2882_v1 }
0x2500   :  { %5262 = vadd.xlane.f32.xlu1 %v5261_v37  ;;  %6563 = vmatprep.subr.mxu1 %v2881_v27 }
0x2501   :  { %6564 = vmatpush3.msra.mxu1 %v2881_v27 }
0x2502   :  { %6565 = vmatprep.subr.mxu1 %v2880_v20 }
0x2503   :  { %6566 = vmatpush3.msra.mxu1 %v2880_v20 }
0x2504   :  { %6567 = vmatprep.subr.mxu1 %v2879_v24 }
0x2505   :  { %6568 = vmatpush3.msra.mxu1 %v2879_v24 }
0x2587   :  { %v5266_v48 = vpop.xlane.xlu0 %5265 }
0x2588   :  { %v5268_v52 = vmul.f32 0.03125, %v5266_v48 }
0x2589   :  { %v5263_v3 = vpop.xlane.xlu1 %5262 }
0x258a   :  { %v5270_v55 = vsub.f32 %v5260_v8, %v5268_v52  ;;  %v5267_v26 = vmul.f32 0.03125, %v5263_v3 }
0x258c   :  { %v5269_v41 = vsub.f32 %v5259_v34, %v5267_v26  ;;  %v5272_v6 = vmul.f32 %v5270_v55, %v5270_v55 }
0x258e   :  { %v5276_v15 = vsel %vm195_vm0, %v5272_v6, 0.0  ;;  %v5271_v35 = vmul.f32 %v5269_v41, %v5269_v41 }
0x258f   :  { %5277 = vadd.xlane.f32.xlu1 %v5276_v15 }
0x2590   :  { %v5273_v61 = vsel %vm195_vm0, %v5271_v35, 0.0 }
0x2591   :  { %5274 = vadd.xlane.f32.xlu0 %v5273_v61 }
0x25a0   :  { %5292 = vrot.lane.b32.xlu1 %v7756_v25, %s6911_s8 }
0x25a4   :  { %5406 = vrot.lane.b32.xlu1 %v2886_v19, %s6909_s28 }
0x25a7   :  { %5287 = vrot.lane.b32.xlu0 %v7756_v25, %s6909_s28  ;;  %v8020_v25 = vld [vmem:[%s8060_s6 + $0x8] sm:$0x1f]  ;;  %s6912_s6 = smov [#allocation11]  }
0x25a8   :  { %5402 = vrot.lane.b32.xlu1 %v2884_v14, %s6909_s28  ;;  %v5300_v22 = vrot.slane %v8020_v25, %v2626_v7  ;;  %v5532_v21 = vrot.slane %v8020_v25, %v2859_v47 }
0x25ab   :  { %5404 = vrot.lane.b32.xlu0 %v2885_v2, %s6909_s28 }
0x25ac   :  { %5398 = vrot.lane.b32.xlu1 %v2882_v1, %s6909_s28 }
0x25af   :  { %5400 = vrot.lane.b32.xlu0 %v2883_v36, %s6909_s28 }
0x25b0   :  { %5394 = vrot.lane.b32.xlu1 %v2880_v20, %s6909_s28 }
0x25b3   :  { %5396 = vrot.lane.b32.xlu0 %v2881_v27, %s6909_s28 }
0x25b4   :  { %5417 = vrot.lane.b32.xlu1 %v5300_v22, %s6909_s28 }
0x25b7   :  { %5392 = vrot.lane.b32.xlu0 %v2879_v24, %s6909_s28 }
0x2618   :  { %v5278_v49 = vpop.xlane.xlu1 %5277 }
0x2619   :  { %v5280_v16 = vmul.f32 0.03125, %v5278_v49 }
0x261a   :  { %v5275_v58 = vpop.xlane.xlu0 %5274 }
0x261b   :  { %v5282_v44 = vadd.f32 1e-05, %v5280_v16  ;;  %v5279_v51 = vmul.f32 0.03125, %v5275_v58 }
0x261c   :  { %v5293_v59 = vpop.permute.xlu1 %5292 }
0x261d   :  { %6750 = vrsqrt.f32 %v5282_v44  ;;  %v5281_v29 = vadd.f32 1e-05, %v5279_v51 }
0x261e   :  { %v5288_v63 = vpop.permute.xlu0 %5287 }
0x261f   :  { %6752 = vrsqrt.f32 %v5281_v29 }
0x2620   :  { %v5407_v13 = vpop.permute.xlu1 %5406 }
0x2621   :  { %6572 = vmatprep.subr.mxu0 %v5407_v13 }
0x2622   :  { %v5405_v57 = vpop.permute.xlu0 %5404  ;;  %6573 = vmatpush3.msra.mxu0 %v5407_v13 }
0x2623   :  { %6574 = vmatprep.subr.mxu0 %v5405_v57 }
0x2624   :  { %6575 = vmatpush3.msra.mxu0 %v5405_v57  ;;  %v5403_v7 = vpop.permute.xlu1 %5402 }
0x2625   :  { %6576 = vmatprep.subr.mxu0 %v5403_v7 }
0x2626   :  { %v5401_v56 = vpop.permute.xlu0 %5400  ;;  %6577 = vmatpush3.msra.mxu0 %v5403_v7 }
0x2627   :  { %6578 = vmatprep.subr.mxu0 %v5401_v56 }
0x2628   :  { %6579 = vmatpush3.msra.mxu0 %v5401_v56  ;;  %v5399_v43 = vpop.permute.xlu1 %5398 }
0x2629   :  { %6580 = vmatprep.subr.mxu0 %v5399_v43 }
0x262a   :  { %v6751_v30 = vpop.eup %6750  ;;  %v5397_v42 = vpop.permute.xlu0 %5396  ;;  %6581 = vmatpush3.msra.mxu0 %v5399_v43 }
0x262b   :  { %v5286_v11 = vmul.f32 %v6751_v30, %v5270_v55  ;;  %6582 = vmatprep.subr.mxu0 %v5397_v42 }
0x262c   :  { %v6753_v0 = vpop.eup %6752  ;;  %6583 = vmatpush3.msra.mxu0 %v5397_v42  ;;  %v5395_v54 = vpop.permute.xlu1 %5394 }
0x262d   :  { %v5285_v53 = vmul.f32 %v6753_v0, %v5269_v41  ;;  %v5291_v60 = vmul.f32 %v5288_v63, %v5286_v11  ;;  %6584 = vmatprep.subr.mxu0 %v5395_v54 }
0x262e   :  { %v5393_v12 = vpop.permute.xlu0 %5392  ;;  %6585 = vmatpush3.msra.mxu0 %v5395_v54 }
0x262f   :  { %v5290_v10 = vmul.f32 %v5288_v63, %v5285_v53  ;;  %v5296_v50 = vadd.f32 %v5293_v59, %v5291_v60  ;;  %6586 = vmatprep.subr.mxu0 %v5393_v12 }
0x2630   :  { %6587 = vmatpush3.msra.mxu0 %v5393_v12  ;;  %v5418_v39 = vpop.permute.xlu1 %5417 }
0x2631   :  { %v5295_v46 = vadd.f32 %v5293_v59, %v5290_v10 }
0x2633   :  { %6569 = vmatprep.mubr.msk.f32.mxu1 %vm195_vm0, %v5295_v46 }
0x2634   :  { %6570 = vmatmul.mubr.msk.f32.vlgmr.msra.gmra.mxu1 %vm195_vm0, %v5296_v50 }
0x26f4   :  { %v6571_v5 = vpop.f32.mrf.mxu1 }
0x26f5   :  { %v5379_v18 = vadd.f32 %v6571_v5, %v5300_v22 }
0x26f6   :  { %v5373_v17 = vpop.f32.mrf.mxu1 }
0x26f7   :  { %v5374_v28 = vadd.f32 %v5373_v17, %v5300_v22  ;;  %v5383_v38 = vmax.f32 %v5379_v18, 0.0 }
0x26f9   :  { %v5382_v62 = vmax.f32 %v5374_v28, 0.0 }
0x26fb   :  { %6588 = vmatprep.mubr.msk.f32.mxu0 %vm2747_vm14, %v5382_v62 }
0x26fc   :  { %6589 = vmatmul.mubr.msk.f32.vlgmr.msra.gmra.mxu0 %vm2747_vm14, %v5383_v38 }
0x27bc   :  { %v6590_v40 = vpop.f32.mrf.mxu0 }
0x27bd   :  { %v5498_v45 = vadd.f32 %v6590_v40, %v5418_v39 }
0x27be   :  { %v5492_v4 = vpop.f32.mrf.mxu0 }
0x27bf   :  { %v5493_v31 = vadd.f32 %v5492_v4, %v5418_v39  ;;  %v5502_v32 = vadd.f32 %v5498_v45, %v5296_v50 }
0x27c1   :  { %v5501_v8 = vadd.f32 %v5493_v31, %v5295_v46  ;;  %v5506_v23 = vsel %vm195_vm0, %v5502_v32, 0.0 }
0x27c2   :  { %5507 = vadd.xlane.f32.xlu1 %v5506_v23 }
0x27c3   :  { %v5503_v34 = vsel %vm195_vm0, %v5501_v8, 0.0 }
0x27c4   :  { %5504 = vadd.xlane.f32.xlu0 %v5503_v34 }
0x27d3   :  { %5536 = vrot.lane.b32.xlu1 %v5532_v21, %s6907_s3  ;;  %s5584_s3 = sshll.u32 %s6912_s6, 4  ;;  %s5585_s3 = int_to_ptr.vmem [resolvable:$true] %s5584_s3 }
0x27d4   :  { %s6870_s5 = scalar_lea.vmem %s5585_s3, 256  ;;  %p6875_p12 = scmp.lt.s32.totalorder %s5585_s3, %s5585_s3 }
0x27d5   :  { %p6871_p11 = scmp.ne.s32.totalorder %s5585_s3, %s6870_s5  ;;  %p6876_p13 = scmp.lt.s32.totalorder %s6870_s5, %s6870_s5 }
0x27d7   :  { %5572 = vrot.lane.b32.xlu1 %v7561_v33, %s6911_s8  ;;  %p6877_p0 = por %p6876_p13, %p6875_p12 }
0x27d9   :  { %p6878_p1 = pnand %p6877_p0, %p6871_p11 }
0x284b   :  { %v5508_v37 = vpop.xlane.xlu1 %5507 }
0x284c   :  { %v5510_v48 = vmul.f32 0.03125, %v5508_v37 }
0x284d   :  { %v5505_v52 = vpop.xlane.xlu0 %5504 }
0x284e   :  { %v5509_v3 = vmul.f32 0.03125, %v5505_v52  ;;  %v5512_v55 = vsub.f32 %v5502_v32, %v5510_v48 }
0x284f   :  { %v5537_v2 = vpop.permute.xlu1 %5536 }
0x2850   :  { %v5511_v26 = vsub.f32 %v5501_v8, %v5509_v3  ;;  %v5514_v15 = vmul.f32 %v5512_v55, %v5512_v55 }
0x2852   :  { %v5513_v41 = vmul.f32 %v5511_v26, %v5511_v26  ;;  %v5518_v9 = vsel %vm195_vm0, %v5514_v15, 0.0 }
0x2853   :  { %v5573_v12 = vpop.permute.xlu1 %5572 }
0x2854   :  { %v5515_v6 = vsel %vm195_vm0, %v5513_v41, 0.0 }
0x2855   :  { %5516 = vadd.xlane.f32.xlu0 %v5515_v6 }
0x2859   :  { %5519 = vadd.xlane.f32.xlu0 %v5518_v9 }
0x28de   :  { %v5517_v47 = vpop.xlane.xlu0 %5516 }
0x28df   :  { %v5521_v35 = vmul.f32 0.03125, %v5517_v47 }
0x28e1   :  { %v5523_v61 = vadd.f32 1e-05, %v5521_v35 }
0x28e2   :  { %v5520_v1 = vpop.xlane.xlu0 %5519 }
0x28e3   :  { %6754 = vrsqrt.f32 %v5523_v61  ;;  %v5522_v27 = vmul.f32 0.03125, %v5520_v1 }
0x28e5   :  { %v5524_v20 = vadd.f32 1e-05, %v5522_v27 }
0x28e7   :  { %6756 = vrsqrt.f32 %v5524_v20 }
0x28f0   :  { %v6755_v24 = vpop.eup %6754 }
0x28f1   :  { %v5527_v19 = vmul.f32 %v6755_v24, %v5511_v26 }
0x28f3   :  { %v5533_v14 = vmul.f32 %v5532_v21, %v5527_v19 }
0x28f4   :  { %v6757_v36 = vpop.eup %6756 }
0x28f5   :  { %v5528_v25 = vmul.f32 %v6757_v36, %v5512_v55  ;;  %v5539_v22 = vadd.f32 %v5537_v2, %v5533_v14 }
0x28f7   :  { %v5534_v49 = vmul.f32 %v5532_v21, %v5528_v25  ;;  %v5541_v16 = vsel %vm195_vm0, %v5539_v22, 0.0 }
0x28f8   :  { %5542 = vadd.xlane.f32.xlu0 %v5541_v16 }
0x28f9   :  { %v5540_v58 = vadd.f32 %v5537_v2, %v5534_v49 }
0x28fb   :  { %v5544_v44 = vsel %vm195_vm0, %v5540_v58, 0.0 }
0x28fc   :  { %5545 = vadd.xlane.f32.xlu0 %v5544_v44 }
0x2981   :  { %v5543_v51 = vpop.xlane.xlu0 %5542 }
0x2982   :  { %v5547_v29 = vmul.f32 0.03125, %v5543_v51 }
0x2984   :  { %v5549_v59 = vsub.f32 %v5539_v22, %v5547_v29 }
0x2985   :  { %v5546_v63 = vpop.xlane.xlu0 %5545 }
0x2986   :  { %v5548_v13 = vmul.f32 0.03125, %v5546_v63  ;;  %v5551_v57 = vmul.f32 %v5549_v59, %v5549_v59 }
0x2988   :  { %v5550_v30 = vsub.f32 %v5540_v58, %v5548_v13  ;;  %v5553_v11 = vsel %vm195_vm0, %v5551_v57, 0.0 }
0x2989   :  { %5554 = vadd.xlane.f32.xlu0 %v5553_v11 }
0x298a   :  { %v5552_v7 = vmul.f32 %v5550_v30, %v5550_v30 }
0x298c   :  { %v5556_v0 = vsel %vm195_vm0, %v5552_v7, 0.0 }
0x298d   :  { %5557 = vadd.xlane.f32.xlu0 %v5556_v0 }
0x29a3   :  { %5567 = vrot.lane.b32.xlu0 %v7561_v33, %s6909_s28 }
0x2a12   :  { %v5555_v56 = vpop.xlane.xlu0 %5554 }
0x2a13   :  { %v5559_v53 = vmul.f32 0.03125, %v5555_v56 }
0x2a15   :  { %v5561_v60 = vadd.f32 1e-05, %v5559_v53 }
0x2a16   :  { %v5558_v10 = vpop.xlane.xlu0 %5557 }
0x2a17   :  { %6758 = vrsqrt.f32 %v5561_v60  ;;  %v5560_v43 = vmul.f32 0.03125, %v5558_v10 }
0x2a19   :  { %v5562_v42 = vadd.f32 1e-05, %v5560_v43 }
0x2a1a   :  { %v5568_v50 = vpop.permute.xlu0 %5567 }
0x2a1b   :  { %6760 = vrsqrt.f32 %v5562_v42 }
0x2a24   :  { %v6759_v46 = vpop.eup %6758 }
0x2a25   :  { %v5565_v54 = vmul.f32 %v6759_v46, %v5549_v59 }
0x2a27   :  { %v5570_v5 = vmul.f32 %v5568_v50, %v5565_v54 }
0x2a28   :  { %v6761_v18 = vpop.eup %6760 }
0x2a29   :  { %v5566_v17 = vmul.f32 %v6761_v18, %v5550_v30  ;;  %v5575_v28 = vadd.f32 %v5573_v12, %v5570_v5 }
0x2a2b   :  { %v5571_v62 = vmul.f32 %v5568_v50, %v5566_v17  ;;  %5577 = vst.msk [vmem:[#allocation11] sm:$0xff] %vm195_vm0, %v5575_v28 }
0x2a2d   :  { %v5576_v33 = vadd.f32 %v5573_v12, %v5571_v62 }
0x2a2f   :  { %5578 = vst.msk [vmem:[#allocation11 + $0x8] sm:$0xff] %vm195_vm0, %v5576_v33 }
0x2a30   :  { %6881 = shalt.err (!%p6878_p1)
}
0x2a31   :  { %5590 = dma.vmem_to_hbm [thread:$0]  %s5585_s3, 256, %s8061_s7, [#allocation4], %s6900_s29, %s6900_s29, %s6901_s30  }
0x2a32   :  { %6896 = dma.done.wait [#allocation4], 256  }
0x2a33   :  { %6897 = vsyncadd [#allocation4], 4294967040 }
0x2a34   :  { %5594 = vsyncpa [#allocation3], 1 }
0x2a35   :  { %5595 = vsyncpa [#allocation6], 1 }
0x2a36   :  { %5596 = vsyncpa [#allocation9], 1 }
0x2a37   :  { %5597 = vsyncpa [#allocation4], 1 }

</bundles_post_ra>
